<compile_context>
chip_gen: v7x
topology: tpu7x:2x2x1
jax: 0.10.0
libtpu: 0.0.40
codegen_flags: <defaults>
</compile_context>

<pallas_src>
import functools

import jax
import jax.numpy as jnp
from jax.experimental import pallas as pl
from jax.experimental.pallas import tpu as pltpu

EPS = 1e-5  # torch.nn.LayerNorm default


def _layer_norm(y, gamma, beta):
    mu = jnp.mean(y, axis=-1, keepdims=True)
    var = jnp.mean(jnp.square(y - mu), axis=-1, keepdims=True)
    return (y - mu) * jax.lax.rsqrt(var + EPS) * gamma + beta


# ------------------------- fused decoder-layer kernel -----------------------

def _decoder_layer_kernel(
        lens_ref,                                            # SMEM (B,) int32
        dec_ref, enc_ref,
        wq_ref, bq_ref, wk_ref, bk_ref, wv_ref, bv_ref,
        wfc_ref, bfc_ref, ln1g_ref, ln1b_ref,
        w1_ref, b1_ref, w2_ref, b2_ref, ln2g_ref, ln2b_ref,
        out_ref, attn_ref,
        q_scr, k_scr, v_scr, ctx_scr,
        *, n_head, d_k, d_v, lk_valid, inv_temp):
    Bb, Lq, D = dec_ref.shape
    _, Lkp, _ = enc_ref.shape
    Mq = Bb * Lq
    Mk = Bb * Lkp
    b0 = pl.program_id(0) * Bb

    # ---- validity masks rebuilt from valid_lens (scalar prefetch; replaces the
    #      (B, Lq, 1) HBM mask input and its masked last-dim-1 loads).
    ridx = jax.lax.broadcasted_iota(jnp.int32, (Mq, 1), 0)
    lidx = jax.lax.broadcasted_iota(jnp.int32, (Bb, Lq, 1), 1)
    bidx = jax.lax.broadcasted_iota(jnp.int32, (Bb, Lq, 1), 0)
    mflat = jnp.zeros((Mq, 1), jnp.float32)       # (Bb*Lq, 1) query-row mask
    m3 = jnp.zeros((Bb, Lq, 1), jnp.float32)      # (Bb, Lq, 1) query-row mask
    for i in range(Bb):                           # tiny static loop
        n_i = lens_ref[b0 + i]
        mflat = jnp.where((ridx >= i * Lq) & (ridx < i * Lq + n_i), 1.0, mflat)
        m3 = jnp.where((bidx == i) & (lidx < n_i), 1.0, m3)

    xf = dec_ref[...].reshape(Mq, D)              # f32 residual (exact)
    xb = xf.astype(jnp.bfloat16)
    eb = enc_ref[...].reshape(Mk, D).astype(jnp.bfloat16)

    # ---- q/k/v projections, head-major, staged once in bf16 VMEM scratch.
    #      Live ranges are bounded per head by the scratch stores.
    for h in range(n_head):
        qh = jnp.dot(xb, wq_ref[h], preferred_element_type=jnp.float32) + bq_ref[h]
        q_scr[h * Bb:(h + 1) * Bb] = (
            (qh * inv_temp).reshape(Bb, Lq, d_k).astype(jnp.bfloat16))
        kh = jnp.dot(eb, wk_ref[h], preferred_element_type=jnp.float32) + bk_ref[h]
        k_scr[h * Bb:(h + 1) * Bb] = kh.reshape(Bb, Lkp, d_k).astype(jnp.bfloat16)
        vh = jnp.dot(eb, wv_ref[h], preferred_element_type=jnp.float32) + bv_ref[h]
        v_scr[h * Bb:(h + 1) * Bb] = vh.reshape(Bb, Lkp, d_v).astype(jnp.bfloat16)

    q_all = q_scr[...]                            # (G, Lq,  d_k) bf16, G = n_head*Bb
    k_all = k_scr[...]                            # (G, Lkp, d_k) bf16
    v_all = v_scr[...]                            # (G, Lkp, d_v) bf16

    # ---- one head(+batch)-batched QK^T; padded keys masked before softmax.
    s = jnp.einsum('gqd,gkd->gqk', q_all, k_all,
                   preferred_element_type=jnp.float32)        # (G, Lq, Lkp)
    if Lkp != lk_valid:
        kpos = jax.lax.broadcasted_iota(jnp.int32, (1, 1, Lkp), 2)
        s = jnp.where(kpos < lk_valid, s, -1e30)
    # TODO(synk): co_attn_mask (masked_fill) not plumbed; call sites pass None.
    s_max = jnp.max(s, axis=-1, keepdims=True)
    p = jnp.exp(s - s_max)
    # Exact normalization: these probabilities are returned as dec_co_attn.
    attn = p / jnp.sum(p, axis=-1, keepdims=True)             # (G, Lq, Lkp) f32

    ctx = jnp.einsum('gqk,gkd->gqd', attn.astype(jnp.bfloat16), v_all,
                     preferred_element_type=jnp.float32)      # (G, Lq, d_v)

    # dec_co_attn *= non_pad_mask (returned attention only); written per head
    # into the contiguous (Bb, n_head, Lq, Lkp) block -> one HBM DMA per step.
    # Context slabs staged into (Mq, Hv) scratch for a single full-K fc matmul.
    for h in range(n_head):
        attn_ref[:, h] = attn[h * Bb:(h + 1) * Bb] * m3
        ctx_scr[:, h * d_v:(h + 1) * d_v] = (
            ctx[h * Bb:(h + 1) * Bb].reshape(Mq, d_v).astype(jnp.bfloat16))

    # fc (K = n_head*d_v) + residual + LayerNorm, then dec_output *= mask
    fc = jnp.dot(ctx_scr[...], wfc_ref[...], preferred_element_type=jnp.float32)
    d1 = _layer_norm(fc + bfc_ref[...] + xf, ln1g_ref[...], ln1b_ref[...]) * mflat

    # PositionwiseFeedForward (Conv1d k=1 == matmul) + residual + LN, then mask
    hdn = jnp.dot(d1.astype(jnp.bfloat16), w1_ref[...],
                  preferred_element_type=jnp.float32) + b1_ref[...]
    hdn = jnp.maximum(hdn, 0.0)                                # ReLU
    h2 = jnp.dot(hdn.astype(jnp.bfloat16), w2_ref[...],
                 preferred_element_type=jnp.float32) + b2_ref[...]
    out = _layer_norm(h2 + d1, ln2g_ref[...], ln2b_ref[...]) * mflat
    out_ref[...] = out.reshape(Bb, Lq, D)


# ------------------------------ JAX glue ------------------------------------

def init_params(key, d_model, d_inner, n_head, d_k, d_v):
    ks = jax.random.split(key, 10)
    n = lambda k, shp, s=0.02: (s * jax.random.normal(k, shp)).astype(jnp.float32)
    return dict(
        w_qs=n(ks[0], (d_model, n_head * d_k)), b_qs=n(ks[1], (n_head * d_k,)),
        w_ks=n(ks[2], (d_model, n_head * d_k)), b_ks=n(ks[3], (n_head * d_k,)),
        w_vs=n(ks[4], (d_model, n_head * d_v)), b_vs=n(ks[5], (n_head * d_v,)),
        w_fc=n(ks[6], (n_head * d_v, d_model)), b_fc=n(ks[7], (d_model,)),
        ln1_g=jnp.ones((d_model,), jnp.float32), ln1_b=jnp.zeros((d_model,), jnp.float32),
        w1=n(ks[8], (d_model, d_inner)), b1=jnp.zeros((d_inner,), jnp.float32),
        w2=n(ks[9], (d_inner, d_model)), b2=jnp.zeros((d_model,), jnp.float32),
        ln2_g=jnp.ones((d_model,), jnp.float32), ln2_b=jnp.zeros((d_model,), jnp.float32),
    )


def decoder_layer_forward(params, dec_input, enc_input, valid_lens, *,
                          n_head, d_k, d_v, batch_block=None):
    """valid_lens (B,) int32 replaces the (B, Lq, 1) non_pad_mask (prefix-valid
    padding, as produced by get_non_pad_mask in the reference)."""
    B, Lq, D = dec_input.shape
    _, Lk, _ = enc_input.shape
    d_inner = params["w1"].shape[1]
    Hv = n_head * d_v
    bf16 = jnp.bfloat16

    if batch_block is None:
        # keep the grid length >= 2 (both v7x TensorCores) while fattening M.
        batch_block = 1 if B <= 2 else max(
            d for d in range(1, B + 1) if B % d == 0 and B // d >= 2)
    Bb = batch_block
    assert B % Bb == 0, "batch_block must divide the batch size"
    assert valid_lens.shape == (B,)
    nb = B // Bb
    G = n_head * Bb

    # Pad keys to a lane-dense multiple of 128; padded keys masked in-kernel.
    Lkp = ((Lk + 127) // 128) * 128
    enc_p = enc_input if Lkp == Lk else jnp.pad(
        enc_input, ((0, 0), (0, Lkp - Lk), (0, 0)))

    # Head-major bf16 weights (no in-kernel lane slicing at non-128 offsets);
    # w_fc stays un-reshaped (Hv, D) for the single full-K output projection.
    wq = params["w_qs"].reshape(D, n_head, d_k).transpose(1, 0, 2).astype(bf16)
    wk = params["w_ks"].reshape(D, n_head, d_k).transpose(1, 0, 2).astype(bf16)
    wv = params["w_vs"].reshape(D, n_head, d_v).transpose(1, 0, 2).astype(bf16)
    bq = params["b_qs"].reshape(n_head, 1, d_k)
    bk = params["b_ks"].reshape(n_head, 1, d_k)
    bv = params["b_vs"].reshape(n_head, 1, d_v)
    wfc = params["w_fc"].astype(bf16)
    w1 = params["w1"].astype(bf16)
    w2 = params["w2"].astype(bf16)
    row = lambda a: a.reshape(1, -1)

    # constant index maps -> weights DMA'd once and stay VMEM-resident.
    c2 = lambda s: pl.BlockSpec(s, lambda b, lens: (0, 0))
    c3 = lambda s: pl.BlockSpec(s, lambda b, lens: (0, 0, 0))

    kernel = functools.partial(
        _decoder_layer_kernel, n_head=n_head, d_k=d_k, d_v=d_v,
        lk_valid=Lk, inv_temp=1.0 / float(d_k) ** 0.5)

    dec_out, attn = pl.pallas_call(
        kernel,
        out_shape=(jax.ShapeDtypeStruct((B, Lq, D), jnp.float32),
                   jax.ShapeDtypeStruct((B, n_head, Lq, Lkp), jnp.float32)),
        grid_spec=pltpu.PrefetchScalarGridSpec(
            num_scalar_prefetch=1,
            grid=(nb,),
            in_specs=[
                pl.BlockSpec((Bb, Lq, D), lambda b, lens: (b, 0, 0)),     # dec
                pl.BlockSpec((Bb, Lkp, D), lambda b, lens: (b, 0, 0)),    # enc
                c3((n_head, D, d_k)), c3((n_head, 1, d_k)),               # wq, bq
                c3((n_head, D, d_k)), c3((n_head, 1, d_k)),               # wk, bk
                c3((n_head, D, d_v)), c3((n_head, 1, d_v)),               # wv, bv
                c2((Hv, D)), c2((1, D)),                                  # wfc, bfc
                c2((1, D)), c2((1, D)),                                   # ln1 g/b
                c2((D, d_inner)), c2((1, d_inner)),                       # w1, b1
                c2((d_inner, D)), c2((1, D)),                             # w2, b2
                c2((1, D)), c2((1, D)),                                   # ln2 g/b
            ],
            out_specs=(
                pl.BlockSpec((Bb, Lq, D), lambda b, lens: (b, 0, 0)),
                pl.BlockSpec((Bb, n_head, Lq, Lkp), lambda b, lens: (b, 0, 0, 0)),
            ),
            scratch_shapes=[
                pltpu.VMEM((G, Lq, d_k), bf16),    # q (head-major, pre-scaled)
                pltpu.VMEM((G, Lkp, d_k), bf16),   # k
                pltpu.VMEM((G, Lkp, d_v), bf16),   # v
                pltpu.VMEM((Bb * Lq, Hv), bf16),   # merged per-head contexts
            ]),
        compiler_params=pltpu.CompilerParams(
            dimension_semantics=("parallel",),
            # 48 MiB is safe on every generation; raise to 64-96 MiB on
            # v5e/v6e (128 MiB physical) when using larger batch blocks.
            vmem_limit_bytes=48 * 1024 * 1024),
    )(valid_lens.astype(jnp.int32), dec_input, enc_p,
      wq, bq, wk, bk, wv, bv,
      wfc, row(params["b_fc"]), row(params["ln1_g"]), row(params["ln1_b"]),
      w1, row(params["b1"]), w2, row(params["b2"]),
      row(params["ln2_g"]), row(params["ln2_b"]))

    # Drop key padding and convert to the PyTorch (n_head*B, Lq, Lk) layout
    # (index h*B + b); these are cheap XLA ops outside the kernel.
    if Lkp != Lk:
        attn = attn[..., :Lk]
    dec_co_attn = jnp.transpose(attn, (1, 0, 2, 3)).reshape(n_head * B, Lq, Lk)
    return dec_out, dec_co_attn


# ------------------------- pure-JAX f32 reference ---------------------------

def decoder_layer_reference(params, dec, enc, valid_lens, *, n_head, d_k, d_v):
    B, Lq, D = dec.shape
    _, Lk, _ = enc.shape
    mask = (jnp.arange(Lq)[None, :] < valid_lens[:, None]).astype(
        jnp.float32)[..., None]                              # (B, Lq, 1)
    q = dec @ params["w_qs"] + params["b_qs"]
    k = enc @ params["w_ks"] + params["b_ks"]
    v = enc @ params["w_vs"] + params["b_vs"]
    q = q.reshape(B, Lq, n_head, d_k).transpose(2, 0, 1, 3)
    k = k.reshape(B, Lk, n_head, d_k).transpose(2, 0, 1, 3)
    v = v.reshape(B, Lk, n_head, d_v).transpose(2, 0, 1, 3)
    s = jnp.einsum('hbqd,hbkd->hbqk', q, k) / float(d_k) ** 0.5
    attn = jax.nn.softmax(s, axis=-1)
    ctx = jnp.einsum('hbqk,hbkd->hbqd', attn, v)
    ctx = ctx.transpose(1, 2, 0, 3).reshape(B, Lq, n_head * d_v)
    d1 = _layer_norm(ctx @ params["w_fc"] + params["b_fc"] + dec,
                     params["ln1_g"], params["ln1_b"]) * mask
    h = jax.nn.relu(d1 @ params["w1"] + params["b1"])
    y2 = h @ params["w2"] + params["b2"] + d1
    out = _layer_norm(y2, params["ln2_g"], params["ln2_b"]) * mask
    attn_m = (attn * mask[None]).reshape(n_head * B, Lq, Lk)
    return out, attn_m


# -------------------------------- main --------------------------------------

if __name__ == "__main__":
    B, Lq, Lk = 2, 8, 8
    d_model, d_inner = 32, 64
    n_head, d_k, d_v = 4, 8, 8

    root = jax.random.PRNGKey(0)
    k_dec, k_enc, k_par = jax.random.split(root, 3)

    dec_input = jax.random.normal(k_dec, (B, Lq, d_model), jnp.float32)
    enc_input = jax.random.normal(k_enc, (B, Lk, d_model), jnp.float32)
    # batch 0 fully valid, batch 1 has 3 padded positions (prefix-valid).
    valid_lens = jnp.array([Lq, Lq - 3], jnp.int32)

    params = init_params(k_par, d_model, d_inner, n_head, d_k, d_v)

    dec_output, dec_co_attn = decoder_layer_forward(
        params, dec_input, enc_input, valid_lens,
        n_head=n_head, d_k=d_k, d_v=d_v, batch_block=1)   # grid=(2,)

    jax.block_until_ready(dec_output)
    jax.block_until_ready(dec_co_attn)

    assert dec_output.shape == (B, Lq, d_model)
    assert dec_co_attn.shape == (n_head * B, Lq, Lk)

    ref_out, ref_attn = decoder_layer_reference(
        params, dec_input, enc_input, valid_lens,
        n_head=n_head, d_k=d_k, d_v=d_v)
    assert jnp.allclose(dec_output, ref_out, atol=3e-2, rtol=3e-2), (
        float(jnp.max(jnp.abs(dec_output - ref_out))))
    assert jnp.allclose(dec_co_attn, ref_attn, atol=3e-2, rtol=3e-2), (
        float(jnp.max(jnp.abs(dec_co_attn - ref_attn))))

    print("KERNEL_OK")
</pallas_src>

<mosaic_0001>
module attributes {stable_mosaic.version = 11 : i64} {
  func.func @_decoder_layer_kernel(%arg0: i32, %arg1: memref<2xi32, #tpu.memory_space<smem>>, %arg2: memref<1x8x32xf32, #tpu.memory_space<vmem>>, %arg3: memref<1x128x32xf32, #tpu.memory_space<vmem>>, %arg4: memref<4x32x8xbf16, #tpu.memory_space<vmem>>, %arg5: memref<4x1x8xf32, #tpu.memory_space<vmem>>, %arg6: memref<4x32x8xbf16, #tpu.memory_space<vmem>>, %arg7: memref<4x1x8xf32, #tpu.memory_space<vmem>>, %arg8: memref<4x32x8xbf16, #tpu.memory_space<vmem>>, %arg9: memref<4x1x8xf32, #tpu.memory_space<vmem>>, %arg10: memref<32x32xbf16, #tpu.memory_space<vmem>>, %arg11: memref<1x32xf32, #tpu.memory_space<vmem>>, %arg12: memref<1x32xf32, #tpu.memory_space<vmem>>, %arg13: memref<1x32xf32, #tpu.memory_space<vmem>>, %arg14: memref<32x64xbf16, #tpu.memory_space<vmem>>, %arg15: memref<1x64xf32, #tpu.memory_space<vmem>>, %arg16: memref<64x32xbf16, #tpu.memory_space<vmem>>, %arg17: memref<1x32xf32, #tpu.memory_space<vmem>>, %arg18: memref<1x32xf32, #tpu.memory_space<vmem>>, %arg19: memref<1x32xf32, #tpu.memory_space<vmem>>, %arg20: memref<1x8x32xf32, #tpu.memory_space<vmem>>, %arg21: memref<1x4x8x128xf32, #tpu.memory_space<vmem>>, %arg22: memref<4x8x8xbf16, #tpu.memory_space<vmem>>, %arg23: memref<4x128x8xbf16, #tpu.memory_space<vmem>>, %arg24: memref<4x128x8xbf16, #tpu.memory_space<vmem>>, %arg25: memref<8x32xbf16, #tpu.memory_space<vmem>>) attributes {dimension_semantics = [#tpu.dimension_semantics<parallel>], iteration_bounds = array<i64: 2>, scalar_prefetch = 1 : i64, scratch_operands = 4 : i64, tpu.core_type = #tpu.core_type<tc>, window_params = [{transform_indices = @transform_0, window_bounds = array<i64: 1, 8, 32>}, {transform_indices = @transform_1, window_bounds = array<i64: 1, 128, 32>}, {pipeline_mode = #tpu.pipeline_mode<synchronous>, transform_indices = @transform_2, window_bounds = array<i64: 4, 32, 8>}, {pipeline_mode = #tpu.pipeline_mode<synchronous>, transform_indices = @transform_3, window_bounds = array<i64: 4, 1, 8>}, {pipeline_mode = #tpu.pipeline_mode<synchronous>, transform_indices = @transform_4, window_bounds = array<i64: 4, 32, 8>}, {pipeline_mode = #tpu.pipeline_mode<synchronous>, transform_indices = @transform_5, window_bounds = array<i64: 4, 1, 8>}, {pipeline_mode = #tpu.pipeline_mode<synchronous>, transform_indices = @transform_6, window_bounds = array<i64: 4, 32, 8>}, {pipeline_mode = #tpu.pipeline_mode<synchronous>, transform_indices = @transform_7, window_bounds = array<i64: 4, 1, 8>}, {pipeline_mode = #tpu.pipeline_mode<synchronous>, transform_indices = @transform_8, window_bounds = array<i64: 32, 32>}, {pipeline_mode = #tpu.pipeline_mode<synchronous>, transform_indices = @transform_9, window_bounds = array<i64: 1, 32>}, {pipeline_mode = #tpu.pipeline_mode<synchronous>, transform_indices = @transform_10, window_bounds = array<i64: 1, 32>}, {pipeline_mode = #tpu.pipeline_mode<synchronous>, transform_indices = @transform_11, window_bounds = array<i64: 1, 32>}, {pipeline_mode = #tpu.pipeline_mode<synchronous>, transform_indices = @transform_12, window_bounds = array<i64: 32, 64>}, {pipeline_mode = #tpu.pipeline_mode<synchronous>, transform_indices = @transform_13, window_bounds = array<i64: 1, 64>}, {pipeline_mode = #tpu.pipeline_mode<synchronous>, transform_indices = @transform_14, window_bounds = array<i64: 64, 32>}, {pipeline_mode = #tpu.pipeline_mode<synchronous>, transform_indices = @transform_15, window_bounds = array<i64: 1, 32>}, {pipeline_mode = #tpu.pipeline_mode<synchronous>, transform_indices = @transform_16, window_bounds = array<i64: 1, 32>}, {pipeline_mode = #tpu.pipeline_mode<synchronous>, transform_indices = @transform_17, window_bounds = array<i64: 1, 32>}, {transform_indices = @transform_18, window_bounds = array<i64: 1, 8, 32>}, {transform_indices = @transform_19, window_bounds = array<i64: 1, 4, 8, 128>}]} {
    %c1_i32 = arith.constant 1 : i32
    %0 = arith.muli %arg0, %c1_i32 : i32
    %1 = tpu.iota {dimensions = array<i32: 0>} : vector<8x1xi32>
    %2 = tpu.iota {dimensions = array<i32: 1>} : vector<1x8x1xi32>
    %3 = tpu.iota {dimensions = array<i32: 0>} : vector<1x8x1xi32>
    %cst = arith.constant 0.000000e+00 : f32
    %4 = vector.broadcast %cst : f32 to vector<8x1xf32>
    %cst_0 = arith.constant 0.000000e+00 : f32
    %5 = vector.broadcast %cst_0 : f32 to vector<1x8x1xf32>
    %c0_i32 = arith.constant 0 : i32
    %6 = arith.addi %0, %c0_i32 : i32
    %7 = arith.index_cast %6 : i32 to index
    %8 = memref.load %arg1[%7] : memref<2xi32, #tpu.memory_space<smem>>
    %c0_i32_1 = arith.constant 0 : i32
    %9 = vector.broadcast %c0_i32_1 : i32 to vector<8x1xi32>
    %10 = arith.cmpi sge, %1, %9 : vector<8x1xi32>
    %c0_i32_2 = arith.constant 0 : i32
    %11 = arith.addi %c0_i32_2, %8 : i32
    %12 = vector.broadcast %11 : i32 to vector<8x1xi32>
    %13 = arith.cmpi slt, %1, %12 : vector<8x1xi32>
    %14 = arith.andi %10, %13 : vector<8x1xi1>
    %cst_3 = arith.constant 1.000000e+00 : f32
    %15 = vector.broadcast %cst_3 : f32 to vector<8x1xf32>
    %16 = arith.select %14, %15, %4 : vector<8x1xi1>, vector<8x1xf32>
    %c0_i32_4 = arith.constant 0 : i32
    %17 = vector.broadcast %c0_i32_4 : i32 to vector<1x8x1xi32>
    %18 = arith.cmpi eq, %3, %17 : vector<1x8x1xi32>
    %19 = vector.broadcast %8 : i32 to vector<1x8x1xi32>
    %20 = arith.cmpi slt, %2, %19 : vector<1x8x1xi32>
    %21 = arith.andi %18, %20 : vector<1x8x1xi1>
    %cst_5 = arith.constant 1.000000e+00 : f32
    %22 = vector.broadcast %cst_5 : f32 to vector<1x8x1xf32>
    %23 = arith.select %21, %22, %5 : vector<1x8x1xi1>, vector<1x8x1xf32>
    %c0 = arith.constant 0 : index
    %c0_6 = arith.constant 0 : index
    %c0_7 = arith.constant 0 : index
    %24 = vector.load %arg2[%c0, %c0_6, %c0_7] : memref<1x8x32xf32, #tpu.memory_space<vmem>>, vector<1x8x32xf32>
    %25 = vector.shape_cast %24 : vector<1x8x32xf32> to vector<8x32xf32>
    %26 = arith.truncf %25 : vector<8x32xf32> to vector<8x32xbf16>
    %c0_8 = arith.constant 0 : index
    %c0_9 = arith.constant 0 : index
    %c0_10 = arith.constant 0 : index
    %27 = vector.load %arg3[%c0_8, %c0_9, %c0_10] : memref<1x128x32xf32, #tpu.memory_space<vmem>>, vector<1x128x32xf32>
    %28 = vector.shape_cast %27 : vector<1x128x32xf32> to vector<128x32xf32>
    %29 = arith.truncf %28 : vector<128x32xf32> to vector<128x32xbf16>
    %c0_11 = arith.constant 0 : index
    %c0_12 = arith.constant 0 : index
    %c0_13 = arith.constant 0 : index
    %30 = vector.load %arg4[%c0_11, %c0_12, %c0_13] : memref<4x32x8xbf16, #tpu.memory_space<vmem>>, vector<1x32x8xbf16>
    %31 = vector.shape_cast %30 : vector<1x32x8xbf16> to vector<32x8xbf16>
    %cst_14 = arith.constant dense<0.000000e+00> : vector<8x8xf32>
    %32 = tpu.matmul %26, %31, %cst_14 {dimension_numbers = #tpu.dot_dimension_numbers<[1], [0], [0], [1], [0, 0, 1, 1], [], []>} : vector<8x32xbf16>, vector<32x8xbf16>, vector<8x8xf32> -> vector<8x8xf32>
    %c0_15 = arith.constant 0 : index
    %c0_16 = arith.constant 0 : index
    %c0_17 = arith.constant 0 : index
    %33 = vector.load %arg5[%c0_15, %c0_16, %c0_17] : memref<4x1x8xf32, #tpu.memory_space<vmem>>, vector<1x1x8xf32>
    %34 = vector.shape_cast %33 : vector<1x1x8xf32> to vector<1x8xf32>
    %35 = vector.broadcast %34 : vector<1x8xf32> to vector<8x8xf32>
    %36 = arith.addf %32, %35 : vector<8x8xf32>
    %cst_18 = arith.constant 0.353553385 : f32
    %37 = vector.broadcast %cst_18 : f32 to vector<8x8xf32>
    %38 = arith.mulf %36, %37 : vector<8x8xf32>
    %39 = vector.shape_cast %38 : vector<8x8xf32> to vector<1x8x8xf32>
    %40 = arith.truncf %39 : vector<1x8x8xf32> to vector<1x8x8xbf16>
    %c0_19 = arith.constant 0 : index
    %c0_20 = arith.constant 0 : index
    %c0_21 = arith.constant 0 : index
    %41 = vector.load %arg22[%c0_19, %c0_20, %c0_21] : memref<4x8x8xbf16, #tpu.memory_space<vmem>>, vector<1x8x8xbf16>
    tpu.vector_store %arg22[%c0_19, %c0_20, %c0_21], %40 {strides = array<i32>} : memref<4x8x8xbf16, #tpu.memory_space<vmem>>, vector<1x8x8xbf16>,
    %c0_22 = arith.constant 0 : index
    %c0_23 = arith.constant 0 : index
    %c0_24 = arith.constant 0 : index
    %42 = vector.load %arg6[%c0_22, %c0_23, %c0_24] : memref<4x32x8xbf16, #tpu.memory_space<vmem>>, vector<1x32x8xbf16>
    %43 = vector.shape_cast %42 : vector<1x32x8xbf16> to vector<32x8xbf16>
    %cst_25 = arith.constant dense<0.000000e+00> : vector<128x8xf32>
    %44 = tpu.matmul %29, %43, %cst_25 {dimension_numbers = #tpu.dot_dimension_numbers<[1], [0], [0], [1], [0, 0, 1, 1], [], []>} : vector<128x32xbf16>, vector<32x8xbf16>, vector<128x8xf32> -> vector<128x8xf32>
    %c0_26 = arith.constant 0 : index
    %c0_27 = arith.constant 0 : index
    %c0_28 = arith.constant 0 : index
    %45 = vector.load %arg7[%c0_26, %c0_27, %c0_28] : memref<4x1x8xf32, #tpu.memory_space<vmem>>, vector<1x1x8xf32>
    %46 = vector.shape_cast %45 : vector<1x1x8xf32> to vector<1x8xf32>
    %47 = vector.broadcast %46 : vector<1x8xf32> to vector<128x8xf32>
    %48 = arith.addf %44, %47 : vector<128x8xf32>
    %49 = vector.shape_cast %48 : vector<128x8xf32> to vector<1x128x8xf32>
    %50 = arith.truncf %49 : vector<1x128x8xf32> to vector<1x128x8xbf16>
    %c0_29 = arith.constant 0 : index
    %c0_30 = arith.constant 0 : index
    %c0_31 = arith.constant 0 : index
    %51 = vector.load %arg23[%c0_29, %c0_30, %c0_31] : memref<4x128x8xbf16, #tpu.memory_space<vmem>>, vector<1x128x8xbf16>
    tpu.vector_store %arg23[%c0_29, %c0_30, %c0_31], %50 {strides = array<i32>} : memref<4x128x8xbf16, #tpu.memory_space<vmem>>, vector<1x128x8xbf16>,
    %c0_32 = arith.constant 0 : index
    %c0_33 = arith.constant 0 : index
    %c0_34 = arith.constant 0 : index
    %52 = vector.load %arg8[%c0_32, %c0_33, %c0_34] : memref<4x32x8xbf16, #tpu.memory_space<vmem>>, vector<1x32x8xbf16>
    %53 = vector.shape_cast %52 : vector<1x32x8xbf16> to vector<32x8xbf16>
    %cst_35 = arith.constant dense<0.000000e+00> : vector<128x8xf32>
    %54 = tpu.matmul %29, %53, %cst_35 {dimension_numbers = #tpu.dot_dimension_numbers<[1], [0], [0], [1], [0, 0, 1, 1], [], []>} : vector<128x32xbf16>, vector<32x8xbf16>, vector<128x8xf32> -> vector<128x8xf32>
    %c0_36 = arith.constant 0 : index
    %c0_37 = arith.constant 0 : index
    %c0_38 = arith.constant 0 : index
    %55 = vector.load %arg9[%c0_36, %c0_37, %c0_38] : memref<4x1x8xf32, #tpu.memory_space<vmem>>, vector<1x1x8xf32>
    %56 = vector.shape_cast %55 : vector<1x1x8xf32> to vector<1x8xf32>
    %57 = vector.broadcast %56 : vector<1x8xf32> to vector<128x8xf32>
    %58 = arith.addf %54, %57 : vector<128x8xf32>
    %59 = vector.shape_cast %58 : vector<128x8xf32> to vector<1x128x8xf32>
    %60 = arith.truncf %59 : vector<1x128x8xf32> to vector<1x128x8xbf16>
    %c0_39 = arith.constant 0 : index
    %c0_40 = arith.constant 0 : index
    %c0_41 = arith.constant 0 : index
    %61 = vector.load %arg24[%c0_39, %c0_40, %c0_41] : memref<4x128x8xbf16, #tpu.memory_space<vmem>>, vector<1x128x8xbf16>
    tpu.vector_store %arg24[%c0_39, %c0_40, %c0_41], %60 {strides = array<i32>} : memref<4x128x8xbf16, #tpu.memory_space<vmem>>, vector<1x128x8xbf16>,
    %c1 = arith.constant 1 : index
    %c0_42 = arith.constant 0 : index
    %c0_43 = arith.constant 0 : index
    %62 = vector.load %arg4[%c1, %c0_42, %c0_43] : memref<4x32x8xbf16, #tpu.memory_space<vmem>>, vector<1x32x8xbf16>
    %63 = vector.shape_cast %62 : vector<1x32x8xbf16> to vector<32x8xbf16>
    %cst_44 = arith.constant dense<0.000000e+00> : vector<8x8xf32>
    %64 = tpu.matmul %26, %63, %cst_44 {dimension_numbers = #tpu.dot_dimension_numbers<[1], [0], [0], [1], [0, 0, 1, 1], [], []>} : vector<8x32xbf16>, vector<32x8xbf16>, vector<8x8xf32> -> vector<8x8xf32>
    %c1_45 = arith.constant 1 : index
    %c0_46 = arith.constant 0 : index
    %c0_47 = arith.constant 0 : index
    %65 = vector.load %arg5[%c1_45, %c0_46, %c0_47] : memref<4x1x8xf32, #tpu.memory_space<vmem>>, vector<1x1x8xf32>
    %66 = vector.shape_cast %65 : vector<1x1x8xf32> to vector<1x8xf32>
    %67 = vector.broadcast %66 : vector<1x8xf32> to vector<8x8xf32>
    %68 = arith.addf %64, %67 : vector<8x8xf32>
    %cst_48 = arith.constant 0.353553385 : f32
    %69 = vector.broadcast %cst_48 : f32 to vector<8x8xf32>
    %70 = arith.mulf %68, %69 : vector<8x8xf32>
    %71 = vector.shape_cast %70 : vector<8x8xf32> to vector<1x8x8xf32>
    %72 = arith.truncf %71 : vector<1x8x8xf32> to vector<1x8x8xbf16>
    %c1_49 = arith.constant 1 : index
    %c0_50 = arith.constant 0 : index
    %c0_51 = arith.constant 0 : index
    %73 = vector.load %arg22[%c1_49, %c0_50, %c0_51] : memref<4x8x8xbf16, #tpu.memory_space<vmem>>, vector<1x8x8xbf16>
    tpu.vector_store %arg22[%c1_49, %c0_50, %c0_51], %72 {strides = array<i32>} : memref<4x8x8xbf16, #tpu.memory_space<vmem>>, vector<1x8x8xbf16>,
    %c1_52 = arith.constant 1 : index
    %c0_53 = arith.constant 0 : index
    %c0_54 = arith.constant 0 : index
    %74 = vector.load %arg6[%c1_52, %c0_53, %c0_54] : memref<4x32x8xbf16, #tpu.memory_space<vmem>>, vector<1x32x8xbf16>
    %75 = vector.shape_cast %74 : vector<1x32x8xbf16> to vector<32x8xbf16>
    %cst_55 = arith.constant dense<0.000000e+00> : vector<128x8xf32>
    %76 = tpu.matmul %29, %75, %cst_55 {dimension_numbers = #tpu.dot_dimension_numbers<[1], [0], [0], [1], [0, 0, 1, 1], [], []>} : vector<128x32xbf16>, vector<32x8xbf16>, vector<128x8xf32> -> vector<128x8xf32>
    %c1_56 = arith.constant 1 : index
    %c0_57 = arith.constant 0 : index
    %c0_58 = arith.constant 0 : index
    %77 = vector.load %arg7[%c1_56, %c0_57, %c0_58] : memref<4x1x8xf32, #tpu.memory_space<vmem>>, vector<1x1x8xf32>
    %78 = vector.shape_cast %77 : vector<1x1x8xf32> to vector<1x8xf32>
    %79 = vector.broadcast %78 : vector<1x8xf32> to vector<128x8xf32>
    %80 = arith.addf %76, %79 : vector<128x8xf32>
    %81 = vector.shape_cast %80 : vector<128x8xf32> to vector<1x128x8xf32>
    %82 = arith.truncf %81 : vector<1x128x8xf32> to vector<1x128x8xbf16>
    %c1_59 = arith.constant 1 : index
    %c0_60 = arith.constant 0 : index
    %c0_61 = arith.constant 0 : index
    %83 = vector.load %arg23[%c1_59, %c0_60, %c0_61] : memref<4x128x8xbf16, #tpu.memory_space<vmem>>, vector<1x128x8xbf16>
    tpu.vector_store %arg23[%c1_59, %c0_60, %c0_61], %82 {strides = array<i32>} : memref<4x128x8xbf16, #tpu.memory_space<vmem>>, vector<1x128x8xbf16>,
    %c1_62 = arith.constant 1 : index
    %c0_63 = arith.constant 0 : index
    %c0_64 = arith.constant 0 : index
    %84 = vector.load %arg8[%c1_62, %c0_63, %c0_64] : memref<4x32x8xbf16, #tpu.memory_space<vmem>>, vector<1x32x8xbf16>
    %85 = vector.shape_cast %84 : vector<1x32x8xbf16> to vector<32x8xbf16>
    %cst_65 = arith.constant dense<0.000000e+00> : vector<128x8xf32>
    %86 = tpu.matmul %29, %85, %cst_65 {dimension_numbers = #tpu.dot_dimension_numbers<[1], [0], [0], [1], [0, 0, 1, 1], [], []>} : vector<128x32xbf16>, vector<32x8xbf16>, vector<128x8xf32> -> vector<128x8xf32>
    %c1_66 = arith.constant 1 : index
    %c0_67 = arith.constant 0 : index
    %c0_68 = arith.constant 0 : index
    %87 = vector.load %arg9[%c1_66, %c0_67, %c0_68] : memref<4x1x8xf32, #tpu.memory_space<vmem>>, vector<1x1x8xf32>
    %88 = vector.shape_cast %87 : vector<1x1x8xf32> to vector<1x8xf32>
    %89 = vector.broadcast %88 : vector<1x8xf32> to vector<128x8xf32>
    %90 = arith.addf %86, %89 : vector<128x8xf32>
    %91 = vector.shape_cast %90 : vector<128x8xf32> to vector<1x128x8xf32>
    %92 = arith.truncf %91 : vector<1x128x8xf32> to vector<1x128x8xbf16>
    %c1_69 = arith.constant 1 : index
    %c0_70 = arith.constant 0 : index
    %c0_71 = arith.constant 0 : index
    %93 = vector.load %arg24[%c1_69, %c0_70, %c0_71] : memref<4x128x8xbf16, #tpu.memory_space<vmem>>, vector<1x128x8xbf16>
    tpu.vector_store %arg24[%c1_69, %c0_70, %c0_71], %92 {strides = array<i32>} : memref<4x128x8xbf16, #tpu.memory_space<vmem>>, vector<1x128x8xbf16>,
    %c2 = arith.constant 2 : index
    %c0_72 = arith.constant 0 : index
    %c0_73 = arith.constant 0 : index
    %94 = vector.load %arg4[%c2, %c0_72, %c0_73] : memref<4x32x8xbf16, #tpu.memory_space<vmem>>, vector<1x32x8xbf16>
    %95 = vector.shape_cast %94 : vector<1x32x8xbf16> to vector<32x8xbf16>
    %cst_74 = arith.constant dense<0.000000e+00> : vector<8x8xf32>
    %96 = tpu.matmul %26, %95, %cst_74 {dimension_numbers = #tpu.dot_dimension_numbers<[1], [0], [0], [1], [0, 0, 1, 1], [], []>} : vector<8x32xbf16>, vector<32x8xbf16>, vector<8x8xf32> -> vector<8x8xf32>
    %c2_75 = arith.constant 2 : index
    %c0_76 = arith.constant 0 : index
    %c0_77 = arith.constant 0 : index
    %97 = vector.load %arg5[%c2_75, %c0_76, %c0_77] : memref<4x1x8xf32, #tpu.memory_space<vmem>>, vector<1x1x8xf32>
    %98 = vector.shape_cast %97 : vector<1x1x8xf32> to vector<1x8xf32>
    %99 = vector.broadcast %98 : vector<1x8xf32> to vector<8x8xf32>
    %100 = arith.addf %96, %99 : vector<8x8xf32>
    %cst_78 = arith.constant 0.353553385 : f32
    %101 = vector.broadcast %cst_78 : f32 to vector<8x8xf32>
    %102 = arith.mulf %100, %101 : vector<8x8xf32>
    %103 = vector.shape_cast %102 : vector<8x8xf32> to vector<1x8x8xf32>
    %104 = arith.truncf %103 : vector<1x8x8xf32> to vector<1x8x8xbf16>
    %c2_79 = arith.constant 2 : index
    %c0_80 = arith.constant 0 : index
    %c0_81 = arith.constant 0 : index
    %105 = vector.load %arg22[%c2_79, %c0_80, %c0_81] : memref<4x8x8xbf16, #tpu.memory_space<vmem>>, vector<1x8x8xbf16>
    tpu.vector_store %arg22[%c2_79, %c0_80, %c0_81], %104 {strides = array<i32>} : memref<4x8x8xbf16, #tpu.memory_space<vmem>>, vector<1x8x8xbf16>,
    %c2_82 = arith.constant 2 : index
    %c0_83 = arith.constant 0 : index
    %c0_84 = arith.constant 0 : index
    %106 = vector.load %arg6[%c2_82, %c0_83, %c0_84] : memref<4x32x8xbf16, #tpu.memory_space<vmem>>, vector<1x32x8xbf16>
    %107 = vector.shape_cast %106 : vector<1x32x8xbf16> to vector<32x8xbf16>
    %cst_85 = arith.constant dense<0.000000e+00> : vector<128x8xf32>
    %108 = tpu.matmul %29, %107, %cst_85 {dimension_numbers = #tpu.dot_dimension_numbers<[1], [0], [0], [1], [0, 0, 1, 1], [], []>} : vector<128x32xbf16>, vector<32x8xbf16>, vector<128x8xf32> -> vector<128x8xf32>
    %c2_86 = arith.constant 2 : index
    %c0_87 = arith.constant 0 : index
    %c0_88 = arith.constant 0 : index
    %109 = vector.load %arg7[%c2_86, %c0_87, %c0_88] : memref<4x1x8xf32, #tpu.memory_space<vmem>>, vector<1x1x8xf32>
    %110 = vector.shape_cast %109 : vector<1x1x8xf32> to vector<1x8xf32>
    %111 = vector.broadcast %110 : vector<1x8xf32> to vector<128x8xf32>
    %112 = arith.addf %108, %111 : vector<128x8xf32>
    %113 = vector.shape_cast %112 : vector<128x8xf32> to vector<1x128x8xf32>
    %114 = arith.truncf %113 : vector<1x128x8xf32> to vector<1x128x8xbf16>
    %c2_89 = arith.constant 2 : index
    %c0_90 = arith.constant 0 : index
    %c0_91 = arith.constant 0 : index
    %115 = vector.load %arg23[%c2_89, %c0_90, %c0_91] : memref<4x128x8xbf16, #tpu.memory_space<vmem>>, vector<1x128x8xbf16>
    tpu.vector_store %arg23[%c2_89, %c0_90, %c0_91], %114 {strides = array<i32>} : memref<4x128x8xbf16, #tpu.memory_space<vmem>>, vector<1x128x8xbf16>,
    %c2_92 = arith.constant 2 : index
    %c0_93 = arith.constant 0 : index
    %c0_94 = arith.constant 0 : index
    %116 = vector.load %arg8[%c2_92, %c0_93, %c0_94] : memref<4x32x8xbf16, #tpu.memory_space<vmem>>, vector<1x32x8xbf16>
    %117 = vector.shape_cast %116 : vector<1x32x8xbf16> to vector<32x8xbf16>
    %cst_95 = arith.constant dense<0.000000e+00> : vector<128x8xf32>
    %118 = tpu.matmul %29, %117, %cst_95 {dimension_numbers = #tpu.dot_dimension_numbers<[1], [0], [0], [1], [0, 0, 1, 1], [], []>} : vector<128x32xbf16>, vector<32x8xbf16>, vector<128x8xf32> -> vector<128x8xf32>
    %c2_96 = arith.constant 2 : index
    %c0_97 = arith.constant 0 : index
    %c0_98 = arith.constant 0 : index
    %119 = vector.load %arg9[%c2_96, %c0_97, %c0_98] : memref<4x1x8xf32, #tpu.memory_space<vmem>>, vector<1x1x8xf32>
    %120 = vector.shape_cast %119 : vector<1x1x8xf32> to vector<1x8xf32>
    %121 = vector.broadcast %120 : vector<1x8xf32> to vector<128x8xf32>
    %122 = arith.addf %118, %121 : vector<128x8xf32>
    %123 = vector.shape_cast %122 : vector<128x8xf32> to vector<1x128x8xf32>
    %124 = arith.truncf %123 : vector<1x128x8xf32> to vector<1x128x8xbf16>
    %c2_99 = arith.constant 2 : index
    %c0_100 = arith.constant 0 : index
    %c0_101 = arith.constant 0 : index
    %125 = vector.load %arg24[%c2_99, %c0_100, %c0_101] : memref<4x128x8xbf16, #tpu.memory_space<vmem>>, vector<1x128x8xbf16>
    tpu.vector_store %arg24[%c2_99, %c0_100, %c0_101], %124 {strides = array<i32>} : memref<4x128x8xbf16, #tpu.memory_space<vmem>>, vector<1x128x8xbf16>,
    %c3 = arith.constant 3 : index
    %c0_102 = arith.constant 0 : index
    %c0_103 = arith.constant 0 : index
    %126 = vector.load %arg4[%c3, %c0_102, %c0_103] : memref<4x32x8xbf16, #tpu.memory_space<vmem>>, vector<1x32x8xbf16>
    %127 = vector.shape_cast %126 : vector<1x32x8xbf16> to vector<32x8xbf16>
    %cst_104 = arith.constant dense<0.000000e+00> : vector<8x8xf32>
    %128 = tpu.matmul %26, %127, %cst_104 {dimension_numbers = #tpu.dot_dimension_numbers<[1], [0], [0], [1], [0, 0, 1, 1], [], []>} : vector<8x32xbf16>, vector<32x8xbf16>, vector<8x8xf32> -> vector<8x8xf32>
    %c3_105 = arith.constant 3 : index
    %c0_106 = arith.constant 0 : index
    %c0_107 = arith.constant 0 : index
    %129 = vector.load %arg5[%c3_105, %c0_106, %c0_107] : memref<4x1x8xf32, #tpu.memory_space<vmem>>, vector<1x1x8xf32>
    %130 = vector.shape_cast %129 : vector<1x1x8xf32> to vector<1x8xf32>
    %131 = vector.broadcast %130 : vector<1x8xf32> to vector<8x8xf32>
    %132 = arith.addf %128, %131 : vector<8x8xf32>
    %cst_108 = arith.constant 0.353553385 : f32
    %133 = vector.broadcast %cst_108 : f32 to vector<8x8xf32>
    %134 = arith.mulf %132, %133 : vector<8x8xf32>
    %135 = vector.shape_cast %134 : vector<8x8xf32> to vector<1x8x8xf32>
    %136 = arith.truncf %135 : vector<1x8x8xf32> to vector<1x8x8xbf16>
    %c3_109 = arith.constant 3 : index
    %c0_110 = arith.constant 0 : index
    %c0_111 = arith.constant 0 : index
    %137 = vector.load %arg22[%c3_109, %c0_110, %c0_111] : memref<4x8x8xbf16, #tpu.memory_space<vmem>>, vector<1x8x8xbf16>
    tpu.vector_store %arg22[%c3_109, %c0_110, %c0_111], %136 {strides = array<i32>} : memref<4x8x8xbf16, #tpu.memory_space<vmem>>, vector<1x8x8xbf16>,
    %c3_112 = arith.constant 3 : index
    %c0_113 = arith.constant 0 : index
    %c0_114 = arith.constant 0 : index
    %138 = vector.load %arg6[%c3_112, %c0_113, %c0_114] : memref<4x32x8xbf16, #tpu.memory_space<vmem>>, vector<1x32x8xbf16>
    %139 = vector.shape_cast %138 : vector<1x32x8xbf16> to vector<32x8xbf16>
    %cst_115 = arith.constant dense<0.000000e+00> : vector<128x8xf32>
    %140 = tpu.matmul %29, %139, %cst_115 {dimension_numbers = #tpu.dot_dimension_numbers<[1], [0], [0], [1], [0, 0, 1, 1], [], []>} : vector<128x32xbf16>, vector<32x8xbf16>, vector<128x8xf32> -> vector<128x8xf32>
    %c3_116 = arith.constant 3 : index
    %c0_117 = arith.constant 0 : index
    %c0_118 = arith.constant 0 : index
    %141 = vector.load %arg7[%c3_116, %c0_117, %c0_118] : memref<4x1x8xf32, #tpu.memory_space<vmem>>, vector<1x1x8xf32>
    %142 = vector.shape_cast %141 : vector<1x1x8xf32> to vector<1x8xf32>
    %143 = vector.broadcast %142 : vector<1x8xf32> to vector<128x8xf32>
    %144 = arith.addf %140, %143 : vector<128x8xf32>
    %145 = vector.shape_cast %144 : vector<128x8xf32> to vector<1x128x8xf32>
    %146 = arith.truncf %145 : vector<1x128x8xf32> to vector<1x128x8xbf16>
    %c3_119 = arith.constant 3 : index
    %c0_120 = arith.constant 0 : index
    %c0_121 = arith.constant 0 : index
    %147 = vector.load %arg23[%c3_119, %c0_120, %c0_121] : memref<4x128x8xbf16, #tpu.memory_space<vmem>>, vector<1x128x8xbf16>
    tpu.vector_store %arg23[%c3_119, %c0_120, %c0_121], %146 {strides = array<i32>} : memref<4x128x8xbf16, #tpu.memory_space<vmem>>, vector<1x128x8xbf16>,
    %c3_122 = arith.constant 3 : index
    %c0_123 = arith.constant 0 : index
    %c0_124 = arith.constant 0 : index
    %148 = vector.load %arg8[%c3_122, %c0_123, %c0_124] : memref<4x32x8xbf16, #tpu.memory_space<vmem>>, vector<1x32x8xbf16>
    %149 = vector.shape_cast %148 : vector<1x32x8xbf16> to vector<32x8xbf16>
    %cst_125 = arith.constant dense<0.000000e+00> : vector<128x8xf32>
    %150 = tpu.matmul %29, %149, %cst_125 {dimension_numbers = #tpu.dot_dimension_numbers<[1], [0], [0], [1], [0, 0, 1, 1], [], []>} : vector<128x32xbf16>, vector<32x8xbf16>, vector<128x8xf32> -> vector<128x8xf32>
    %c3_126 = arith.constant 3 : index
    %c0_127 = arith.constant 0 : index
    %c0_128 = arith.constant 0 : index
    %151 = vector.load %arg9[%c3_126, %c0_127, %c0_128] : memref<4x1x8xf32, #tpu.memory_space<vmem>>, vector<1x1x8xf32>
    %152 = vector.shape_cast %151 : vector<1x1x8xf32> to vector<1x8xf32>
    %153 = vector.broadcast %152 : vector<1x8xf32> to vector<128x8xf32>
    %154 = arith.addf %150, %153 : vector<128x8xf32>
    %155 = vector.shape_cast %154 : vector<128x8xf32> to vector<1x128x8xf32>
    %156 = arith.truncf %155 : vector<1x128x8xf32> to vector<1x128x8xbf16>
    %c3_129 = arith.constant 3 : index
    %c0_130 = arith.constant 0 : index
    %c0_131 = arith.constant 0 : index
    %157 = vector.load %arg24[%c3_129, %c0_130, %c0_131] : memref<4x128x8xbf16, #tpu.memory_space<vmem>>, vector<1x128x8xbf16>
    tpu.vector_store %arg24[%c3_129, %c0_130, %c0_131], %156 {strides = array<i32>} : memref<4x128x8xbf16, #tpu.memory_space<vmem>>, vector<1x128x8xbf16>,
    %c0_132 = arith.constant 0 : index
    %c0_133 = arith.constant 0 : index
    %c0_134 = arith.constant 0 : index
    %158 = vector.load %arg22[%c0_132, %c0_133, %c0_134] : memref<4x8x8xbf16, #tpu.memory_space<vmem>>, vector<4x8x8xbf16>
    %c0_135 = arith.constant 0 : index
    %c0_136 = arith.constant 0 : index
    %c0_137 = arith.constant 0 : index
    %159 = vector.load %arg23[%c0_135, %c0_136, %c0_137] : memref<4x128x8xbf16, #tpu.memory_space<vmem>>, vector<4x128x8xbf16>
    %c0_138 = arith.constant 0 : index
    %c0_139 = arith.constant 0 : index
    %c0_140 = arith.constant 0 : index
    %160 = vector.load %arg24[%c0_138, %c0_139, %c0_140] : memref<4x128x8xbf16, #tpu.memory_space<vmem>>, vector<4x128x8xbf16>
    "tpu.trace_start"() <{level = 10 : i32, message = "gqd,gkd->gqk"}> : () -> ()
    %cst_141 = arith.constant dense<0.000000e+00> : vector<4x8x128xf32>
    %161 = tpu.matmul %158, %159, %cst_141 {dimension_numbers = #tpu.dot_dimension_numbers<[2], [2], [1], [1], [0, 0, 0, 1, 1, 1], [0], [0]>} : vector<4x8x8xbf16>, vector<4x128x8xbf16>, vector<4x8x128xf32> -> vector<4x8x128xf32>
    "tpu.trace_stop"() : () -> ()
    %162 = tpu.iota {dimensions = array<i32: 2>} : vector<1x1x128xi32>
    %c8_i32 = arith.constant 8 : i32
    %163 = vector.broadcast %c8_i32 : i32 to vector<1x1x128xi32>
    %164 = arith.cmpi slt, %162, %163 : vector<1x1x128xi32>
    %cst_142 = arith.constant -1.000000e+30 : f32
    %165 = vector.shape_cast %164 : vector<1x1x128xi1> to vector<1x1x128xi1>
    %166 = vector.broadcast %165 : vector<1x1x128xi1> to vector<4x8x128xi1>
    %167 = vector.broadcast %cst_142 : f32 to vector<4x8x128xf32>
    %168 = arith.select %166, %161, %167 : vector<4x8x128xi1>, vector<4x8x128xf32>
    %cst_143 = arith.constant dense<0xFF800000> : vector<4x8xf32>
    %169 = vector.multi_reduction <maximumf>, %168, %cst_143 [2] : vector<4x8x128xf32> to vector<4x8xf32>
    %170 = vector.shape_cast %169 : vector<4x8xf32> to vector<4x8x1xf32>
    %171 = vector.broadcast %170 : vector<4x8x1xf32> to vector<4x8x128xf32>
    %172 = arith.subf %168, %171 : vector<4x8x128xf32>
    %173 = math.exp %172 : vector<4x8x128xf32>
    %cst_144 = arith.constant dense<0.000000e+00> : vector<4x8xf32>
    %174 = vector.multi_reduction <add>, %173, %cst_144 [2] : vector<4x8x128xf32> to vector<4x8xf32>
    %175 = vector.shape_cast %174 : vector<4x8xf32> to vector<4x8x1xf32>
    %176 = vector.broadcast %175 : vector<4x8x1xf32> to vector<4x8x128xf32>
    %177 = arith.divf %173, %176 : vector<4x8x128xf32>
    %178 = arith.truncf %177 : vector<4x8x128xf32> to vector<4x8x128xbf16>
    "tpu.trace_start"() <{level = 10 : i32, message = "gqk,gkd->gqd"}> : () -> ()
    %cst_145 = arith.constant dense<0.000000e+00> : vector<4x8x8xf32>
    %179 = tpu.matmul %178, %160, %cst_145 {dimension_numbers = #tpu.dot_dimension_numbers<[2], [1], [1], [2], [0, 0, 0, 1, 1, 2], [0], [0]>} : vector<4x8x128xbf16>, vector<4x128x8xbf16>, vector<4x8x8xf32> -> vector<4x8x8xf32>
    "tpu.trace_stop"() : () -> ()
    %180 = vector.extract_strided_slice %177 {offsets = [0, 0, 0], sizes = [1, 8, 128], strides = [1, 1, 1]} : vector<4x8x128xf32> to vector<1x8x128xf32>
    %181 = vector.broadcast %23 : vector<1x8x1xf32> to vector<1x8x128xf32>
    %182 = arith.mulf %180, %181 : vector<1x8x128xf32>
    %c0_146 = arith.constant 0 : index
    %c0_147 = arith.constant 0 : index
    %c0_148 = arith.constant 0 : index
    %c0_149 = arith.constant 0 : index
    %183 = vector.load %arg21[%c0_146, %c0_147, %c0_148, %c0_149] : memref<1x4x8x128xf32, #tpu.memory_space<vmem>>, vector<1x1x8x128xf32>
    %184 = vector.shape_cast %183 : vector<1x1x8x128xf32> to vector<1x8x128xf32>
    %185 = vector.shape_cast %182 : vector<1x8x128xf32> to vector<1x1x8x128xf32>
    tpu.vector_store %arg21[%c0_146, %c0_147, %c0_148, %c0_149], %185 {strides = array<i32>} : memref<1x4x8x128xf32, #tpu.memory_space<vmem>>, vector<1x1x8x128xf32>,
    %186 = vector.extract_strided_slice %179 {offsets = [0, 0, 0], sizes = [1, 8, 8], strides = [1, 1, 1]} : vector<4x8x8xf32> to vector<1x8x8xf32>
    %187 = vector.shape_cast %186 : vector<1x8x8xf32> to vector<8x8xf32>
    %188 = arith.truncf %187 : vector<8x8xf32> to vector<8x8xbf16>
    %c0_150 = arith.constant 0 : index
    %c0_151 = arith.constant 0 : index
    %189 = vector.load %arg25[%c0_150, %c0_151] : memref<8x32xbf16, #tpu.memory_space<vmem>>, vector<8x8xbf16>
    tpu.vector_store %arg25[%c0_150, %c0_151], %188 {strides = array<i32>} : memref<8x32xbf16, #tpu.memory_space<vmem>>, vector<8x8xbf16>,
    %190 = vector.extract_strided_slice %177 {offsets = [1, 0, 0], sizes = [1, 8, 128], strides = [1, 1, 1]} : vector<4x8x128xf32> to vector<1x8x128xf32>
    %191 = vector.broadcast %23 : vector<1x8x1xf32> to vector<1x8x128xf32>
    %192 = arith.mulf %190, %191 : vector<1x8x128xf32>
    %c0_152 = arith.constant 0 : index
    %c1_153 = arith.constant 1 : index
    %c0_154 = arith.constant 0 : index
    %c0_155 = arith.constant 0 : index
    %193 = vector.load %arg21[%c0_152, %c1_153, %c0_154, %c0_155] : memref<1x4x8x128xf32, #tpu.memory_space<vmem>>, vector<1x1x8x128xf32>
    %194 = vector.shape_cast %193 : vector<1x1x8x128xf32> to vector<1x8x128xf32>
    %195 = vector.shape_cast %192 : vector<1x8x128xf32> to vector<1x1x8x128xf32>
    tpu.vector_store %arg21[%c0_152, %c1_153, %c0_154, %c0_155], %195 {strides = array<i32>} : memref<1x4x8x128xf32, #tpu.memory_space<vmem>>, vector<1x1x8x128xf32>,
    %196 = vector.extract_strided_slice %179 {offsets = [1, 0, 0], sizes = [1, 8, 8], strides = [1, 1, 1]} : vector<4x8x8xf32> to vector<1x8x8xf32>
    %197 = vector.shape_cast %196 : vector<1x8x8xf32> to vector<8x8xf32>
    %198 = arith.truncf %197 : vector<8x8xf32> to vector<8x8xbf16>
    %c0_156 = arith.constant 0 : index
    %c8 = arith.constant 8 : index
    %199 = vector.load %arg25[%c0_156, %c8] : memref<8x32xbf16, #tpu.memory_space<vmem>>, vector<8x8xbf16>
    tpu.vector_store %arg25[%c0_156, %c8], %198 {strides = array<i32>} : memref<8x32xbf16, #tpu.memory_space<vmem>>, vector<8x8xbf16>,
    %200 = vector.extract_strided_slice %177 {offsets = [2, 0, 0], sizes = [1, 8, 128], strides = [1, 1, 1]} : vector<4x8x128xf32> to vector<1x8x128xf32>
    %201 = vector.broadcast %23 : vector<1x8x1xf32> to vector<1x8x128xf32>
    %202 = arith.mulf %200, %201 : vector<1x8x128xf32>
    %c0_157 = arith.constant 0 : index
    %c2_158 = arith.constant 2 : index
    %c0_159 = arith.constant 0 : index
    %c0_160 = arith.constant 0 : index
    %203 = vector.load %arg21[%c0_157, %c2_158, %c0_159, %c0_160] : memref<1x4x8x128xf32, #tpu.memory_space<vmem>>, vector<1x1x8x128xf32>
    %204 = vector.shape_cast %203 : vector<1x1x8x128xf32> to vector<1x8x128xf32>
    %205 = vector.shape_cast %202 : vector<1x8x128xf32> to vector<1x1x8x128xf32>
    tpu.vector_store %arg21[%c0_157, %c2_158, %c0_159, %c0_160], %205 {strides = array<i32>} : memref<1x4x8x128xf32, #tpu.memory_space<vmem>>, vector<1x1x8x128xf32>,
    %206 = vector.extract_strided_slice %179 {offsets = [2, 0, 0], sizes = [1, 8, 8], strides = [1, 1, 1]} : vector<4x8x8xf32> to vector<1x8x8xf32>
    %207 = vector.shape_cast %206 : vector<1x8x8xf32> to vector<8x8xf32>
    %208 = arith.truncf %207 : vector<8x8xf32> to vector<8x8xbf16>
    %c0_161 = arith.constant 0 : index
    %c16 = arith.constant 16 : index
    %209 = vector.load %arg25[%c0_161, %c16] : memref<8x32xbf16, #tpu.memory_space<vmem>>, vector<8x8xbf16>
    tpu.vector_store %arg25[%c0_161, %c16], %208 {strides = array<i32>} : memref<8x32xbf16, #tpu.memory_space<vmem>>, vector<8x8xbf16>,
    %210 = vector.extract_strided_slice %177 {offsets = [3, 0, 0], sizes = [1, 8, 128], strides = [1, 1, 1]} : vector<4x8x128xf32> to vector<1x8x128xf32>
    %211 = vector.broadcast %23 : vector<1x8x1xf32> to vector<1x8x128xf32>
    %212 = arith.mulf %210, %211 : vector<1x8x128xf32>
    %c0_162 = arith.constant 0 : index
    %c3_163 = arith.constant 3 : index
    %c0_164 = arith.constant 0 : index
    %c0_165 = arith.constant 0 : index
    %213 = vector.load %arg21[%c0_162, %c3_163, %c0_164, %c0_165] : memref<1x4x8x128xf32, #tpu.memory_space<vmem>>, vector<1x1x8x128xf32>
    %214 = vector.shape_cast %213 : vector<1x1x8x128xf32> to vector<1x8x128xf32>
    %215 = vector.shape_cast %212 : vector<1x8x128xf32> to vector<1x1x8x128xf32>
    tpu.vector_store %arg21[%c0_162, %c3_163, %c0_164, %c0_165], %215 {strides = array<i32>} : memref<1x4x8x128xf32, #tpu.memory_space<vmem>>, vector<1x1x8x128xf32>,
    %216 = vector.extract_strided_slice %179 {offsets = [3, 0, 0], sizes = [1, 8, 8], strides = [1, 1, 1]} : vector<4x8x8xf32> to vector<1x8x8xf32>
    %217 = vector.shape_cast %216 : vector<1x8x8xf32> to vector<8x8xf32>
    %218 = arith.truncf %217 : vector<8x8xf32> to vector<8x8xbf16>
    %c0_166 = arith.constant 0 : index
    %c24 = arith.constant 24 : index
    %219 = vector.load %arg25[%c0_166, %c24] : memref<8x32xbf16, #tpu.memory_space<vmem>>, vector<8x8xbf16>
    tpu.vector_store %arg25[%c0_166, %c24], %218 {strides = array<i32>} : memref<8x32xbf16, #tpu.memory_space<vmem>>, vector<8x8xbf16>,
    %c0_167 = arith.constant 0 : index
    %c0_168 = arith.constant 0 : index
    %220 = vector.load %arg25[%c0_167, %c0_168] : memref<8x32xbf16, #tpu.memory_space<vmem>>, vector<8x32xbf16>
    %c0_169 = arith.constant 0 : index
    %c0_170 = arith.constant 0 : index
    %221 = vector.load %arg10[%c0_169, %c0_170] : memref<32x32xbf16, #tpu.memory_space<vmem>>, vector<32x32xbf16>
    %cst_171 = arith.constant dense<0.000000e+00> : vector<8x32xf32>
    %222 = tpu.matmul %220, %221, %cst_171 {dimension_numbers = #tpu.dot_dimension_numbers<[1], [0], [0], [1], [0, 0, 1, 1], [], []>} : vector<8x32xbf16>, vector<32x32xbf16>, vector<8x32xf32> -> vector<8x32xf32>
    %c0_172 = arith.constant 0 : index
    %c0_173 = arith.constant 0 : index
    %223 = vector.load %arg11[%c0_172, %c0_173] : memref<1x32xf32, #tpu.memory_space<vmem>>, vector<1x32xf32>
    %224 = vector.broadcast %223 : vector<1x32xf32> to vector<8x32xf32>
    %225 = arith.addf %222, %224 : vector<8x32xf32>
    %226 = arith.addf %225, %25 : vector<8x32xf32>
    %c0_174 = arith.constant 0 : index
    %c0_175 = arith.constant 0 : index
    %227 = vector.load %arg12[%c0_174, %c0_175] : memref<1x32xf32, #tpu.memory_space<vmem>>, vector<1x32xf32>
    %c0_176 = arith.constant 0 : index
    %c0_177 = arith.constant 0 : index
    %228 = vector.load %arg13[%c0_176, %c0_177] : memref<1x32xf32, #tpu.memory_space<vmem>>, vector<1x32xf32>
    %cst_178 = arith.constant dense<0.000000e+00> : vector<8xf32>
    %229 = vector.multi_reduction <add>, %226, %cst_178 [1] : vector<8x32xf32> to vector<8xf32>
    %230 = vector.shape_cast %229 : vector<8xf32> to vector<8x1xf32>
    %cst_179 = arith.constant 3.200000e+01 : f32
    %231 = vector.broadcast %cst_179 : f32 to vector<8x1xf32>
    %232 = arith.divf %230, %231 : vector<8x1xf32>
    %233 = vector.broadcast %232 : vector<8x1xf32> to vector<8x32xf32>
    %234 = arith.subf %226, %233 : vector<8x32xf32>
    %235 = arith.mulf %234, %234 : vector<8x32xf32>
    %cst_180 = arith.constant dense<0.000000e+00> : vector<8xf32>
    %236 = vector.multi_reduction <add>, %235, %cst_180 [1] : vector<8x32xf32> to vector<8xf32>
    %237 = vector.shape_cast %236 : vector<8xf32> to vector<8x1xf32>
    %cst_181 = arith.constant 3.200000e+01 : f32
    %238 = vector.broadcast %cst_181 : f32 to vector<8x1xf32>
    %239 = arith.divf %237, %238 : vector<8x1xf32>
    %240 = vector.broadcast %232 : vector<8x1xf32> to vector<8x32xf32>
    %241 = arith.subf %226, %240 : vector<8x32xf32>
    %cst_182 = arith.constant 9.99999974E-6 : f32
    %242 = vector.broadcast %cst_182 : f32 to vector<8x1xf32>
    %243 = arith.addf %239, %242 : vector<8x1xf32>
    %244 = math.rsqrt %243 : vector<8x1xf32>
    %245 = vector.broadcast %244 : vector<8x1xf32> to vector<8x32xf32>
    %246 = arith.mulf %241, %245 : vector<8x32xf32>
    %247 = vector.broadcast %227 : vector<1x32xf32> to vector<8x32xf32>
    %248 = arith.mulf %246, %247 : vector<8x32xf32>
    %249 = vector.broadcast %228 : vector<1x32xf32> to vector<8x32xf32>
    %250 = arith.addf %248, %249 : vector<8x32xf32>
    %251 = vector.broadcast %16 : vector<8x1xf32> to vector<8x32xf32>
    %252 = arith.mulf %250, %251 : vector<8x32xf32>
    %253 = arith.truncf %252 : vector<8x32xf32> to vector<8x32xbf16>
    %c0_183 = arith.constant 0 : index
    %c0_184 = arith.constant 0 : index
    %254 = vector.load %arg14[%c0_183, %c0_184] : memref<32x64xbf16, #tpu.memory_space<vmem>>, vector<32x64xbf16>
    %cst_185 = arith.constant dense<0.000000e+00> : vector<8x64xf32>
    %255 = tpu.matmul %253, %254, %cst_185 {dimension_numbers = #tpu.dot_dimension_numbers<[1], [0], [0], [1], [0, 0, 1, 1], [], []>} : vector<8x32xbf16>, vector<32x64xbf16>, vector<8x64xf32> -> vector<8x64xf32>
    %c0_186 = arith.constant 0 : index
    %c0_187 = arith.constant 0 : index
    %256 = vector.load %arg15[%c0_186, %c0_187] : memref<1x64xf32, #tpu.memory_space<vmem>>, vector<1x64xf32>
    %257 = vector.broadcast %256 : vector<1x64xf32> to vector<8x64xf32>
    %258 = arith.addf %255, %257 : vector<8x64xf32>
    %cst_188 = arith.constant 0.000000e+00 : f32
    %259 = vector.broadcast %cst_188 : f32 to vector<8x64xf32>
    %260 = arith.maximumf %258, %259 : vector<8x64xf32>
    %261 = arith.truncf %260 : vector<8x64xf32> to vector<8x64xbf16>
    %c0_189 = arith.constant 0 : index
    %c0_190 = arith.constant 0 : index
    %262 = vector.load %arg16[%c0_189, %c0_190] : memref<64x32xbf16, #tpu.memory_space<vmem>>, vector<64x32xbf16>
    %cst_191 = arith.constant dense<0.000000e+00> : vector<8x32xf32>
    %263 = tpu.matmul %261, %262, %cst_191 {dimension_numbers = #tpu.dot_dimension_numbers<[1], [0], [0], [1], [0, 0, 1, 1], [], []>} : vector<8x64xbf16>, vector<64x32xbf16>, vector<8x32xf32> -> vector<8x32xf32>
    %c0_192 = arith.constant 0 : index
    %c0_193 = arith.constant 0 : index
    %264 = vector.load %arg17[%c0_192, %c0_193] : memref<1x32xf32, #tpu.memory_space<vmem>>, vector<1x32xf32>
    %265 = vector.broadcast %264 : vector<1x32xf32> to vector<8x32xf32>
    %266 = arith.addf %263, %265 : vector<8x32xf32>
    %267 = arith.addf %266, %252 : vector<8x32xf32>
    %c0_194 = arith.constant 0 : index
    %c0_195 = arith.constant 0 : index
    %268 = vector.load %arg18[%c0_194, %c0_195] : memref<1x32xf32, #tpu.memory_space<vmem>>, vector<1x32xf32>
    %c0_196 = arith.constant 0 : index
    %c0_197 = arith.constant 0 : index
    %269 = vector.load %arg19[%c0_196, %c0_197] : memref<1x32xf32, #tpu.memory_space<vmem>>, vector<1x32xf32>
    %cst_198 = arith.constant dense<0.000000e+00> : vector<8xf32>
    %270 = vector.multi_reduction <add>, %267, %cst_198 [1] : vector<8x32xf32> to vector<8xf32>
    %271 = vector.shape_cast %270 : vector<8xf32> to vector<8x1xf32>
    %cst_199 = arith.constant 3.200000e+01 : f32
    %272 = vector.broadcast %cst_199 : f32 to vector<8x1xf32>
    %273 = arith.divf %271, %272 : vector<8x1xf32>
    %274 = vector.broadcast %273 : vector<8x1xf32> to vector<8x32xf32>
    %275 = arith.subf %267, %274 : vector<8x32xf32>
    %276 = arith.mulf %275, %275 : vector<8x32xf32>
    %cst_200 = arith.constant dense<0.000000e+00> : vector<8xf32>
    %277 = vector.multi_reduction <add>, %276, %cst_200 [1] : vector<8x32xf32> to vector<8xf32>
    %278 = vector.shape_cast %277 : vector<8xf32> to vector<8x1xf32>
    %cst_201 = arith.constant 3.200000e+01 : f32
    %279 = vector.broadcast %cst_201 : f32 to vector<8x1xf32>
    %280 = arith.divf %278, %279 : vector<8x1xf32>
    %281 = vector.broadcast %273 : vector<8x1xf32> to vector<8x32xf32>
    %282 = arith.subf %267, %281 : vector<8x32xf32>
    %cst_202 = arith.constant 9.99999974E-6 : f32
    %283 = vector.broadcast %cst_202 : f32 to vector<8x1xf32>
    %284 = arith.addf %280, %283 : vector<8x1xf32>
    %285 = math.rsqrt %284 : vector<8x1xf32>
    %286 = vector.broadcast %285 : vector<8x1xf32> to vector<8x32xf32>
    %287 = arith.mulf %282, %286 : vector<8x32xf32>
    %288 = vector.broadcast %268 : vector<1x32xf32> to vector<8x32xf32>
    %289 = arith.mulf %287, %288 : vector<8x32xf32>
    %290 = vector.broadcast %269 : vector<1x32xf32> to vector<8x32xf32>
    %291 = arith.addf %289, %290 : vector<8x32xf32>
    %292 = vector.broadcast %16 : vector<8x1xf32> to vector<8x32xf32>
    %293 = arith.mulf %291, %292 : vector<8x32xf32>
    %294 = vector.shape_cast %293 : vector<8x32xf32> to vector<1x8x32xf32>
    %c0_203 = arith.constant 0 : index
    %c0_204 = arith.constant 0 : index
    %c0_205 = arith.constant 0 : index
    %295 = vector.load %arg20[%c0_203, %c0_204, %c0_205] : memref<1x8x32xf32, #tpu.memory_space<vmem>>, vector<1x8x32xf32>
    tpu.vector_store %arg20[%c0_203, %c0_204, %c0_205], %294 {strides = array<i32>} : memref<1x8x32xf32, #tpu.memory_space<vmem>>, vector<1x8x32xf32>,
    return
  }
  func.func @transform_0(%arg0: i32, %arg1: memref<2xi32, #tpu.memory_space<smem>>) -> (i32, i32, i32) {
    %c0_i32 = arith.constant 0 : i32
    %c0_i32_0 = arith.constant 0 : i32
    %c0_i32_1 = arith.constant 0 : i32
    return %arg0, %c0_i32, %c0_i32_0 : i32, i32, i32
  }
  func.func @transform_1(%arg0: i32, %arg1: memref<2xi32, #tpu.memory_space<smem>>) -> (i32, i32, i32) {
    %c0_i32 = arith.constant 0 : i32
    %c0_i32_0 = arith.constant 0 : i32
    %c0_i32_1 = arith.constant 0 : i32
    return %arg0, %c0_i32, %c0_i32_0 : i32, i32, i32
  }
  func.func @transform_2(%arg0: i32, %arg1: memref<2xi32, #tpu.memory_space<smem>>) -> (i32, i32, i32) {
    %c0_i32 = arith.constant 0 : i32
    %c0_i32_0 = arith.constant 0 : i32
    %c0_i32_1 = arith.constant 0 : i32
    %c0_i32_2 = arith.constant 0 : i32
    return %c0_i32, %c0_i32_0, %c0_i32_1 : i32, i32, i32
  }
  func.func @transform_3(%arg0: i32, %arg1: memref<2xi32, #tpu.memory_space<smem>>) -> (i32, i32, i32) {
    %c0_i32 = arith.constant 0 : i32
    %c0_i32_0 = arith.constant 0 : i32
    %c0_i32_1 = arith.constant 0 : i32
    %c0_i32_2 = arith.constant 0 : i32
    return %c0_i32, %c0_i32_0, %c0_i32_1 : i32, i32, i32
  }
  func.func @transform_4(%arg0: i32, %arg1: memref<2xi32, #tpu.memory_space<smem>>) -> (i32, i32, i32) {
    %c0_i32 = arith.constant 0 : i32
    %c0_i32_0 = arith.constant 0 : i32
    %c0_i32_1 = arith.constant 0 : i32
    %c0_i32_2 = arith.constant 0 : i32
    return %c0_i32, %c0_i32_0, %c0_i32_1 : i32, i32, i32
  }
  func.func @transform_5(%arg0: i32, %arg1: memref<2xi32, #tpu.memory_space<smem>>) -> (i32, i32, i32) {
    %c0_i32 = arith.constant 0 : i32
    %c0_i32_0 = arith.constant 0 : i32
    %c0_i32_1 = arith.constant 0 : i32
    %c0_i32_2 = arith.constant 0 : i32
    return %c0_i32, %c0_i32_0, %c0_i32_1 : i32, i32, i32
  }
  func.func @transform_6(%arg0: i32, %arg1: memref<2xi32, #tpu.memory_space<smem>>) -> (i32, i32, i32) {
    %c0_i32 = arith.constant 0 : i32
    %c0_i32_0 = arith.constant 0 : i32
    %c0_i32_1 = arith.constant 0 : i32
    %c0_i32_2 = arith.constant 0 : i32
    return %c0_i32, %c0_i32_0, %c0_i32_1 : i32, i32, i32
  }
  func.func @transform_7(%arg0: i32, %arg1: memref<2xi32, #tpu.memory_space<smem>>) -> (i32, i32, i32) {
    %c0_i32 = arith.constant 0 : i32
    %c0_i32_0 = arith.constant 0 : i32
    %c0_i32_1 = arith.constant 0 : i32
    %c0_i32_2 = arith.constant 0 : i32
    return %c0_i32, %c0_i32_0, %c0_i32_1 : i32, i32, i32
  }
  func.func @transform_8(%arg0: i32, %arg1: memref<2xi32, #tpu.memory_space<smem>>) -> (i32, i32) {
    %c0_i32 = arith.constant 0 : i32
    %c0_i32_0 = arith.constant 0 : i32
    %c0_i32_1 = arith.constant 0 : i32
    return %c0_i32, %c0_i32_0 : i32, i32
  }
  func.func @transform_9(%arg0: i32, %arg1: memref<2xi32, #tpu.memory_space<smem>>) -> (i32, i32) {
    %c0_i32 = arith.constant 0 : i32
    %c0_i32_0 = arith.constant 0 : i32
    %c0_i32_1 = arith.constant 0 : i32
    return %c0_i32, %c0_i32_0 : i32, i32
  }
  func.func @transform_10(%arg0: i32, %arg1: memref<2xi32, #tpu.memory_space<smem>>) -> (i32, i32) {
    %c0_i32 = arith.constant 0 : i32
    %c0_i32_0 = arith.constant 0 : i32
    %c0_i32_1 = arith.constant 0 : i32
    return %c0_i32, %c0_i32_0 : i32, i32
  }
  func.func @transform_11(%arg0: i32, %arg1: memref<2xi32, #tpu.memory_space<smem>>) -> (i32, i32) {
    %c0_i32 = arith.constant 0 : i32
    %c0_i32_0 = arith.constant 0 : i32
    %c0_i32_1 = arith.constant 0 : i32
    return %c0_i32, %c0_i32_0 : i32, i32
  }
  func.func @transform_12(%arg0: i32, %arg1: memref<2xi32, #tpu.memory_space<smem>>) -> (i32, i32) {
    %c0_i32 = arith.constant 0 : i32
    %c0_i32_0 = arith.constant 0 : i32
    %c0_i32_1 = arith.constant 0 : i32
    return %c0_i32, %c0_i32_0 : i32, i32
  }
  func.func @transform_13(%arg0: i32, %arg1: memref<2xi32, #tpu.memory_space<smem>>) -> (i32, i32) {
    %c0_i32 = arith.constant 0 : i32
    %c0_i32_0 = arith.constant 0 : i32
    %c0_i32_1 = arith.constant 0 : i32
    return %c0_i32, %c0_i32_0 : i32, i32
  }
  func.func @transform_14(%arg0: i32, %arg1: memref<2xi32, #tpu.memory_space<smem>>) -> (i32, i32) {
    %c0_i32 = arith.constant 0 : i32
    %c0_i32_0 = arith.constant 0 : i32
    %c0_i32_1 = arith.constant 0 : i32
    return %c0_i32, %c0_i32_0 : i32, i32
  }
  func.func @transform_15(%arg0: i32, %arg1: memref<2xi32, #tpu.memory_space<smem>>) -> (i32, i32) {
    %c0_i32 = arith.constant 0 : i32
    %c0_i32_0 = arith.constant 0 : i32
    %c0_i32_1 = arith.constant 0 : i32
    return %c0_i32, %c0_i32_0 : i32, i32
  }
  func.func @transform_16(%arg0: i32, %arg1: memref<2xi32, #tpu.memory_space<smem>>) -> (i32, i32) {
    %c0_i32 = arith.constant 0 : i32
    %c0_i32_0 = arith.constant 0 : i32
    %c0_i32_1 = arith.constant 0 : i32
    return %c0_i32, %c0_i32_0 : i32, i32
  }
  func.func @transform_17(%arg0: i32, %arg1: memref<2xi32, #tpu.memory_space<smem>>) -> (i32, i32) {
    %c0_i32 = arith.constant 0 : i32
    %c0_i32_0 = arith.constant 0 : i32
    %c0_i32_1 = arith.constant 0 : i32
    return %c0_i32, %c0_i32_0 : i32, i32
  }
  func.func @transform_18(%arg0: i32, %arg1: memref<2xi32, #tpu.memory_space<smem>>) -> (i32, i32, i32) {
    %c0_i32 = arith.constant 0 : i32
    %c0_i32_0 = arith.constant 0 : i32
    %c0_i32_1 = arith.constant 0 : i32
    return %arg0, %c0_i32, %c0_i32_0 : i32, i32, i32
  }
  func.func @transform_19(%arg0: i32, %arg1: memref<2xi32, #tpu.memory_space<smem>>) -> (i32, i32, i32, i32) {
    %c0_i32 = arith.constant 0 : i32
    %c0_i32_0 = arith.constant 0 : i32
    %c0_i32_1 = arith.constant 0 : i32
    %c0_i32_2 = arith.constant 0 : i32
    return %arg0, %c0_i32, %c0_i32_0, %c0_i32_1 : i32, i32, i32, i32
  }
}

</mosaic_0001>

<bundles_post_ra>
// kernel: tpu_custom_call.1
= control target key start
LH: loop header
LB: loop body
LE: loop exit
PB: predicated region body
PF: predicated region fallthrough
CT: control target
= control target key end

     0   :  { %s5038_s0 = inlined_call_operand.vmem [shape: s32[2], index: 0, kind: input, shape index: {}]   ;;  %s5039_s1 = inlined_call_operand.vmem [shape: f32[2,8,32], index: 1, kind: input, shape index: {}]   ;;  %s5040_s2 = inlined_call_operand.vmem [shape: f32[2,128,32], index: 2, kind: input, shape index: {}]   ;;  %s5041_s3 = inlined_call_operand.vmem [shape: bf16[4,32,8], index: 3, kind: input, shape index: {}]   ;;  %s5042_s4 = inlined_call_operand.vmem [shape: f32[4,1,8], index: 4, kind: input, shape index: {}]   ;;  %s5043_s5 = inlined_call_operand.vmem [shape: bf16[4,32,8], index: 5, kind: input, shape index: {}]   ;;  %s5044_s6 = inlined_call_operand.vmem [shape: f32[4,1,8], index: 6, kind: input, shape index: {}]   ;;  %s5045_s7 = inlined_call_operand.vmem [shape: bf16[4,32,8], index: 7, kind: input, shape index: {}]   ;;  %s5046_s8 = inlined_call_operand.vmem [shape: f32[4,1,8], index: 8, kind: input, shape index: {}]   ;;  %s5047_s9 = inlined_call_operand.vmem [shape: bf16[32,32], index: 9, kind: input, shape index: {}]   ;;  %s5048_s10 = inlined_call_operand.vmem [shape: f32[1,32], index: 10, kind: input, shape index: {}]   ;;  %s5049_s11 = inlined_call_operand.vmem [shape: f32[1,32], index: 11, kind: input, shape index: {}]   ;;  %s5050_s12 = inlined_call_operand.vmem [shape: f32[1,32], index: 12, kind: input, shape index: {}]   ;;  %s5051_s13 = inlined_call_operand.vmem [shape: bf16[32,64], index: 13, kind: input, shape index: {}]   ;;  %s5052_s14 = inlined_call_operand.vmem [shape: f32[1,64], index: 14, kind: input, shape index: {}]   ;;  %s5053_s15 = inlined_call_operand.vmem [shape: bf16[64,32], index: 15, kind: input, shape index: {}]   ;;  %s5054_s16 = inlined_call_operand.vmem [shape: f32[1,32], index: 16, kind: input, shape index: {}]   ;;  %s5055_s17 = inlined_call_operand.vmem [shape: f32[1,32], index: 17, kind: input, shape index: {}]   ;;  %s5056_s18 = inlined_call_operand.vmem [shape: f32[1,32], index: 18, kind: input, shape index: {}]   ;;  %s5057_s19 = inlined_call_operand.hbm [shape: f32[2,8,32], index: 19, kind: output, shape index: {0}]   ;;  %s5058_s20 = inlined_call_operand.hbm [shape: f32[2,4,8,128], index: 20, kind: output, shape index: {1}]  }
   0x1   :  { %5068 = sst [smem:[#allocation21_spill]] %s5038_s0 }
   0x2   :  { %5069 = sst [smem:[#allocation22_spill]] %s5039_s1  ;;  %s5078_s23 = sld [smem:[#allocation21_spill]] }
   0x3   :  { %5070 = sst [smem:[#allocation23_spill]] %s5040_s2 }
   0x4   :  { %5071 = sst [smem:[#allocation24_spill]] %s5041_s3 }
   0x5   :  { %5072 = sst [smem:[#allocation25_spill]] %s5042_s4 }
   0x6   :  { %5073 = sst [smem:[#allocation26_spill]] %s5043_s5 }
   0x7   :  { %5074 = sst [smem:[#allocation27_spill]] %s5052_s14 }
   0x8   :  { %5075 = sst [smem:[#allocation28_spill]] %s5055_s17  ;;  %s26_s14 = sshll.u32 %s5078_s23, 4  ;;  %s27_s14 = int_to_ptr.vmem [resolvable:$true] %s26_s14 }
   0x9   :  { %5076 = sst [smem:[#allocation29_spill]] %s5056_s18  ;;  %s3945_s24 = scalar_lea.vmem %s27_s14, 16 }
   0xa   :  { %5077 = sst [smem:[#allocation30_spill]] %s5057_s19  ;;  %p3946_p0 = scmp.ne.s32.totalorder %s27_s14, %s3945_s24 }
   0xb   :  { %p3950_p1 = scmp.lt.s32.totalorder %s27_s14, %s27_s14  ;;  %p3951_p2 = scmp.lt.s32.totalorder %s3945_s24, %s3945_s24 }
   0xd   :  { %p3952_p3 = por %p3951_p2, %p3950_p1 }
   0xf   :  { %p3953_p4 = pnand %p3952_p3, %p3946_p0 }
  0x11   :  { %3956 = shalt.err (!%p3953_p4)  }
  0x12   :  { %s4055_s2 = smov [#allocation7]  }
  0x13   :  { %29 = dma.vmem_to_smem %s27_s14, 16, %s4055_s2, [#allocation6] }
  0x14   :  { %4029 = dma.done.wait [#allocation6], 16 }
  0x15   :  { %4030 = vsyncadd [#allocation6], 4294967280 }
  0x16   :  { %31 = sfence }
  0x17   :  { %32 = vsyncpa [#allocation9], 0 }
  0x18   :  { %34 = vsyncpa [#allocation9 + $0x1], 0 }
  0x19   :  { %35 = vsyncpa [#allocation11], 0 }
  0x1a   :  { %37 = vsyncpa [#allocation11 + $0x1], 0  ;;  %s4172_s25 = smov 0   ;;  %s4174_s3 = smov 0  }
  0x1b   :  { %s4176_s26 = smov 0   ;;  %s4178_s27 = smov 0  }
  0x1c LB: > { %5079 = sst [smem:[#allocation15_spill]] %s4041_s25  ;;  %s4193_s14 = sadd.s32 4294967295, %s4053_s27   ;;  %s4053_s27 = sphi %s4178_s27, %s5099_s27   ;;  %s4049_s26 = sphi %s4176_s26, %s5101_s26   ;;  %s4045_s3 = sphi %s4174_s3, %s5103_s3   ;;  %s4041_s25 = sphi %s4172_s25, %s5102_s25  }
  0x1d   : > { %5080 = sst [smem:[#allocation16_spill]] %s4049_s26  ;;  %s3088_s28 = sadd.s32 4294967294, %s4053_s27  }
  0x1e   : > { %5081 = sst [smem:[#allocation17_spill]] %s4053_s27  ;;  %s4197_s4 = sadd.s32 1, %s4053_s27  }
  0x1f   : > { %5082 = sst [smem:[#allocation18_spill]] %s4197_s4  ;;  %s438_s29 = sadd.s32 1, %s4049_s26 }
  0x20   : > { %s435_s30 = ssub.s32 %s4053_s27, %s4197_s4  ;;  %p448_p5 = scmp.ne.s32.totalorder %s4049_s26, %s4045_s3 }
  0x21   : > { %p436_p6 = scmp.eq.s32.totalorder %s435_s30, 0  ;;  %p449_p7 = scmp.eq.s32.totalorder %s4193_s14, 1 }
  0x22   : > { %p454_p8 = scmp.ne.s32.totalorder %s4045_s3, %s4041_s25  ;;  %p455_p9 = scmp.eq.s32.totalorder %s3088_s28, 1 }
  0x23   : > { %s4208_s0 = scalar_select %p436_p6, %s4049_s26, %s438_s29  }
  0x24   : > { %p4210_p10 = por %p449_p7, %p448_p5  ;;  %p4214_p11 = por %p455_p9, %p454_p8 }
  0x25   : > { %5083 = sst [smem:[#allocation19_spill]] %s4208_s0  ;;  %p3091_p12 = scmp.ge.s32.totalorder %s4053_s27, 1 }
  0x26   : > { %s5085_s1 = scalar_select %p4214_p11, 1, 0 }
  0x27   : > { %p562_p13 = scmp.lt.s32.totalorder %s4053_s27, 3 }
  0x28   : > { %5086 = sst [smem:[#allocation20_spill]] %s5085_s1 }
  0x29   : > { %p563_p0 = pnand %p3091_p12, %p562_p13 }
  0x2a   : > { %s5087_s24 = sld [smem:[#allocation24_spill]] (!%p563_p0)  ;;  %v4056_v1 = vmov (!%p563_p0), 0.0   ;;  %v3893_v2 = vld [vmem:[%s5045_s7] sm:$0xff] (!%p563_p0)   ;;  %vm4057_vm0 = vmmov (!%p563_p0), 0   ;;  %p627_p1 = scmp.lt.s32.totalorder (!%p563_p0), %s4193_s14, 1  ;;  %v3895_v4 = vld [vmem:[%s5045_s7 + $0x8] sm:$0xff] (!%p563_p0)  }
  0x2b   : > { %566 = sbr.rel (%p563_p0) target bundleno = 2614 (0xa36), region = 92  ;;  %3461 = vmatprep.subr.bf16.mxu1 (!%p563_p0), %v4056_v1  ;;  %3465 = vmatprep.mubr.msk.bf16.mxu1 (!%p563_p0), %vm4057_vm0, %v4056_v1  ;;  %s5088_s5 = sld [smem:[#allocation26_spill]] (!%p563_p0)  ;;  %vm696_vm1 = vcmask (!%p563_p0), 261120   ;;  %v3903_v32 = vld [vmem:[%s5045_s7 + $0x10] sm:$0xff] (!%p563_p0)   ;;  %v3906_v40 = vld [vmem:[%s5045_s7 + $0x20] sm:$0xff] (!%p563_p0)   ;;  %v3904_v41 = vld [vmem:[%s5045_s7 + $0x18] sm:$0xff] (!%p563_p0)  }
  0x2c   : > { %3489 = vmatprep.subr.bf16.mxu0 (!%p563_p0), %v3893_v2  ;;  %s5089_s27 = sld [smem:[#allocation22_spill]] (!%p563_p0)  ;;  %s5090_s18 = sld [smem:[#allocation23_spill]] (!%p563_p0)  ;;  %v3908_v44 = vld [vmem:[%s5045_s7 + $0x28] sm:$0xff] (!%p563_p0)   ;;  %v3914_v49 = vld [vmem:[%s5045_s7 + $0x30] sm:$0xff] (!%p563_p0)   ;;  %v3915_v50 = vld [vmem:[%s5045_s7 + $0x38] sm:$0xff] (!%p563_p0)   ;;  %vm742_vm2 = vcmask (!%p563_p0), 60416  }
  0x2d   : > { %3490 = vmatpush3.bf16.msra.mxu0 (!%p563_p0), %v3893_v2  ;;  %v4503_v54 = vld [vmem:[%s5046_s8] ss:$0 sm:$0xff] (!%p563_p0)  ;;  %vm896_vm3 = vcmask (!%p563_p0), 64512   ;;  %s4849_s1 = sand.u32 (!%p563_p0), 1, %s4045_s3   ;;  %s4058_s30 = smov (!%p563_p0), 8   ;;  %vm2641_vm6 = vcmask (!%p563_p0), 126016  }
  0x2e   : > { %3491 = vmatprep.subr.bf16.mxu0 (!%p563_p0), %v3895_v4  ;;  %s3093_s28 = sshll.u32 (!%p563_p0), %s4849_s1, 5  ;;  %s4059_s22 = smov (!%p563_p0), 16   ;;  %vm2653_vm7 = vcmask (!%p563_p0), 191616   ;;  %vm2665_vm8 = vcmask (!%p563_p0), 257216   ;;  %vm2874_vm9 = vcmask (!%p563_p0), 523264  }
  0x2f   : > { %s4856_s29 = scalar_lea.vmem (!%p563_p0), [#allocation10], %s3093_s28  ;;  %s4060_s25 = smov (!%p563_p0), 24  }
  0x30   : > { %v3892_v0 = vld [vmem:[%s5087_s24] sm:$0xff] (!%p563_p0)   ;;  %v3894_v3 = vld [vmem:[%s5087_s24 + $0x8] sm:$0xff] (!%p563_p0)   ;;  %v3900_v26 = vld [vmem:[%s5087_s24 + $0x10] sm:$0xff] (!%p563_p0)  }
  0x31   : > { %3462 = vmatpush3.bf16.msra.mxu1 (!%p563_p0), %v3892_v0  ;;  %v3896_v5 = vld [vmem:[%s5088_s5] sm:$0xff] (!%p563_p0)   ;;  %v3897_v6 = vld [vmem:[%s5088_s5 + $0x10] sm:$0xff] (!%p563_p0)   ;;  %v3898_v7 = vld [vmem:[%s5088_s5 + $0x8] sm:$0xff] (!%p563_p0)   ;;  %3492 = vmatpush3.bf16.msra.mxu0 (!%p563_p0), %v3895_v4 }
  0x32   : > { %3463 = vmatprep.subr.bf16.mxu1 %v4056_v1  ;;  %s628_s2 = scalar_select %p627_p1, %s4193_s14, 1  ;;  %3517 = vmatprep.subr.bf16.mxu0 %v3897_v6  ;;  %v3899_v19 = vld [vmem:[%s5088_s5 + $0x18] sm:$0xff]   ;;  %v3901_v38 = vld [vmem:[%s5087_s24 + $0x20] sm:$0xff]   ;;  %v3905_v39 = vld [vmem:[%s5087_s24 + $0x28] sm:$0xff]  }
  0x33   : > { %v3902_v31 = vld [vmem:[%s5087_s24 + $0x18] sm:$0xff]   ;;  %v3907_v42 = vld [vmem:[%s5088_s5 + $0x20] sm:$0xff]   ;;  %v3910_v43 = vld [vmem:[%s5088_s5 + $0x28] sm:$0xff]  }
  0x34   : > { %s3094_s26 = sshll.u32 %s628_s2, 3  ;;  %s3281_s4 = sshll.u32 %s628_s2, 7  ;;  %v3909_v45 = vld [vmem:[%s5088_s5 + $0x30] sm:$0xff]   ;;  %v3911_v46 = vld [vmem:[%s5088_s5 + $0x38] sm:$0xff]  }
  0x35   : > { %3464 = vmatpush3.bf16.msra.mxu1 %v3894_v3  ;;  %s4247_s19 = scalar_lea.vmem %s5089_s27, %s3094_s26  ;;  %s4252_s17 = scalar_lea.vmem %s5090_s18, %s3281_s4  ;;  %v3912_v47 = vld [vmem:[%s5087_s24 + $0x30] sm:$0xff]   ;;  %v3913_v48 = vld [vmem:[%s5087_s24 + $0x38] sm:$0xff]  }
  0x36   : > { %3469 = vmatprep.subr.bf16.mxu1 %v3896_v5  ;;  %v647_v8 = vld [vmem:[%s4247_s19] sm:$0xff]  ;;  %v650_v10 = vld [vmem:[%s4252_s17 + $0x8] sm:$0xff]  ;;  %v651_v13 = vld [vmem:[%s4252_s17 + $0x10] sm:$0xff]  ;;  %s639_s4 = sld [smem:[#allocation7 + %s4193_s14]]  ;;  %s2982_s27 = sshll.u32 %s4856_s29, 4  ;;  %s4950_s27 = int_to_ptr.vmem [resolvable:$true] %s2982_s27 }
  0x37   : > { %v649_v9 = vld [vmem:[%s4252_s17] sm:$0xff]  ;;  %v4260_v11 = vpack.c.bf16 %v647_v8, %v647_v8  ;;  %v652_v14 = vld [vmem:[%s4252_s17 + $0x18] sm:$0xff]  ;;  %v654_v17 = vld [vmem:[%s4252_s17 + $0x28] sm:$0xff]  ;;  %s5092_s18 = sld [smem:[#allocation27_spill]]  ;;  %s3957_s0 = scalar_lea.vmem %s4950_s27, 512 }
  0x38   : > { %v4262_v12 = vpack.c.bf16 %v650_v10, %v649_v9  ;;  %v653_v15 = vld [vmem:[%s4252_s17 + $0x20] sm:$0xff]  ;;  %v4267_v16 = vpack.c.bf16 %v652_v14, %v651_v13  ;;  %v655_v20 = vld [vmem:[%s4252_s17 + $0x30] sm:$0xff]  ;;  %v656_v21 = vld [vmem:[%s4252_s17 + $0x38] sm:$0xff]  ;;  %p3958_p2 = scmp.ne.s32.totalorder %s4950_s27, %s3957_s0  ;;  %s4061_s2 = smov [#allocation10]  }
  0x39   : > { %3466 = vmatmul.mubr.msk.bf16.vlgmr.msra.gmra.mrb[0].mxu1 %vm696_vm1, %v4260_v11  ;;  %v4274_v18 = vpack.c.bf16 %v654_v17, %v653_v15  ;;  %v657_v22 = vld [vmem:[%s4252_s17 + $0x40] sm:$0xff]  ;;  %v658_v23 = vld [vmem:[%s4252_s17 + $0x48] sm:$0xff]  ;;  %v4289_v24 = vpack.c.bf16 %v656_v21, %v655_v20  ;;  %v659_v27 = vld [vmem:[%s4252_s17 + $0x50] sm:$0xff] }
  0x3a   : > { %3493 = vmatprep.mubr.msk.bf16.mxu0 %vm696_vm1, %v4262_v12  ;;  %3470 = vmatpush3.bf16.msra.mxu1 %v3896_v5  ;;  %v4291_v25 = vpack.c.bf16 %v658_v23, %v657_v22  ;;  %v660_v28 = vld [vmem:[%s4252_s17 + $0x58] sm:$0xff]  ;;  %v661_v29 = vld [vmem:[%s4252_s17 + $0x60] sm:$0xff]  ;;  %v662_v30 = vld [vmem:[%s4252_s17 + $0x68] sm:$0xff]  ;;  %p3959_p3 = pnand %p3958_p2, %p4210_p10 }
  0x3b   : > { %3494 = vmatmul.mubr.msk.bf16.vlgmr.msra.gmra.mrb[0].mxu0 %vm696_vm1, %v4267_v16  ;;  %3471 = vmatprep.subr.bf16.mxu1 %v3898_v7  ;;  %v4317_v33 = vpack.c.bf16 %v660_v28, %v659_v27  ;;  %v4319_v34 = vpack.c.bf16 %v662_v30, %v661_v29  ;;  %v663_v35 = vld [vmem:[%s4252_s17 + $0x70] sm:$0xff]  ;;  %v664_v36 = vld [vmem:[%s4252_s17 + $0x78] sm:$0xff]  ;;  %s5091_s17 = sld [smem:[#allocation25_spill]] }
  0x3c   : > { %3518 = vmatpush3.bf16.msra.mxu0 %v3897_v6  ;;  %3473 = vmatprep.mubr.msk.bf16.mxu1 %vm696_vm1, %v4262_v12  ;;  %v4331_v37 = vpack.c.bf16 %v664_v36, %v663_v35  ;;  %p3960_p4 = pneg %p3959_p3 }
  0x3d   : > { %3497 = vmatprep.mubr.msk.bf16.mxu0 %vm696_vm1, %v4274_v18  ;;  %3519 = vmatprep.subr.bf16.mxu0 %v3899_v19 }
  0x3e   : > { %3472 = vmatpush3.bf16.msra.mxu1 %v3898_v7  ;;  %v4513_v7 = vld [vmem:[%s5044_s6] ss:$0 sm:$0xff] }
  0x3f   : > { %3509 = vmatprep.subr.bf16.mxu1 %v4056_v1 }
  0x40   : > { %3520 = vmatpush3.bf16.msra.mxu0 %v3899_v19 }
  0x41   : > { %3557 = vmatprep.subr.bf16.mxu0 %v4056_v1  ;;  %3474 = vmatmul.mubr.msk.bf16.vlgmr.msra.gmra.mrb[4].mxu1 %vm696_vm1, %v4267_v16  ;;  %v3097_v51 = vld [vmem:[%s5091_s17] ss:$0 sm:$0xff] }
  0x42   : > { %3477 = vmatprep.mubr.msk.bf16.mxu1 %vm696_vm1, %v4274_v18  ;;  %3510 = vmatpush3.bf16.msra.mxu1 %v3900_v26 }
  0x43   : > { %3498 = vmatmul.mubr.msk.bf16.gmra.mrb[4].mxu0 %vm696_vm1, %v4289_v24  ;;  %3511 = vmatprep.subr.bf16.mxu1 %v4056_v1 }
  0x44   : > { %3501 = vmatprep.mubr.msk.bf16.mxu0 %vm696_vm1, %v4291_v25 }
  0x46   : > { %3512 = vmatpush3.bf16.msra.mxu1 %v3902_v31 }
  0x47   : > { %3537 = vmatprep.subr.bf16.mxu1 %v3903_v32 }
  0x49   : > { %3478 = vmatmul.mubr.msk.bf16.gmra.mrb[8].mxu1 %vm696_vm1, %v4289_v24 }
  0x4a   : > { %3481 = vmatprep.mubr.msk.bf16.mxu1 %vm696_vm1, %v4291_v25 }
  0x4b   : > { %3502 = vmatmul.mubr.msk.bf16.gmra.mrb[8].mxu0 %vm696_vm1, %v4317_v33 }
  0x4c   : > { %3505 = vmatprep.mubr.msk.bf16.mxu0 %vm696_vm1, %v4319_v34 }
  0x51   : > { %3482 = vmatmul.mubr.msk.bf16.gmra.mrb[12].mxu1 %vm696_vm1, %v4317_v33 }
  0x52   : > { %3485 = vmatprep.mubr.msk.bf16.mxu1 %vm696_vm1, %v4319_v34 }
  0x53   : > { %3506 = vmatmul.mubr.msk.bf16.gmra.mrb[12].mxu0 %vm696_vm1, %v4331_v37 }
  0x54   : > { %3521 = vmatprep.mubr.msk.bf16.mxu0 %vm696_vm1, %v4262_v12 }
  0x59   : > { %3486 = vmatmul.mubr.msk.bf16.gmra.mrb[16].mxu1 %vm696_vm1, %v4331_v37 }
  0x5a   : > { %3513 = vmatprep.mubr.msk.bf16.mxu1 %vm4057_vm0, %v4056_v1 }
  0x5b   : > { %3522 = vmatmul.mubr.msk.bf16.vlgmr.msra.gmra.mrb[16].mxu0 %vm696_vm1, %v4267_v16 }
  0x5c   : > { %3558 = vmatpush3.bf16.msra.mxu0 %v3901_v38  ;;  %3525 = vmatprep.mubr.msk.bf16.mxu0 %vm696_vm1, %v4274_v18 }
  0x5d   : > { %3559 = vmatprep.subr.bf16.mxu0 %v4056_v1 }
  0x60   : > { %3560 = vmatpush3.bf16.msra.mxu0 %v3905_v39 }
  0x61   : > { %3585 = vmatprep.subr.bf16.mxu0 %v3906_v40  ;;  %3514 = vmatmul.mubr.msk.bf16.vlgmr.msra.gmra.mrb[20].mxu1 %vm696_vm1, %v4260_v11 }
  0x62   : > { %3538 = vmatpush3.bf16.msra.mxu1 %v3903_v32  ;;  %3541 = vmatprep.mubr.msk.bf16.mxu1 %vm696_vm1, %v4262_v12 }
  0x63   : > { %3526 = vmatmul.mubr.msk.bf16.gmra.mrb[20].mxu0 %vm696_vm1, %v4289_v24  ;;  %3539 = vmatprep.subr.bf16.mxu1 %v3904_v41 }
  0x64   : > { %3529 = vmatprep.mubr.msk.bf16.mxu0 %vm696_vm1, %v4291_v25 }
  0x66   : > { %3540 = vmatpush3.bf16.msra.mxu1 %v3904_v41 }
  0x67   : > { %3565 = vmatprep.subr.bf16.mxu1 %v3907_v42 }
  0x69   : > { %3542 = vmatmul.mubr.msk.bf16.vlgmr.msra.gmra.mrb[24].mxu1 %vm696_vm1, %v4267_v16 }
  0x6a   : > { %3545 = vmatprep.mubr.msk.bf16.mxu1 %vm696_vm1, %v4274_v18  ;;  %3566 = vmatpush3.bf16.msra.mxu1 %v3907_v42 }
  0x6b   : > { %3530 = vmatmul.mubr.msk.bf16.gmra.mrb[24].mxu0 %vm696_vm1, %v4317_v33  ;;  %3567 = vmatprep.subr.bf16.mxu1 %v3910_v43 }
  0x6c   : > { %3533 = vmatprep.mubr.msk.bf16.mxu0 %vm696_vm1, %v4319_v34 }
  0x6e   : > { %3568 = vmatpush3.bf16.msra.mxu1 %v3910_v43 }
  0x6f   : > { %3605 = vmatprep.subr.bf16.mxu1 %v4056_v1 }
  0x71   : > { %3546 = vmatmul.mubr.msk.bf16.gmra.mrb[28].mxu1 %vm696_vm1, %v4289_v24 }
  0x72   : > { %3549 = vmatprep.mubr.msk.bf16.mxu1 %vm696_vm1, %v4291_v25 }
  0x73   : > { %3534 = vmatmul.mubr.msk.bf16.gmra.mrb[28].mxu0 %vm696_vm1, %v4331_v37 }
  0x74   : > { %3561 = vmatprep.mubr.msk.bf16.mxu0 %vm4057_vm0, %v4056_v1 }
  0x79   : > { %3550 = vmatmul.mubr.msk.bf16.gmra.mrb[32].mxu1 %vm696_vm1, %v4317_v33 }
  0x7a   : > { %3553 = vmatprep.mubr.msk.bf16.mxu1 %vm696_vm1, %v4319_v34 }
  0x7b   : > { %3562 = vmatmul.mubr.msk.bf16.vlgmr.msra.gmra.mrb[32].mxu0 %vm696_vm1, %v4260_v11 }
  0x7c   : > { %3586 = vmatpush3.bf16.msra.mxu0 %v3906_v40  ;;  %3589 = vmatprep.mubr.msk.bf16.mxu0 %vm696_vm1, %v4262_v12 }
  0x7d   : > { %3587 = vmatprep.subr.bf16.mxu0 %v3908_v44 }
  0x80   : > { %3588 = vmatpush3.bf16.msra.mxu0 %v3908_v44 }
  0x81   : > { %3613 = vmatprep.subr.bf16.mxu0 %v3909_v45  ;;  %3554 = vmatmul.mubr.msk.bf16.gmra.mrb[36].mxu1 %vm696_vm1, %v4331_v37 }
  0x82   : > { %3569 = vmatprep.mubr.msk.bf16.mxu1 %vm696_vm1, %v4262_v12 }
  0x83   : > { %3590 = vmatmul.mubr.msk.bf16.vlgmr.msra.gmra.mrb[36].mxu0 %vm696_vm1, %v4267_v16 }
  0x84   : > { %3614 = vmatpush3.bf16.msra.mxu0 %v3909_v45  ;;  %3593 = vmatprep.mubr.msk.bf16.mxu0 %vm696_vm1, %v4274_v18 }
  0x85   : > { %3615 = vmatprep.subr.bf16.mxu0 %v3911_v46 }
  0x88   : > { %3616 = vmatpush3.bf16.msra.mxu0 %v3911_v46 }
  0x89   : > { %3653 = vmatprep.subr.bf16.mxu0 %v4056_v1  ;;  %3570 = vmatmul.mubr.msk.bf16.vlgmr.msra.gmra.mrb[40].mxu1 %vm696_vm1, %v4267_v16 }
  0x8a   : > { %3573 = vmatprep.mubr.msk.bf16.mxu1 %vm696_vm1, %v4274_v18  ;;  %3606 = vmatpush3.bf16.msra.mxu1 %v3912_v47 }
  0x8b   : > { %3594 = vmatmul.mubr.msk.bf16.gmra.mrb[40].mxu0 %vm696_vm1, %v4289_v24  ;;  %3607 = vmatprep.subr.bf16.mxu1 %v4056_v1 }
  0x8c   : > { %3597 = vmatprep.mubr.msk.bf16.mxu0 %vm696_vm1, %v4291_v25 }
  0x8e   : > { %3608 = vmatpush3.bf16.msra.mxu1 %v3913_v48 }
  0x8f   : > { %3633 = vmatprep.subr.bf16.mxu1 %v3914_v49 }
  0x91   : > { %3574 = vmatmul.mubr.msk.bf16.gmra.mrb[44].mxu1 %vm696_vm1, %v4289_v24 }
  0x92   : > { %3577 = vmatprep.mubr.msk.bf16.mxu1 %vm696_vm1, %v4291_v25 }
  0x93   : > { %3598 = vmatmul.mubr.msk.bf16.gmra.mrb[44].mxu0 %vm696_vm1, %v4317_v33 }
  0x94   : > { %3601 = vmatprep.mubr.msk.bf16.mxu0 %vm696_vm1, %v4319_v34 }
  0x99   : > { %3578 = vmatmul.mubr.msk.bf16.gmra.mrb[48].mxu1 %vm696_vm1, %v4317_v33 }
  0x9a   : > { %3581 = vmatprep.mubr.msk.bf16.mxu1 %vm696_vm1, %v4319_v34 }
  0x9b   : > { %3602 = vmatmul.mubr.msk.bf16.gmra.mrb[48].mxu0 %vm696_vm1, %v4331_v37 }
  0x9c   : > { %3617 = vmatprep.mubr.msk.bf16.mxu0 %vm696_vm1, %v4262_v12 }
  0xa1   : > { %3582 = vmatmul.mubr.msk.bf16.gmra.mrb[52].mxu1 %vm696_vm1, %v4331_v37 }
  0xa2   : > { %3609 = vmatprep.mubr.msk.bf16.mxu1 %vm4057_vm0, %v4056_v1 }
  0xa3   : > { %3618 = vmatmul.mubr.msk.bf16.vlgmr.msra.gmra.mrb[52].mxu0 %vm696_vm1, %v4267_v16 }
  0xa4   : > { %3621 = vmatprep.mubr.msk.bf16.mxu0 %vm696_vm1, %v4274_v18 }
  0xa9   : > { %3610 = vmatmul.mubr.msk.bf16.vlgmr.msra.gmra.mrb[56].mxu1 %vm696_vm1, %v4260_v11 }
  0xaa   : > { %3637 = vmatprep.mubr.msk.bf16.mxu1 %vm696_vm1, %v4262_v12  ;;  %3634 = vmatpush3.bf16.msra.mxu1 %v3914_v49 }
  0xab   : > { %3622 = vmatmul.mubr.msk.bf16.gmra.mrb[56].mxu0 %vm696_vm1, %v4289_v24  ;;  %3635 = vmatprep.subr.bf16.mxu1 %v3915_v50 }
  0xac   : > { %3625 = vmatprep.mubr.msk.bf16.mxu0 %vm696_vm1, %v4291_v25 }
  0xae   : > { %3636 = vmatpush3.bf16.msra.mxu1 %v3915_v50 }
  0xaf   : > { %3673 = vmatprep.subr.bf16.mxu1 %v4056_v1 }
  0xb1   : > { %3638 = vmatmul.mubr.msk.bf16.vlgmr.msra.gmra.mrb[60].mxu1 %vm696_vm1, %v4267_v16 }
  0xb2   : > { %3641 = vmatprep.mubr.msk.bf16.mxu1 %vm696_vm1, %v4274_v18 }
  0xb3   : > { %3626 = vmatmul.mubr.msk.bf16.gmra.mrb[60].mxu0 %vm696_vm1, %v4317_v33 }
  0xb4   : > { %3629 = vmatprep.mubr.msk.bf16.mxu0 %vm696_vm1, %v4319_v34 }
  0xb9   : > { %3642 = vmatmul.mubr.msk.bf16.gmra.mrb[64].mxu1 %vm696_vm1, %v4289_v24 }
  0xba   : > { %3645 = vmatprep.mubr.msk.bf16.mxu1 %vm696_vm1, %v4291_v25 }
  0xbb   : > { %3630 = vmatmul.mubr.msk.bf16.gmra.mrb[64].mxu0 %vm696_vm1, %v4331_v37 }
  0xbc   : > { %3669 = vmatprep.mubr.msk.bf16.mxu0 %vm4057_vm0, %v4056_v1 }
  0xc1   : > { %3646 = vmatmul.mubr.msk.bf16.gmra.mrb[68].mxu1 %vm696_vm1, %v4317_v33 }
  0xc2   : > { %3649 = vmatprep.mubr.msk.bf16.mxu1 %vm696_vm1, %v4319_v34 }
  0xc9   : > { %3650 = vmatmul.mubr.msk.bf16.gmra.mrb[72].mxu1 %vm696_vm1, %v4331_v37 }
  0xca   : > { %3689 = vmatprep.mubr.msk.bf16.mxu1 %vm4057_vm0, %v4056_v1 }
 0x10c   : > { %v734_v52 = vpop.f32.mrb[0].mxu1 }
 0x10d   : > { %v735_v55 = vadd.f32 %v3097_v51, %v734_v52  ;;  %v3467_v56 = vpop.f32.mrb[1].mxu1 }
 0x10e   : > { %v3495_v53 = vpop.f32.mrb[0].mxu0  ;;  %v737_v58 = vpop.f32.mrb[2].mxu1 }
 0x10f   : > { %v962_v57 = vpop.f32.mrb[1].mxu0  ;;  %v740_v60 = vmul.f32 0.35355338, %v735_v55  ;;  %v3468_v61 = vpop.f32.mrb[3].mxu1  ;;  %v971_v62 = vadd.f32 %v3495_v53, %v4503_v54 }
 0x110   : > { %v3496_v59 = vpop.f32.mrb[2].mxu0  ;;  %v963_v2 = vadd.f32 %v4503_v54, %v962_v57 }
 0x111   : > { %v974_v63 = vadd.f32 %v3496_v59, %v4503_v54  ;;  %v965_v0 = vpop.f32.mrb[3].mxu0  ;;  %v741_v3 = vpack.c.bf16 %v740_v60, %v740_v60 }
 0x112   : > { %v966_v4 = vadd.f32 %v4503_v54, %v965_v0 }
 0x113   : > { %v1026_v5 = vpack.c.bf16 %v974_v63, %v971_v62  ;;  %743 = vst.msk [vmem:[#allocation2] sm:$0xf] %vm742_vm2, %v741_v3 }
 0x114   : > { %v1025_v6 = vpack.c.bf16 %v966_v4, %v963_v2  ;;  %v3475_v8 = vpop.f32.mrb[4].mxu1 }
 0x115   : > { %1034 = vst.msk [vmem:[#allocation4 + $0x8] sm:$0xff] %vm896_vm3, %v1026_v5  ;;  %v834_v9 = vadd.f32 %v3475_v8, %v4513_v7  ;;  %v825_v10 = vpop.f32.mrb[5].mxu1 }
 0x116   : > { %1033 = vst.msk [vmem:[#allocation4] sm:$0xff] %vm896_vm3, %v1025_v6  ;;  %v3499_v11 = vpop.f32.mrb[4].mxu0  ;;  %v826_v12 = vadd.f32 %v4513_v7, %v825_v10  ;;  %v3476_v13 = vpop.f32.mrb[6].mxu1 }
 0x117   : > { %v978_v14 = vpop.f32.mrb[5].mxu0  ;;  %v837_v15 = vadd.f32 %v3476_v13, %v4513_v7  ;;  %v828_v16 = vpop.f32.mrb[7].mxu1  ;;  %v987_v18 = vadd.f32 %v3499_v11, %v4503_v54 }
 0x118   : > { %v3500_v17 = vpop.f32.mrb[6].mxu0  ;;  %v829_v19 = vadd.f32 %v4513_v7, %v828_v16  ;;  %v979_v23 = vadd.f32 %v4503_v54, %v978_v14 }
 0x119   : > { %v990_v20 = vadd.f32 %v3500_v17, %v4503_v54  ;;  %v981_v21 = vpop.f32.mrb[7].mxu0  ;;  %v889_v22 = vpack.c.bf16 %v837_v15, %v834_v9 }
 0x11a   : > { %v982_v24 = vadd.f32 %v4503_v54, %v981_v21  ;;  %v888_v25 = vpack.c.bf16 %v829_v19, %v826_v12 }
 0x11b   : > { %v1028_v26 = vpack.c.bf16 %v990_v20, %v987_v18  ;;  %898 = vst.msk [vmem:[#allocation3 + $0x8] sm:$0xff] %vm896_vm3, %v889_v22 }
 0x11c   : > { %v1027_v27 = vpack.c.bf16 %v982_v24, %v979_v23  ;;  %897 = vst.msk [vmem:[#allocation3] sm:$0xff] %vm896_vm3, %v888_v25  ;;  %v3479_v28 = vpop.f32.mrb[8].mxu1 }
 0x11d   : > { %1036 = vst.msk [vmem:[#allocation4 + $0x18] sm:$0xff] %vm896_vm3, %v1028_v26  ;;  %v850_v30 = vadd.f32 %v3479_v28, %v4513_v7  ;;  %v841_v31 = vpop.f32.mrb[9].mxu1 }
 0x11e   : > { %1035 = vst.msk [vmem:[#allocation4 + $0x10] sm:$0xff] %vm896_vm3, %v1027_v27  ;;  %v3503_v29 = vpop.f32.mrb[8].mxu0  ;;  %v842_v33 = vadd.f32 %v4513_v7, %v841_v31  ;;  %v3480_v34 = vpop.f32.mrb[10].mxu1 }
 0x11f   : > { %v994_v32 = vpop.f32.mrb[9].mxu0  ;;  %v853_v36 = vadd.f32 %v3480_v34, %v4513_v7  ;;  %v844_v37 = vpop.f32.mrb[11].mxu1  ;;  %v1003_v38 = vadd.f32 %v3503_v29, %v4503_v54 }
 0x120   : > { %v3504_v35 = vpop.f32.mrb[10].mxu0  ;;  %v845_v41 = vadd.f32 %v4513_v7, %v844_v37  ;;  %v995_v42 = vadd.f32 %v4503_v54, %v994_v32  ;;  %v3128_v32 = vld [vmem:[%s5091_s17 + $0x1] ss:$0 sm:$0xff] }
 0x121   : > { %v1006_v39 = vadd.f32 %v3504_v35, %v4503_v54  ;;  %v997_v40 = vpop.f32.mrb[11].mxu0  ;;  %v891_v44 = vpack.c.bf16 %v853_v36, %v850_v30 }
 0x122   : > { %v998_v43 = vadd.f32 %v4503_v54, %v997_v40  ;;  %v890_v46 = vpack.c.bf16 %v845_v41, %v842_v33  ;;  %v2087_v59 = vld [vmem:[#allocation3 + $0x8] sm:$0xff] }
 0x123   : > { %v1030_v45 = vpack.c.bf16 %v1006_v39, %v1003_v38  ;;  %v2086_v48 = vld [vmem:[#allocation3] sm:$0xff]  ;;  %900 = vst.msk [vmem:[#allocation3 + $0x18] sm:$0xff] %vm896_vm3, %v891_v44  ;;  %v2157_v8 = vsel %vm896_vm3, %v2087_v59, 0 }
 0x124   : > { %v1029_v47 = vpack.c.bf16 %v998_v43, %v995_v42  ;;  %v2154_v49 = vsel %vm896_vm3, %v2086_v48, 0  ;;  %899 = vst.msk [vmem:[#allocation3 + $0x10] sm:$0xff] %vm896_vm3, %v890_v46  ;;  %v3483_v50 = vpop.f32.mrb[12].mxu1 }
 0x125   : > { %1038 = vst.msk [vmem:[#allocation4 + $0x28] sm:$0xff] %vm896_vm3, %v1030_v45  ;;  %3654 = vmatpush3.bf16.xpose.msra.mxu0 %v2154_v49  ;;  %v866_v52 = vadd.f32 %v3483_v50, %v4513_v7  ;;  %v857_v53 = vpop.f32.mrb[13].mxu1 }
 0x126   : > { %1037 = vst.msk [vmem:[#allocation4 + $0x20] sm:$0xff] %vm896_vm3, %v1029_v47  ;;  %v3507_v51 = vpop.f32.mrb[12].mxu0  ;;  %3655 = vmatprep.subr.bf16.mxu0 %v4056_v1  ;;  %v858_v56 = vadd.f32 %v4513_v7, %v857_v53  ;;  %v3484_v57 = vpop.f32.mrb[14].mxu1 }
 0x127   : > { %v1010_v55 = vpop.f32.mrb[13].mxu0  ;;  %v869_v60 = vadd.f32 %v3484_v57, %v4513_v7  ;;  %v860_v61 = vpop.f32.mrb[15].mxu1  ;;  %v1019_v62 = vadd.f32 %v3507_v51, %v4503_v54  ;;  %v4587_v51 = vld [vmem:[%s5046_s8 + $0x1] ss:$0 sm:$0xff] }
 0x128   : > { %v3508_v58 = vpop.f32.mrb[14].mxu0  ;;  %v861_v2 = vadd.f32 %v4513_v7, %v860_v61  ;;  %v1011_v3 = vadd.f32 %v4503_v54, %v1010_v55 }
 0x129   : > { %v1022_v63 = vadd.f32 %v3508_v58, %v4503_v54  ;;  %v1013_v0 = vpop.f32.mrb[15].mxu0  ;;  %v893_v5 = vpack.c.bf16 %v869_v60, %v866_v52 }
 0x12a   : > { %v1014_v4 = vadd.f32 %v4503_v54, %v1013_v0  ;;  %v892_v9 = vpack.c.bf16 %v861_v2, %v858_v56  ;;  %v4559_v54 = vld [vmem:[%s5044_s6 + $0x1] ss:$0 sm:$0xff]  ;;  %v2089_v40 = vld [vmem:[#allocation3 + $0x18] sm:$0xff] }
 0x12b   : > { %v1032_v6 = vpack.c.bf16 %v1022_v63, %v1019_v62  ;;  %902 = vst.msk [vmem:[#allocation3 + $0x28] sm:$0xff] %vm896_vm3, %v893_v5  ;;  %v2088_v19 = vld [vmem:[#allocation3 + $0x10] sm:$0xff]  ;;  %v2163_v50 = vsel %vm896_vm3, %v2089_v40, 0 }
 0x12c   : > { %v1031_v10 = vpack.c.bf16 %v1014_v4, %v1011_v3  ;;  %901 = vst.msk [vmem:[#allocation3 + $0x20] sm:$0xff] %vm896_vm3, %v892_v9  ;;  %v3487_v11 = vpop.f32.mrb[16].mxu1  ;;  %v2160_v30 = vsel %vm896_vm3, %v2088_v19, 0 }
 0x12d   : > { %1040 = vst.msk [vmem:[#allocation4 + $0x38] sm:$0xff] %vm896_vm3, %v1032_v6  ;;  %3656 = vmatpush3.bf16.xpose.msra.mxu0 %v2157_v8  ;;  %v882_v13 = vadd.f32 %v3487_v11, %v4513_v7  ;;  %v873_v14 = vpop.f32.mrb[17].mxu1 }
 0x12e   : > { %1039 = vst.msk [vmem:[#allocation4 + $0x30] sm:$0xff] %vm896_vm3, %v1031_v10  ;;  %v3523_v12 = vpop.f32.mrb[16].mxu0  ;;  %3657 = vmatprep.subr.bf16.mxu0 %v4056_v1  ;;  %v874_v16 = vadd.f32 %v4513_v7, %v873_v14  ;;  %v3488_v17 = vpop.f32.mrb[18].mxu1 }
 0x12f   : > { %v1169_v15 = vpop.f32.mrb[17].mxu0  ;;  %v885_v20 = vadd.f32 %v3488_v17, %v4513_v7  ;;  %v876_v21 = vpop.f32.mrb[19].mxu1  ;;  %v1178_v22 = vadd.f32 %v3523_v12, %v4559_v54 }
 0x130   : > { %v3524_v18 = vpop.f32.mrb[18].mxu0  ;;  %v877_v25 = vadd.f32 %v4513_v7, %v876_v21  ;;  %v1170_v26 = vadd.f32 %v4559_v54, %v1169_v15 }
 0x131   : > { %v1181_v23 = vadd.f32 %v3524_v18, %v4559_v54  ;;  %v1172_v24 = vpop.f32.mrb[19].mxu0  ;;  %v895_v28 = vpack.c.bf16 %v885_v20, %v882_v13 }
 0x132   : > { %v1173_v27 = vadd.f32 %v4559_v54, %v1172_v24  ;;  %v894_v31 = vpack.c.bf16 %v877_v25, %v874_v16 }
 0x133   : > { %v1233_v29 = vpack.c.bf16 %v1181_v23, %v1178_v22  ;;  %904 = vst.msk [vmem:[#allocation3 + $0x38] sm:$0xff] %vm896_vm3, %v895_v28  ;;  %v2090_v0 = vld [vmem:[#allocation3 + $0x20] sm:$0xff] }
 0x134   : > { %v1232_v33 = vpack.c.bf16 %v1173_v27, %v1170_v26  ;;  %903 = vst.msk [vmem:[#allocation3 + $0x30] sm:$0xff] %vm896_vm3, %v894_v31  ;;  %v1100_v7 = vpop.f32.mrb[20].mxu1  ;;  %v2166_v13 = vsel %vm896_vm3, %v2090_v0, 0 }
 0x135   : > { %1242 = vst.msk [vmem:[#allocation3 + $0x48] sm:$0xff] %vm896_vm3, %v1233_v29  ;;  %3658 = vmatpush3.bf16.xpose.msra.mxu0 %v2160_v30  ;;  %v1101_v35 = vadd.f32 %v3128_v32, %v1100_v7  ;;  %v3515_v36 = vpop.f32.mrb[21].mxu1  ;;  %v2091_v7 = vld [vmem:[#allocation3 + $0x28] sm:$0xff] }
 0x136   : > { %1241 = vst.msk [vmem:[#allocation3 + $0x40] sm:$0xff] %vm896_vm3, %v1232_v33  ;;  %v3527_v34 = vpop.f32.mrb[20].mxu0  ;;  %3659 = vmatprep.subr.bf16.mxu0 %v4056_v1  ;;  %v1103_v38 = vpop.f32.mrb[22].mxu1  ;;  %v2169_v40 = vsel %vm896_vm3, %v2091_v7, 0 }
 0x137   : > { %v1185_v37 = vpop.f32.mrb[21].mxu0  ;;  %v1106_v41 = vmul.f32 0.35355338, %v1101_v35  ;;  %v3516_v42 = vpop.f32.mrb[23].mxu1  ;;  %v1194_v43 = vadd.f32 %v3527_v34, %v4559_v54 }
 0x138   : > { %v3528_v39 = vpop.f32.mrb[22].mxu0  ;;  %v1186_v46 = vadd.f32 %v4559_v54, %v1185_v37 }
 0x139   : > { %v1197_v44 = vadd.f32 %v3528_v39, %v4559_v54  ;;  %v1188_v45 = vpop.f32.mrb[23].mxu0  ;;  %v1107_v48 = vpack.c.bf16 %v1106_v41, %v1106_v41  ;;  %v3169_v39 = vld [vmem:[%s5091_s17 + $0x2] ss:$0 sm:$0xff] }
 0x13a   : > { %v1189_v47 = vadd.f32 %v4559_v54, %v1188_v45 }
 0x13b   : > { %v1235_v49 = vpack.c.bf16 %v1197_v44, %v1194_v43  ;;  %1109 = vst.msk [vmem:[#allocation2 + $0x4] sm:$0xf] %vm742_vm2, %v1107_v48 }
 0x13c   : > { %v1234_v52 = vpack.c.bf16 %v1189_v47, %v1186_v46  ;;  %v3543_v55 = vpop.f32.mrb[24].mxu1  ;;  %v2095_v14 = vld [vmem:[#allocation3 + $0x48] sm:$0xff] }
 0x13d   : > { %1244 = vst.msk [vmem:[#allocation3 + $0x58] sm:$0xff] %vm896_vm3, %v1235_v49  ;;  %v2094_v53 = vld [vmem:[#allocation3 + $0x40] sm:$0xff]  ;;  %3660 = vmatpush3.bf16.xpose.msra.mxu0 %v2163_v50  ;;  %v1317_v58 = vadd.f32 %v3543_v55, %v4587_v51  ;;  %v1308_v59 = vpop.f32.mrb[25].mxu1  ;;  %v2224_v19 = vsel %vm896_vm3, %v2095_v14, 0 }
 0x13e   : > { %1243 = vst.msk [vmem:[#allocation3 + $0x50] sm:$0xff] %vm896_vm3, %v1234_v52  ;;  %v3531_v56 = vpop.f32.mrb[24].mxu0  ;;  %v2221_v57 = vsel %vm896_vm3, %v2094_v53, 0  ;;  %3661 = vmatprep.subr.bf16.mxu0 %v4056_v1  ;;  %v1309_v61 = vadd.f32 %v4587_v51, %v1308_v59  ;;  %v3544_v62 = vpop.f32.mrb[26].mxu1 }
 0x13f   : > { %v1201_v60 = vpop.f32.mrb[25].mxu0  ;;  %3674 = vmatpush3.bf16.xpose.msra.mxu1 %v2221_v57  ;;  %v1320_v2 = vadd.f32 %v3544_v62, %v4587_v51  ;;  %v1311_v3 = vpop.f32.mrb[27].mxu1  ;;  %v1210_v4 = vadd.f32 %v3531_v56, %v4559_v54  ;;  %v2092_v57 = vld [vmem:[#allocation3 + $0x30] sm:$0xff] }
 0x140   : > { %v3532_v63 = vpop.f32.mrb[26].mxu0  ;;  %3675 = vmatprep.subr.bf16.mxu1 %v4056_v1  ;;  %v1312_v8 = vadd.f32 %v4587_v51, %v1311_v3  ;;  %v1202_v9 = vadd.f32 %v4559_v54, %v1201_v60  ;;  %v2172_v62 = vsel %vm896_vm3, %v2092_v57, 0 }
 0x141   : > { %v1213_v5 = vadd.f32 %v3532_v63, %v4559_v54  ;;  %v1204_v6 = vpop.f32.mrb[27].mxu0  ;;  %v1372_v11 = vpack.c.bf16 %v1320_v2, %v1317_v58  ;;  %v4641_v2 = vld [vmem:[%s5046_s8 + $0x2] ss:$0 sm:$0xff] }
 0x142   : > { %v1205_v10 = vadd.f32 %v4559_v54, %v1204_v6  ;;  %v1371_v15 = vpack.c.bf16 %v1312_v8, %v1309_v61 }
 0x143   : > { %v1237_v12 = vpack.c.bf16 %v1213_v5, %v1210_v4  ;;  %1381 = vst.msk [vmem:[#allocation4 + $0x48] sm:$0xff] %vm896_vm3, %v1372_v11 }
 0x144   : > { %v1236_v16 = vpack.c.bf16 %v1205_v10, %v1202_v9  ;;  %1380 = vst.msk [vmem:[#allocation4 + $0x40] sm:$0xff] %vm896_vm3, %v1371_v15  ;;  %v3547_v17 = vpop.f32.mrb[28].mxu1  ;;  %v2097_v60 = vld [vmem:[#allocation3 + $0x58] sm:$0xff] }
 0x145   : > { %1246 = vst.msk [vmem:[#allocation3 + $0x68] sm:$0xff] %vm896_vm3, %v1237_v12  ;;  %3662 = vmatpush3.bf16.xpose.msra.mxu0 %v2166_v13  ;;  %v1333_v20 = vadd.f32 %v3547_v17, %v4587_v51  ;;  %v1324_v21 = vpop.f32.mrb[29].mxu1  ;;  %v2096_v36 = vld [vmem:[#allocation3 + $0x50] sm:$0xff]  ;;  %v2230_v3 = vsel %vm896_vm3, %v2097_v60, 0 }
 0x146   : > { %1245 = vst.msk [vmem:[#allocation3 + $0x60] sm:$0xff] %vm896_vm3, %v1236_v16  ;;  %v3535_v18 = vpop.f32.mrb[28].mxu0  ;;  %3663 = vmatprep.subr.bf16.mxu0 %v4056_v1  ;;  %v1325_v23 = vadd.f32 %v4587_v51, %v1324_v21  ;;  %v3548_v24 = vpop.f32.mrb[30].mxu1  ;;  %v2227_v42 = vsel %vm896_vm3, %v2096_v36, 0 }
 0x147   : > { %v1217_v22 = vpop.f32.mrb[29].mxu0  ;;  %3676 = vmatpush3.bf16.xpose.msra.mxu1 %v2224_v19  ;;  %v1336_v26 = vadd.f32 %v3548_v24, %v4587_v51  ;;  %v1327_v27 = vpop.f32.mrb[31].mxu1  ;;  %v1226_v28 = vadd.f32 %v3535_v18, %v4559_v54 }
 0x148   : > { %v3536_v25 = vpop.f32.mrb[30].mxu0  ;;  %3677 = vmatprep.subr.bf16.mxu1 %v4056_v1  ;;  %v1328_v31 = vadd.f32 %v4587_v51, %v1327_v27  ;;  %v1218_v32 = vadd.f32 %v4559_v54, %v1217_v22 }
 0x149   : > { %v1229_v29 = vadd.f32 %v3536_v25, %v4559_v54  ;;  %v1220_v30 = vpop.f32.mrb[31].mxu0  ;;  %v1374_v34 = vpack.c.bf16 %v1336_v26, %v1333_v20  ;;  %v2093_v20 = vld [vmem:[#allocation3 + $0x38] sm:$0xff]  ;;  %v4658_v25 = vld [vmem:[%s5044_s6 + $0x2] ss:$0 sm:$0xff] }
 0x14a   : > { %v1221_v33 = vadd.f32 %v4559_v54, %v1220_v30  ;;  %v1373_v37 = vpack.c.bf16 %v1328_v31, %v1325_v23  ;;  %v2175_v26 = vsel %vm896_vm3, %v2093_v20, 0 }
 0x14b   : > { %v1239_v35 = vpack.c.bf16 %v1229_v29, %v1226_v28  ;;  %1383 = vst.msk [vmem:[#allocation4 + $0x58] sm:$0xff] %vm896_vm3, %v1374_v34 }
 0x14c   : > { %v1238_v38 = vpack.c.bf16 %v1221_v33, %v1218_v32  ;;  %1382 = vst.msk [vmem:[#allocation4 + $0x50] sm:$0xff] %vm896_vm3, %v1373_v37  ;;  %v3551_v41 = vpop.f32.mrb[32].mxu1 }
 0x14d   : > { %1248 = vst.msk [vmem:[#allocation3 + $0x78] sm:$0xff] %vm896_vm3, %v1239_v35  ;;  %3664 = vmatpush3.bf16.xpose.msra.mxu0 %v2169_v40  ;;  %v1349_v43 = vadd.f32 %v3551_v41, %v4587_v51  ;;  %v1340_v44 = vpop.f32.mrb[33].mxu1  ;;  %v2098_v23 = vld [vmem:[#allocation3 + $0x60] sm:$0xff] }
 0x14e   : > { %1247 = vst.msk [vmem:[#allocation3 + $0x70] sm:$0xff] %vm896_vm3, %v1238_v38  ;;  %v1447_v54 = vpop.f32.mrb[32].mxu0  ;;  %3665 = vmatprep.subr.bf16.mxu0 %v4056_v1  ;;  %v1341_v47 = vadd.f32 %v4587_v51, %v1340_v44  ;;  %v3552_v48 = vpop.f32.mrb[34].mxu1  ;;  %v2233_v30 = vsel %vm896_vm3, %v2098_v23, 0  ;;  %v2099_v44 = vld [vmem:[#allocation3 + $0x68] sm:$0xff] }
 0x14f   : > { %v1448_v45 = vadd.f32 %v3169_v39, %v1447_v54  ;;  %v3563_v46 = vpop.f32.mrb[33].mxu0  ;;  %3678 = vmatpush3.bf16.xpose.msra.mxu1 %v2227_v42  ;;  %v1352_v50 = vadd.f32 %v3552_v48, %v4587_v51  ;;  %v1343_v52 = vpop.f32.mrb[35].mxu1 }
 0x150   : > { %v1450_v49 = vpop.f32.mrb[34].mxu0  ;;  %3679 = vmatprep.subr.bf16.mxu1 %v4056_v1  ;;  %v1344_v56 = vadd.f32 %v4587_v51, %v1343_v52  ;;  %v2082_v46 = vld [vmem:[#allocation2] sm:$0xf] }
 0x151   : > { %v1453_v53 = vmul.f32 0.35355338, %v1448_v45  ;;  %v3564_v55 = vpop.f32.mrb[35].mxu0  ;;  %v1376_v58 = vpack.c.bf16 %v1352_v50, %v1349_v43  ;;  %v2236_v49 = vsel %vm896_vm3, %v2099_v44, 0 }
 0x152   : > { %v1375_v61 = vpack.c.bf16 %v1344_v56, %v1341_v47 }
 0x153   : > { %v1454_v59 = vpack.c.bf16 %v1453_v53, %v1453_v53  ;;  %1385 = vst.msk [vmem:[#allocation4 + $0x68] sm:$0xff] %vm896_vm3, %v1376_v58 }
 0x154   : > { %1384 = vst.msk [vmem:[#allocation4 + $0x60] sm:$0xff] %vm896_vm3, %v1375_v61  ;;  %v3555_v63 = vpop.f32.mrb[36].mxu1 }
 0x155   : > { %1456 = vst.msk [vmem:[#allocation2 + $0x8] sm:$0xf] %vm742_vm2, %v1454_v59  ;;  %3666 = vmatpush3.bf16.xpose.msra.mxu0 %v2172_v62  ;;  %v1365_v4 = vadd.f32 %v3555_v63, %v4587_v51  ;;  %v1356_v5 = vpop.f32.mrb[37].mxu1 }
 0x156   : > { %v3591_v0 = vpop.f32.mrb[36].mxu0  ;;  %v1357_v8 = vadd.f32 %v4587_v51, %v1356_v5  ;;  %v3556_v9 = vpop.f32.mrb[38].mxu1  ;;  %3667 = vmatprep.subr.bf16.mxu0 %v4056_v1 }
 0x157   : > { %v1655_v6 = vpop.f32.mrb[37].mxu0  ;;  %3680 = vmatpush3.bf16.xpose.msra.mxu1 %v2230_v3  ;;  %v1368_v11 = vadd.f32 %v3556_v9, %v4587_v51  ;;  %v1359_v12 = vpop.f32.mrb[39].mxu1  ;;  %v1664_v13 = vadd.f32 %v3591_v0, %v4641_v2 }
 0x158   : > { %v3592_v10 = vpop.f32.mrb[38].mxu0  ;;  %3681 = vmatprep.subr.bf16.mxu1 %v4056_v1  ;;  %v1360_v16 = vadd.f32 %v4587_v51, %v1359_v12  ;;  %v1656_v17 = vadd.f32 %v4641_v2, %v1655_v6  ;;  %v2100_v6 = vld [vmem:[#allocation3 + $0x70] sm:$0xff] }
 0x159   : > { %v1667_v14 = vadd.f32 %v3592_v10, %v4641_v2  ;;  %v1658_v15 = vpop.f32.mrb[39].mxu0  ;;  %v1378_v19 = vpack.c.bf16 %v1368_v11, %v1365_v4 }
 0x15a   : > { %v1659_v18 = vadd.f32 %v4641_v2, %v1658_v15  ;;  %v1377_v22 = vpack.c.bf16 %v1360_v16, %v1357_v8 }
 0x15b   : > { %v1719_v21 = vpack.c.bf16 %v1667_v14, %v1664_v13  ;;  %1387 = vst.msk [vmem:[#allocation4 + $0x78] sm:$0xff] %vm896_vm3, %v1378_v19  ;;  %v2239_v14 = vsel %vm896_vm3, %v2100_v6, 0 }
 0x15c   : > { %v1718_v24 = vpack.c.bf16 %v1659_v18, %v1656_v17  ;;  %1386 = vst.msk [vmem:[#allocation4 + $0x70] sm:$0xff] %vm896_vm3, %v1377_v22  ;;  %v3571_v51 = vpop.f32.mrb[40].mxu1 }
 0x15d   : > { %1728 = vst.msk [vmem:[#allocation4 + $0x88] sm:$0xff] %vm896_vm3, %v1719_v21  ;;  %v1525_v27 = vadd.f32 %v3571_v51, %v4658_v25  ;;  %v1516_v28 = vpop.f32.mrb[41].mxu1  ;;  %3668 = vmatpush3.bf16.xpose.msra.mxu0 %v2175_v26 }
 0x15e   : > { %1727 = vst.msk [vmem:[#allocation4 + $0x80] sm:$0xff] %vm896_vm3, %v1718_v24  ;;  %v3595_v29 = vpop.f32.mrb[40].mxu0  ;;  %v1517_v31 = vadd.f32 %v4658_v25, %v1516_v28  ;;  %v3572_v32 = vpop.f32.mrb[42].mxu1  ;;  %3693 = vmatprep.subr.bf16.mxu0 %v4056_v1 }
 0x15f   : > { %v1671_v33 = vpop.f32.mrb[41].mxu0  ;;  %3682 = vmatpush3.bf16.xpose.msra.mxu1 %v2233_v30  ;;  %v1528_v7 = vadd.f32 %v3572_v32, %v4658_v25  ;;  %v1519_v34 = vpop.f32.mrb[43].mxu1  ;;  %v1680_v36 = vadd.f32 %v3595_v29, %v4641_v2 }
 0x160   : > { %v3596_v35 = vpop.f32.mrb[42].mxu0  ;;  %3683 = vmatprep.subr.bf16.mxu1 %v4056_v1  ;;  %v1520_v37 = vadd.f32 %v4658_v25, %v1519_v34  ;;  %v1672_v41 = vadd.f32 %v4641_v2, %v1671_v33  ;;  %v2101_v33 = vld [vmem:[#allocation3 + $0x78] sm:$0xff] }
 0x161   : > { %v1683_v38 = vadd.f32 %v3596_v35, %v4641_v2  ;;  %v1674_v39 = vpop.f32.mrb[43].mxu0  ;;  %v1580_v40 = vpack.c.bf16 %v1528_v7, %v1525_v27 }
 0x162   : > { %v1675_v54 = vadd.f32 %v4641_v2, %v1674_v39  ;;  %v1579_v42 = vpack.c.bf16 %v1520_v37, %v1517_v31  ;;  %v2242_v37 = vsel %vm896_vm3, %v2101_v33, 0 }
 0x163   : > { %v1721_v43 = vpack.c.bf16 %v1683_v38, %v1680_v36  ;;  %1589 = vst.msk [vmem:[#allocation3 + $0x88] sm:$0xff] %vm896_vm3, %v1580_v40 }
 0x164   : > { %v1720_v45 = vpack.c.bf16 %v1675_v54, %v1672_v41  ;;  %1588 = vst.msk [vmem:[#allocation3 + $0x80] sm:$0xff] %vm896_vm3, %v1579_v42  ;;  %3670 = vmatmul.mubr.msk.bf16.vlgmr.msra.gmra.mrb[68].mxu0 %vm896_vm3, %v2082_v46  ;;  %v3575_v47 = vpop.f32.mrb[44].mxu1 }
 0x165   : > { %1730 = vst.msk [vmem:[#allocation4 + $0x98] sm:$0xff] %vm896_vm3, %v1721_v43  ;;  %v1541_v50 = vadd.f32 %v3575_v47, %v4658_v25  ;;  %v1532_v52 = vpop.f32.mrb[45].mxu1  ;;  %3709 = vmatprep.mubr.msk.bf16.mxu0 %vm4057_vm0, %v4056_v1 }
 0x166   : > { %1729 = vst.msk [vmem:[#allocation4 + $0x90] sm:$0xff] %vm896_vm3, %v1720_v45  ;;  %v3599_v48 = vpop.f32.mrb[44].mxu0  ;;  %v1533_v55 = vadd.f32 %v4658_v25, %v1532_v52  ;;  %v3576_v56 = vpop.f32.mrb[46].mxu1 }
 0x167   : > { %v1687_v53 = vpop.f32.mrb[45].mxu0  ;;  %3684 = vmatpush3.bf16.xpose.msra.mxu1 %v2236_v49  ;;  %v1544_v58 = vadd.f32 %v3576_v56, %v4658_v25  ;;  %v1535_v59 = vpop.f32.mrb[47].mxu1  ;;  %v1696_v60 = vadd.f32 %v3599_v48, %v4641_v2 }
 0x168   : > { %v3600_v57 = vpop.f32.mrb[46].mxu0  ;;  %3685 = vmatprep.subr.bf16.mxu1 %v4056_v1  ;;  %v1536_v63 = vadd.f32 %v4658_v25, %v1535_v59  ;;  %v1688_v0 = vadd.f32 %v4641_v2, %v1687_v53 }
 0x169   : > { %v1699_v61 = vadd.f32 %v3600_v57, %v4641_v2  ;;  %v1690_v62 = vpop.f32.mrb[47].mxu0  ;;  %v1582_v4 = vpack.c.bf16 %v1544_v58, %v1541_v50  ;;  %v3210_v58 = vld [vmem:[%s5091_s17 + $0x3] ss:$0 sm:$0xff] }
 0x16a   : > { %v1691_v3 = vadd.f32 %v4641_v2, %v1690_v62  ;;  %v1581_v8 = vpack.c.bf16 %v1536_v63, %v1533_v55  ;;  %v2103_v21 = vld [vmem:[#allocation3 + $0x88] sm:$0xff] }
 0x16b   : > { %v1723_v5 = vpack.c.bf16 %v1699_v61, %v1696_v60  ;;  %v2102_v10 = vld [vmem:[#allocation3 + $0x80] sm:$0xff]  ;;  %1591 = vst.msk [vmem:[#allocation3 + $0x98] sm:$0xff] %vm896_vm3, %v1582_v4  ;;  %v2291_v32 = vsel %vm896_vm3, %v2103_v21, 0  ;;  %v2083_v60 = vld [vmem:[#allocation2 + $0x4] sm:$0xf] }
 0x16c   : > { %v1722_v9 = vpack.c.bf16 %v1691_v3, %v1688_v0  ;;  %v2288_v11 = vsel %vm896_vm3, %v2102_v10, 0  ;;  %1590 = vst.msk [vmem:[#allocation3 + $0x90] sm:$0xff] %vm896_vm3, %v1581_v8  ;;  %v3579_v12 = vpop.f32.mrb[48].mxu1 }
 0x16d   : > { %1732 = vst.msk [vmem:[#allocation4 + $0xa8] sm:$0xff] %vm896_vm3, %v1723_v5  ;;  %3694 = vmatpush3.bf16.xpose.msra.mxu0 %v2288_v11  ;;  %v1557_v15 = vadd.f32 %v3579_v12, %v4658_v25  ;;  %v1548_v16 = vpop.f32.mrb[49].mxu1 }
 0x16e   : > { %1731 = vst.msk [vmem:[#allocation4 + $0xa0] sm:$0xff] %vm896_vm3, %v1722_v9  ;;  %v3603_v13 = vpop.f32.mrb[48].mxu0  ;;  %3695 = vmatprep.subr.bf16.mxu0 %v4056_v1  ;;  %v1549_v18 = vadd.f32 %v4658_v25, %v1548_v16  ;;  %v3580_v19 = vpop.f32.mrb[50].mxu1 }
 0x16f   : > { %v1703_v17 = vpop.f32.mrb[49].mxu0  ;;  %3686 = vmatpush3.bf16.xpose.msra.mxu1 %v2239_v14  ;;  %v1560_v22 = vadd.f32 %v3580_v19, %v4658_v25  ;;  %v1551_v23 = vpop.f32.mrb[51].mxu1  ;;  %v1712_v24 = vadd.f32 %v3603_v13, %v4641_v2 }
 0x170   : > { %v3604_v20 = vpop.f32.mrb[50].mxu0  ;;  %3687 = vmatprep.subr.bf16.mxu1 %v4056_v1  ;;  %v1552_v27 = vadd.f32 %v4658_v25, %v1551_v23  ;;  %v1704_v28 = vadd.f32 %v4641_v2, %v1703_v17 }
 0x171   : > { %v1715_v51 = vadd.f32 %v3604_v20, %v4641_v2  ;;  %v1706_v26 = vpop.f32.mrb[51].mxu0  ;;  %v1584_v30 = vpack.c.bf16 %v1560_v22, %v1557_v15 }
 0x172   : > { %v1707_v29 = vadd.f32 %v4641_v2, %v1706_v26  ;;  %v1583_v7 = vpack.c.bf16 %v1552_v27, %v1549_v18  ;;  %v4716_v2 = vld [vmem:[%s5044_s6 + $0x3] ss:$0 sm:$0xff]  ;;  %v2105_v8 = vld [vmem:[#allocation3 + $0x98] sm:$0xff] }
 0x173   : > { %v1725_v31 = vpack.c.bf16 %v1715_v51, %v1712_v24  ;;  %1593 = vst.msk [vmem:[#allocation3 + $0xa8] sm:$0xff] %vm896_vm3, %v1584_v30  ;;  %v2104_v43 = vld [vmem:[#allocation3 + $0x90] sm:$0xff]  ;;  %v2297_v16 = vsel %vm896_vm3, %v2105_v8, 0  ;;  %v2119_v8 = vld [vmem:[#allocation4 + $0x8] sm:$0xff] }
 0x174   : > { %v1724_v34 = vpack.c.bf16 %v1707_v29, %v1704_v28  ;;  %1592 = vst.msk [vmem:[#allocation3 + $0xa0] sm:$0xff] %vm896_vm3, %v1583_v7  ;;  %v3583_v35 = vpop.f32.mrb[52].mxu1  ;;  %v2294_v56 = vsel %vm896_vm3, %v2104_v43, 0  ;;  %v4759_v29 = vld [vmem:[%s5046_s8 + $0x3] ss:$0 sm:$0xff] }
 0x175   : > { %1734 = vst.msk [vmem:[#allocation4 + $0xb8] sm:$0xff] %vm896_vm3, %v1725_v31  ;;  %3696 = vmatpush3.bf16.xpose.msra.mxu0 %v2291_v32  ;;  %v1573_v38 = vadd.f32 %v3583_v35, %v4658_v25  ;;  %v1564_v39 = vpop.f32.mrb[53].mxu1 }
 0x176   : > { %1733 = vst.msk [vmem:[#allocation4 + $0xb0] sm:$0xff] %vm896_vm3, %v1724_v34  ;;  %v3619_v36 = vpop.f32.mrb[52].mxu0  ;;  %3697 = vmatprep.subr.bf16.mxu0 %v4056_v1  ;;  %v1565_v41 = vadd.f32 %v4658_v25, %v1564_v39  ;;  %v3584_v54 = vpop.f32.mrb[54].mxu1 }
 0x177   : > { %v1863_v40 = vpop.f32.mrb[53].mxu0  ;;  %3688 = vmatpush3.bf16.xpose.msra.mxu1 %v2242_v37  ;;  %v1576_v44 = vadd.f32 %v3584_v54, %v4658_v25  ;;  %v1567_v45 = vpop.f32.mrb[55].mxu1  ;;  %v1872_v46 = vadd.f32 %v3619_v36, %v4716_v2 }
 0x178   : > { %v3620_v42 = vpop.f32.mrb[54].mxu0  ;;  %3713 = vmatprep.subr.bf16.mxu1 %v4056_v1  ;;  %v1568_v49 = vadd.f32 %v4658_v25, %v1567_v45  ;;  %v1864_v50 = vadd.f32 %v4716_v2, %v1863_v40 }
 0x179   : > { %v1875_v47 = vadd.f32 %v3620_v42, %v4716_v2  ;;  %v1866_v48 = vpop.f32.mrb[55].mxu0  ;;  %v1586_v53 = vpack.c.bf16 %v1576_v44, %v1573_v38 }
 0x17a   : > { %v1867_v52 = vadd.f32 %v4716_v2, %v1866_v48  ;;  %v1585_v57 = vpack.c.bf16 %v1568_v49, %v1565_v41  ;;  %v2107_v43 = vld [vmem:[#allocation3 + $0xa8] sm:$0xff] }
 0x17b   : > { %v1927_v55 = vpack.c.bf16 %v1875_v47, %v1872_v46  ;;  %1595 = vst.msk [vmem:[#allocation3 + $0xb8] sm:$0xff] %vm896_vm3, %v1586_v53  ;;  %v2106_v23 = vld [vmem:[#allocation3 + $0xa0] sm:$0xff]  ;;  %v2303_v53 = vsel %vm896_vm3, %v2107_v43, 0 }
 0x17c   : > { %v1926_v59 = vpack.c.bf16 %v1867_v52, %v1864_v50  ;;  %1594 = vst.msk [vmem:[#allocation3 + $0xb0] sm:$0xff] %vm896_vm3, %v1585_v57  ;;  %v1794_v25 = vpop.f32.mrb[56].mxu1  ;;  %v2300_v30 = vsel %vm896_vm3, %v2106_v23, 0  ;;  %v2126_v43 = vld [vmem:[#allocation4 + $0x40] sm:$0xff] }
 0x17d   : > { %1936 = vst.msk [vmem:[#allocation3 + $0xc8] sm:$0xff] %vm896_vm3, %v1927_v55  ;;  %3698 = vmatpush3.bf16.xpose.msra.mxu0 %v2294_v56  ;;  %v1795_v62 = vadd.f32 %v3210_v58, %v1794_v25  ;;  %v3611_v63 = vpop.f32.mrb[57].mxu1 }
 0x17e   : > { %1935 = vst.msk [vmem:[#allocation3 + $0xc0] sm:$0xff] %vm896_vm3, %v1926_v59  ;;  %3690 = vmatmul.mubr.msk.bf16.vlgmr.msra.gmra.mrb[76].mxu1 %vm896_vm3, %v2083_v60  ;;  %v3623_v61 = vpop.f32.mrb[56].mxu0  ;;  %3699 = vmatprep.subr.bf16.mxu0 %v4056_v1  ;;  %v1797_v4 = vpop.f32.mrb[58].mxu1 }
 0x17f   : > { %v1888_v0 = vadd.f32 %v3623_v61, %v4716_v2  ;;  %v1879_v3 = vpop.f32.mrb[57].mxu0  ;;  %3729 = vmatprep.mubr.msk.bf16.mxu1 %vm4057_vm0, %v4056_v1  ;;  %v1800_v9 = vmul.f32 0.35355338, %v1795_v62  ;;  %v3612_v10 = vpop.f32.mrb[59].mxu1  ;;  %v2084_v4 = vld [vmem:[#allocation2 + $0x8] sm:$0xf] }
 0x180   : > { %v1880_v5 = vadd.f32 %v4716_v2, %v1879_v3  ;;  %v3624_v6 = vpop.f32.mrb[58].mxu0  ;;  %v2120_v10 = vld [vmem:[#allocation4 + $0x10] sm:$0xff] }
 0x181   : > { %v1891_v11 = vadd.f32 %v3624_v6, %v4716_v2  ;;  %v1882_v12 = vpop.f32.mrb[59].mxu0  ;;  %v1801_v14 = vpack.c.bf16 %v1800_v9, %v1800_v9 }
 0x182   : > { %v1883_v13 = vadd.f32 %v4716_v2, %v1882_v12  ;;  %v2109_v61 = vld [vmem:[#allocation3 + $0xb8] sm:$0xff] }
 0x183   : > { %v1929_v15 = vpack.c.bf16 %v1891_v11, %v1888_v0  ;;  %1803 = vst.msk [vmem:[#allocation2 + $0xc] sm:$0xf] %vm742_vm2, %v1801_v14  ;;  %v2309_v62 = vsel %vm896_vm3, %v2109_v61, 0  ;;  %v2121_v12 = vld [vmem:[#allocation4 + $0x18] sm:$0xff] }
 0x184   : > { %v1928_v17 = vpack.c.bf16 %v1883_v13, %v1880_v5  ;;  %v2111_v31 = vld [vmem:[#allocation3 + $0xc8] sm:$0xff]  ;;  %v3639_v7 = vpop.f32.mrb[60].mxu1  ;;  %v2118_v5 = vld [vmem:[#allocation4] sm:$0xff] }
 0x185   : > { %1938 = vst.msk [vmem:[#allocation3 + $0xd8] sm:$0xff] %vm896_vm3, %v1929_v15  ;;  %v2110_v18 = vld [vmem:[#allocation3 + $0xc0] sm:$0xff]  ;;  %3700 = vmatpush3.bf16.xpose.msra.mxu0 %v2297_v16  ;;  %v2011_v34 = vadd.f32 %v3639_v7, %v4759_v29  ;;  %v2002_v35 = vpop.f32.mrb[61].mxu1  ;;  %v2358_v36 = vsel %vm896_vm3, %v2111_v31, 0 }
 0x186   : > { %1937 = vst.msk [vmem:[#allocation3 + $0xd0] sm:$0xff] %vm896_vm3, %v1928_v17  ;;  %v2355_v19 = vsel %vm896_vm3, %v2110_v18, 0  ;;  %v3627_v20 = vpop.f32.mrb[60].mxu0  ;;  %3701 = vmatprep.subr.bf16.mxu0 %v4056_v1  ;;  %v2003_v38 = vadd.f32 %v4759_v29, %v2002_v35  ;;  %v3640_v39 = vpop.f32.mrb[62].mxu1  ;;  %v2122_v17 = vld [vmem:[#allocation4 + $0x20] sm:$0xff] }
 0x187   : > { %3714 = vmatpush3.bf16.xpose.msra.mxu1 %v2355_v19  ;;  %v1904_v21 = vadd.f32 %v3627_v20, %v4716_v2  ;;  %v1895_v22 = vpop.f32.mrb[61].mxu0  ;;  %v2014_v54 = vadd.f32 %v3640_v39, %v4759_v29  ;;  %v2005_v42 = vpop.f32.mrb[63].mxu1 }
 0x188   : > { %3715 = vmatprep.subr.bf16.mxu1 %v4056_v1  ;;  %v1896_v24 = vadd.f32 %v4716_v2, %v1895_v22  ;;  %v3628_v51 = vpop.f32.mrb[62].mxu0  ;;  %v2006_v46 = vadd.f32 %v4759_v29, %v2005_v42 }
 0x189   : > { %v1907_v26 = vadd.f32 %v3628_v51, %v4716_v2  ;;  %v1898_v27 = vpop.f32.mrb[63].mxu0  ;;  %v2066_v49 = vpack.c.bf16 %v2014_v54, %v2011_v34 }
 0x18a   : > { %v1899_v28 = vadd.f32 %v4716_v2, %v1898_v27  ;;  %v2065_v52 = vpack.c.bf16 %v2006_v46, %v2003_v38  ;;  %v2085_v34 = vld [vmem:[#allocation2 + $0xc] sm:$0xf] }
 0x18b   : > { %v1931_v32 = vpack.c.bf16 %v1907_v26, %v1904_v21  ;;  %2075 = vst.msk [vmem:[#allocation4 + $0xc8] sm:$0xff] %vm896_vm3, %v2066_v49 }
 0x18c   : > { %v1930_v33 = vpack.c.bf16 %v1899_v28, %v1896_v24  ;;  %2074 = vst.msk [vmem:[#allocation4 + $0xc0] sm:$0xff] %vm896_vm3, %v2065_v52  ;;  %v2113_v60 = vld [vmem:[#allocation3 + $0xd8] sm:$0xff]  ;;  %v3643_v14 = vpop.f32.mrb[64].mxu1  ;;  %v2123_v28 = vld [vmem:[#allocation4 + $0x28] sm:$0xff] }
 0x18d   : > { %1940 = vst.msk [vmem:[#allocation3 + $0xe8] sm:$0xff] %vm896_vm3, %v1931_v32  ;;  %3702 = vmatpush3.bf16.xpose.msra.mxu0 %v2300_v30  ;;  %v2112_v55 = vld [vmem:[#allocation3 + $0xd0] sm:$0xff]  ;;  %v2364_v25 = vsel %vm896_vm3, %v2113_v60, 0  ;;  %v2027_v15 = vadd.f32 %v3643_v14, %v4759_v29  ;;  %v2018_v16 = vpop.f32.mrb[65].mxu1  ;;  %v2129_v52 = vld [vmem:[#allocation4 + $0x58] sm:$0xff] }
 0x18e   : > { %1939 = vst.msk [vmem:[#allocation3 + $0xe0] sm:$0xff] %vm896_vm3, %v1930_v33  ;;  %v3631_v37 = vpop.f32.mrb[64].mxu0  ;;  %3703 = vmatprep.subr.bf16.mxu0 %v4056_v1  ;;  %v2361_v58 = vsel %vm896_vm3, %v2112_v55, 0  ;;  %v2019_v18 = vadd.f32 %v4759_v29, %v2018_v16  ;;  %v3644_v19 = vpop.f32.mrb[66].mxu1  ;;  %v2131_v55 = vld [vmem:[#allocation4 + $0x68] sm:$0xff] }
 0x18f   : > { %3716 = vmatpush3.bf16.xpose.msra.mxu1 %v2358_v36  ;;  %v1920_v40 = vadd.f32 %v3631_v37, %v4716_v2  ;;  %v1911_v41 = vpop.f32.mrb[65].mxu0  ;;  %v2030_v21 = vadd.f32 %v3644_v19, %v4759_v29  ;;  %v2021_v22 = vpop.f32.mrb[67].mxu1 }
 0x190   : > { %3717 = vmatprep.subr.bf16.mxu1 %v4056_v1  ;;  %v1912_v44 = vadd.f32 %v4716_v2, %v1911_v41  ;;  %v3632_v45 = vpop.f32.mrb[66].mxu0  ;;  %v2022_v23 = vadd.f32 %v4759_v29, %v2021_v22 }
 0x191   : > { %v1923_v47 = vadd.f32 %v3632_v45, %v4716_v2  ;;  %v1914_v48 = vpop.f32.mrb[67].mxu0  ;;  %v2068_v51 = vpack.c.bf16 %v2030_v21, %v2027_v15 }
 0x192   : > { %v1915_v50 = vadd.f32 %v4716_v2, %v1914_v48  ;;  %v2108_v2 = vld [vmem:[#allocation3 + $0xb0] sm:$0xff]  ;;  %v2067_v30 = vpack.c.bf16 %v2022_v23, %v2019_v18  ;;  %v2125_v48 = vld [vmem:[#allocation4 + $0x38] sm:$0xff] }
 0x193   : > { %v1933_v56 = vpack.c.bf16 %v1923_v47, %v1920_v40  ;;  %v2306_v59 = vsel %vm896_vm3, %v2108_v2, 0  ;;  %2077 = vst.msk [vmem:[#allocation4 + $0xd8] sm:$0xff] %vm896_vm3, %v2068_v51  ;;  %v2124_v40 = vld [vmem:[#allocation4 + $0x30] sm:$0xff] }
 0x194   : > { %v1932_v57 = vpack.c.bf16 %v1915_v50, %v1912_v44  ;;  %v2115_v3 = vld [vmem:[#allocation3 + $0xe8] sm:$0xff]  ;;  %v3647_v24 = vpop.f32.mrb[68].mxu1  ;;  %2076 = vst.msk [vmem:[#allocation4 + $0xd0] sm:$0xff] %vm896_vm3, %v2067_v30 }
 0x195   : > { %1942 = vst.msk [vmem:[#allocation3 + $0xf8] sm:$0xff] %vm896_vm3, %v1933_v56  ;;  %3704 = vmatpush3.bf16.xpose.msra.mxu0 %v2303_v53  ;;  %v2114_v63 = vld [vmem:[#allocation3 + $0xe0] sm:$0xff]  ;;  %v2370_v6 = vsel %vm896_vm3, %v2115_v3, 0  ;;  %v2043_v26 = vadd.f32 %v3647_v24, %v4759_v29  ;;  %v2034_v27 = vpop.f32.mrb[69].mxu1  ;;  %v2127_v50 = vld [vmem:[#allocation4 + $0x48] sm:$0xff]  ;;  %v2132_v56 = vld [vmem:[#allocation4 + $0x70] sm:$0xff] }
 0x196   : > { %1941 = vst.msk [vmem:[#allocation3 + $0xf0] sm:$0xff] %vm896_vm3, %v1932_v57  ;;  %3705 = vmatprep.subr.bf16.mxu0 %v4056_v1  ;;  %v2367_v0 = vsel %vm896_vm3, %v2114_v63, 0  ;;  %v2035_v31 = vadd.f32 %v4759_v29, %v2034_v27  ;;  %v3648_v32 = vpop.f32.mrb[70].mxu1  ;;  %v2130_v53 = vld [vmem:[#allocation4 + $0x60] sm:$0xff]  ;;  %v2133_v57 = vld [vmem:[#allocation4 + $0x78] sm:$0xff] }
 0x197   : > { %3718 = vmatpush3.bf16.xpose.msra.mxu1 %v2361_v58  ;;  %v2046_v33 = vadd.f32 %v3648_v32, %v4759_v29  ;;  %v2037_v7 = vpop.f32.mrb[71].mxu1  ;;  %v637_v58 = vlaneseq }
 0x198   : > { %3719 = vmatprep.subr.bf16.mxu1 %v4056_v1  ;;  %v2038_v35 = vadd.f32 %v4759_v29, %v2037_v7 }
 0x199   : > { %v2070_v37 = vpack.c.bf16 %v2046_v33, %v2043_v26  ;;  %v2419_v2 = vand.u32 127, %v637_v58 }
 0x19a   : > { %v2069_v41 = vpack.c.bf16 %v2038_v35, %v2035_v31  ;;  %v641_v35 = vstv %s639_s4  ;;  %s3285_s4 = sshll.u32 %s4193_s14, 9 }
 0x19b   : > { %2079 = vst.msk [vmem:[#allocation4 + $0xe8] sm:$0xff] %vm896_vm3, %v2070_v37  ;;  %vm2420_vm4 = vcmp.lt.s32.totalorder %v2419_v2, 8  ;;  %s4955_s23 = scalar_lea.hbm %s5058_s20, %s3285_s4 }
 0x19c   : > { %v2117_v13 = vld [vmem:[#allocation3 + $0xf8] sm:$0xff]  ;;  %v3651_v36 = vpop.f32.mrb[72].mxu1  ;;  %2078 = vst.msk [vmem:[#allocation4 + $0xe0] sm:$0xff] %vm896_vm3, %v2069_v41  ;;  %v2134_v41 = vld [vmem:[#allocation4 + $0x80] sm:$0xff] }
 0x19d   : > { %3706 = vmatpush3.bf16.xpose.msra.mxu0 %v2306_v59  ;;  %v2116_v9 = vld [vmem:[#allocation3 + $0xf0] sm:$0xff]  ;;  %v2376_v20 = vsel %vm896_vm3, %v2117_v13, 0  ;;  %v2059_v38 = vadd.f32 %v3651_v36, %v4759_v29  ;;  %v2050_v39 = vpop.f32.mrb[73].mxu1 }
 0x19e   : > { %3707 = vmatprep.subr.bf16.mxu0 %v4056_v1  ;;  %v2373_v11 = vsel %vm896_vm3, %v2116_v9, 0  ;;  %v2051_v54 = vadd.f32 %v4759_v29, %v2050_v39  ;;  %v3652_v42 = vpop.f32.mrb[74].mxu1 }
 0x19f   : > { %3720 = vmatpush3.bf16.xpose.msra.mxu1 %v2364_v25  ;;  %v2062_v44 = vadd.f32 %v3652_v42, %v4759_v29  ;;  %v2053_v45 = vpop.f32.mrb[75].mxu1  ;;  %v2136_v42 = vld [vmem:[#allocation4 + $0x90] sm:$0xff] }
 0x1a0   : > { %3721 = vmatprep.subr.bf16.mxu1 %v4056_v1  ;;  %v2054_v46 = vadd.f32 %v4759_v29, %v2053_v45  ;;  %v2128_v29 = vld [vmem:[#allocation4 + $0x50] sm:$0xff]  ;;  %v2138_v45 = vld [vmem:[#allocation4 + $0xa0] sm:$0xff] }
 0x1a1   : > { %v2072_v47 = vpack.c.bf16 %v2062_v44, %v2059_v38  ;;  %v2137_v44 = vld [vmem:[#allocation4 + $0x98] sm:$0xff] }
 0x1a2   : > { %v2071_v49 = vpack.c.bf16 %v2054_v46, %v2051_v54  ;;  %v2135_v54 = vld [vmem:[#allocation4 + $0x88] sm:$0xff] }
 0x1a3   : > { %2081 = vst.msk [vmem:[#allocation4 + $0xf8] sm:$0xff] %vm896_vm3, %v2072_v47  ;;  %v2139_v47 = vld [vmem:[#allocation4 + $0xa8] sm:$0xff] }
 0x1a4   : > { %2080 = vst.msk [vmem:[#allocation4 + $0xf0] sm:$0xff] %vm896_vm3, %v2071_v49  ;;  %v2147_v2 = vld [vmem:[#allocation4 + $0xe8] sm:$0xff] }
 0x1a5   : > { %3708 = vmatpush3.bf16.xpose.msra.mxu0 %v2309_v62 }
 0x1a6   : > { %3733 = vmatprep.subr.bf16.mxu0 %v4056_v1 }
 0x1a7   : > { %3722 = vmatpush3.bf16.xpose.msra.mxu1 %v2367_v0 }
 0x1a8   : > { %3723 = vmatprep.subr.bf16.mxu1 %v4056_v1 }
 0x1ac   : > { %3710 = vmatmul.mubr.msk.bf16.vlgmr.msra.gmra.mrb[72].mxu0 %vm896_vm3, %v2084_v4 }
 0x1ad   : > { %3734 = vmatpush3.bf16.msra.mxu0 %v2118_v5  ;;  %3749 = vmatprep.mubr.msk.bf16.mxu0 %vm4057_vm0, %v4056_v1 }
 0x1ae   : > { %3735 = vmatprep.subr.bf16.mxu0 %v4056_v1 }
 0x1af   : > { %3724 = vmatpush3.bf16.xpose.msra.mxu1 %v2370_v6 }
 0x1b0   : > { %3725 = vmatprep.subr.bf16.mxu1 %v4056_v1 }
 0x1b1   : > { %3736 = vmatpush3.bf16.msra.mxu0 %v2119_v8 }
 0x1b2   : > { %3737 = vmatprep.subr.bf16.mxu0 %v4056_v1 }
 0x1b5   : > { %3738 = vmatpush3.bf16.msra.mxu0 %v2120_v10 }
 0x1b6   : > { %3739 = vmatprep.subr.bf16.mxu0 %v4056_v1 }
 0x1b7   : > { %3726 = vmatpush3.bf16.xpose.msra.mxu1 %v2373_v11 }
 0x1b8   : > { %3727 = vmatprep.subr.bf16.mxu1 %v4056_v1 }
 0x1b9   : > { %3740 = vmatpush3.bf16.msra.mxu0 %v2121_v12 }
 0x1ba   : > { %3741 = vmatprep.subr.bf16.mxu0 %v4056_v1 }
 0x1bd   : > { %3742 = vmatpush3.bf16.msra.mxu0 %v2122_v17 }
 0x1be   : > { %3743 = vmatprep.subr.bf16.mxu0 %v4056_v1 }
 0x1bf   : > { %3728 = vmatpush3.bf16.xpose.msra.mxu1 %v2376_v20 }
 0x1c0   : > { %3753 = vmatprep.subr.bf16.mxu1 %v4056_v1 }
 0x1c1   : > { %3744 = vmatpush3.bf16.msra.mxu0 %v2123_v28 }
 0x1c2   : > { %3745 = vmatprep.subr.bf16.mxu0 %v4056_v1 }
 0x1c5   : > { %3746 = vmatpush3.bf16.msra.mxu0 %v2124_v40 }
 0x1c6   : > { %3730 = vmatmul.mubr.msk.bf16.vlgmr.msra.gmra.mrb[80].mxu1 %vm896_vm3, %v2085_v34  ;;  %3747 = vmatprep.subr.bf16.mxu0 %v4056_v1  ;;  %v638_v34 = vshrl.u32 %v637_v58, 7  ;;  %v2146_v58 = vld [vmem:[#allocation4 + $0xe0] sm:$0xff] }
 0x1c7   : > { %3754 = vmatpush3.bf16.msra.mxu1 %v2126_v43  ;;  %3769 = vmatprep.mubr.msk.bf16.mxu1 %vm4057_vm0, %v4056_v1 }
 0x1c8   : > { %3755 = vmatprep.subr.bf16.mxu1 %v4056_v1  ;;  %vm642_vm5 = vcmp.lt.s32.totalorder %v638_v34, %v641_v35  ;;  %v3256_v35 = vld [vmem:[%s5048_s10] ss:$0 sm:$0xff] }
 0x1c9   : > { %3748 = vmatpush3.bf16.msra.mxu0 %v2125_v48  ;;  %v4853_v37 = vsel %vm642_vm5, 1.0, %v4056_v1 }
 0x1ca   : > { %3773 = vmatprep.subr.bf16.mxu0 %v4056_v1 }
 0x1cb   : > { %3756 = vmatpush3.bf16.msra.mxu1 %v2127_v50 }
 0x1cc   : > { %3757 = vmatprep.subr.bf16.mxu1 %v4056_v1 }
 0x1cf   : > { %3758 = vmatpush3.bf16.msra.mxu1 %v2128_v29  ;;  %v2140_v29 = vld [vmem:[#allocation4 + $0xb0] sm:$0xff] }
 0x1d0   : > { %3759 = vmatprep.subr.bf16.mxu1 %v4056_v1 }
 0x1d3   : > { %3760 = vmatpush3.bf16.msra.mxu1 %v2129_v52  ;;  %v2142_v52 = vld [vmem:[#allocation4 + $0xc0] sm:$0xff] }
 0x1d4   : > { %3761 = vmatprep.subr.bf16.mxu1 %v4056_v1 }
 0x1d7   : > { %3762 = vmatpush3.bf16.msra.mxu1 %v2130_v53  ;;  %v2141_v53 = vld [vmem:[#allocation4 + $0xb8] sm:$0xff] }
 0x1d8   : > { %3763 = vmatprep.subr.bf16.mxu1 %v4056_v1 }
 0x1db   : > { %3764 = vmatpush3.bf16.msra.mxu1 %v2131_v55  ;;  %v2143_v55 = vld [vmem:[#allocation4 + $0xc8] sm:$0xff] }
 0x1dc   : > { %3765 = vmatprep.subr.bf16.mxu1 %v4056_v1 }
 0x1df   : > { %3766 = vmatpush3.bf16.msra.mxu1 %v2132_v56  ;;  %v2144_v56 = vld [vmem:[#allocation4 + $0xd0] sm:$0xff] }
 0x1e0   : > { %3767 = vmatprep.subr.bf16.mxu1 %v4056_v1 }
 0x1e3   : > { %3768 = vmatpush3.bf16.msra.mxu1 %v2133_v57  ;;  %v2145_v57 = vld [vmem:[#allocation4 + $0xd8] sm:$0xff] }
 0x1e4   : > { %3793 = vmatprep.subr.bf16.mxu1 %v4056_v1 }
 0x237   : > { %v2211_v59 = vpop.f32.mrb[68].mxu0 }
 0x238   : > { %v3671_v60 = vpop.f32.mrb[69].mxu0  ;;  %v2423_v25 = vsel %vm2420_vm4, %v2211_v59, -1e+30  ;;  %v2148_v59 = vld [vmem:[#allocation4 + $0xf0] sm:$0xff] }
 0x239   : > { %2427 = vmax.xlane.f32.xlu0 %v2423_v25  ;;  %v2214_v61 = vpop.f32.mrb[70].mxu0  ;;  %v2149_v60 = vld [vmem:[#allocation4 + $0xf8] sm:$0xff] }
 0x23a   : > { %v3672_v62 = vpop.f32.mrb[71].mxu0 }
 0x251   : > { %v2278_v63 = vpop.f32.mrb[76].mxu1 }
 0x252   : > { %v3691_v0 = vpop.f32.mrb[77].mxu1  ;;  %v2424_v3 = vsel %vm2420_vm4, %v2278_v63, -1e+30 }
 0x253   : > { %v2281_v4 = vpop.f32.mrb[78].mxu1  ;;  %2429 = vmax.xlane.f32.xlu0 %v2424_v3 }
 0x254   : > { %v3692_v5 = vpop.f32.mrb[79].mxu1 }
 0x27f   : > { %v2345_v6 = vpop.f32.mrb[72].mxu0 }
 0x280   : > { %v3711_v8 = vpop.f32.mrb[73].mxu0  ;;  %v2425_v9 = vsel %vm2420_vm4, %v2345_v6, -1e+30 }
 0x281   : > { %2431 = vmax.xlane.f32.xlu1 %v2425_v9  ;;  %v2348_v10 = vpop.f32.mrb[74].mxu0 }
 0x282   : > { %v3712_v11 = vpop.f32.mrb[75].mxu0 }
 0x299   : > { %v2412_v12 = vpop.f32.mrb[80].mxu1 }
 0x29a   : > { %v3731_v13 = vpop.f32.mrb[81].mxu1  ;;  %v2426_v14 = vsel %vm2420_vm4, %v2412_v12, -1e+30 }
 0x29b   : > { %v2415_v15 = vpop.f32.mrb[82].mxu1  ;;  %2433 = vmax.xlane.f32.xlu1 %v2426_v14 }
 0x29c   : > { %v3732_v16 = vpop.f32.mrb[83].mxu1 }
 0x2c6   : > { %v2428_v17 = vpop.xlane.xlu0 %2427 }
 0x2c7   : > { %v2435_v18 = vsub.f32 %v2423_v25, %v2428_v17 }
 0x2c9   : > { %v2439_v19 = vmul.f32 1.442695, %v2435_v18 }
 0x2cb   : > { %3924 = vpow2.f32 %v2439_v19 }
 0x2d5   : > { %v3925_v20 = vpop.eup %3924 }
 0x2d6   : > { %2447 = vadd.xlane.f32.xlu0 %v3925_v20 }
 0x2e0   : > { %v2430_v21 = vpop.xlane.xlu0 %2429 }
 0x2e1   : > { %v2436_v22 = vsub.f32 %v2424_v3, %v2430_v21 }
 0x2e3   : > { %v2441_v23 = vmul.f32 1.442695, %v2436_v22 }
 0x2e5   : > { %3926 = vpow2.f32 %v2441_v23 }
 0x2ef   : > { %v3927_v24 = vpop.eup %3926 }
 0x2f0   : > { %2449 = vadd.xlane.f32.xlu1 %v3927_v24 }
 0x30e   : > { %v2432_v51 = vpop.xlane.xlu1 %2431 }
 0x30f   : > { %v2437_v26 = vsub.f32 %v2425_v9, %v2432_v51  ;;  %v3917_v51 = vld [vmem:[%s5047_s9 + $0x8] sm:$0xff]  }
 0x311   : > { %v2443_v27 = vmul.f32 1.442695, %v2437_v26 }
 0x313   : > { %3928 = vpow2.f32 %v2443_v27 }
 0x31d   : > { %v4841_v28 = vpop.eup %3928 }
 0x31e   : > { %2451 = vadd.xlane.f32.xlu0 %v4841_v28 }
 0x328   : > { %v2434_v30 = vpop.xlane.xlu1 %2433 }
 0x329   : > { %v2438_v31 = vsub.f32 %v2426_v14, %v2434_v30 }
 0x32b   : > { %v2445_v32 = vmul.f32 1.442695, %v2438_v31 }
 0x32d   : > { %3930 = vpow2.f32 %v2445_v32 }
 0x337   : > { %v4844_v33 = vpop.eup %3930 }
 0x338   : > { %2453 = vadd.xlane.f32.xlu1 %v4844_v33 }
 0x363   : > { %v2448_v7 = vpop.xlane.xlu0 %2447 }
 0x364   : > { %3932 = vrcp.f32 %v2448_v7 }
 0x36e   : > { %v3933_v36 = vpop.eup %3932 }
 0x36f   : > { %v2456_v38 = vmul.f32 %v3933_v36, %v3925_v20 }
 0x371   : > { %v2463_v39 = vpack.c.bf16 %v2456_v38, %v2456_v38  ;;  %v2627_v40 = vmul.f32 %v2456_v38, %v4853_v37 }
 0x373   : > { %3750 = vmatmul.mubr.bf16.vlgmr.msra.gmra.mrb[76].mxu0 %v2463_v39  ;;  %2628 = vst [vmem:[%s4856_s29] sm:$0xff] %v2627_v40 }
 0x374   : > { %3774 = vmatpush3.bf16.msra.mxu0 %v2134_v41  ;;  %3789 = vmatprep.mubr.msk.bf16.mxu0 %vm4057_vm0, %v4056_v1 }
 0x375   : > { %3775 = vmatprep.subr.bf16.mxu0 %v4056_v1 }
 0x378   : > { %3776 = vmatpush3.bf16.msra.mxu0 %v2135_v54  ;;  %v3944_v54 = vld [vmem:[%s4247_s19] sm:$0xff]  ;;  %s2956_s19 = scalar_lea.sflag [#allocation11], %s4849_s1 }
 0x379   : > { %3777 = vmatprep.subr.bf16.mxu0 %v4056_v1 }
 0x37c   : > { %3778 = vmatpush3.bf16.msra.mxu0 %v2136_v42 }
 0x37d   : > { %v2450_v43 = vpop.xlane.xlu1 %2449  ;;  %3779 = vmatprep.subr.bf16.mxu0 %v4056_v1 }
 0x37e   : > { %3934 = vrcp.f32 %v2450_v43 }
 0x380   : > { %3780 = vmatpush3.bf16.msra.mxu0 %v2137_v44 }
 0x381   : > { %3781 = vmatprep.subr.bf16.mxu0 %v4056_v1 }
 0x384   : > { %3782 = vmatpush3.bf16.msra.mxu0 %v2138_v45 }
 0x385   : > { %3783 = vmatprep.subr.bf16.mxu0 %v4056_v1 }
 0x388   : > { %v3935_v46 = vpop.eup %3934  ;;  %3784 = vmatpush3.bf16.msra.mxu0 %v2139_v47 }
 0x389   : > { %v2458_v48 = vmul.f32 %v3935_v46, %v3927_v24  ;;  %3785 = vmatprep.subr.bf16.mxu0 %v4056_v1  ;;  %v3916_v24 = vld [vmem:[%s5047_s9] sm:$0xff]  }
 0x38b   : > { %v2464_v49 = vpack.c.bf16 %v2458_v48, %v2458_v48  ;;  %v2631_v50 = vmul.f32 %v2458_v48, %v4853_v37 }
 0x38c   : > { %3786 = vmatpush3.bf16.msra.mxu0 %v2140_v29  ;;  %v3920_v29 = vld [vmem:[%s5053_s15] sm:$0xff]  }
 0x38d   : > { %3770 = vmatmul.mubr.bf16.vlgmr.msra.gmra.mrb[84].mxu1 %v2464_v49  ;;  %3250 = vst [vmem:[%s4856_s29 + $0x8] sm:$0xff] %v2631_v50  ;;  %3787 = vmatprep.subr.bf16.mxu0 %v4056_v1  ;;  %v3918_v49 = vld [vmem:[%s5051_s13] sm:$0xff]   ;;  %v3919_v50 = vld [vmem:[%s5051_s13 + $0x8] sm:$0xff]  }
 0x38e   : > { %3794 = vmatpush3.bf16.msra.mxu1 %v2142_v52  ;;  %3809 = vmatprep.mubr.msk.bf16.mxu1 %vm4057_vm0, %v4056_v1  ;;  %v3921_v52 = vld [vmem:[%s5053_s15 + $0x8] sm:$0xff]  }
 0x38f   : > { %3795 = vmatprep.subr.bf16.mxu1 %v4056_v1 }
 0x390   : > { %3788 = vmatpush3.bf16.msra.mxu0 %v2141_v53 }
 0x391   : > { %3813 = vmatprep.subr.bf16.mxu0 %v4056_v1 }
 0x392   : > { %3796 = vmatpush3.bf16.msra.mxu1 %v2143_v55 }
 0x393   : > { %3797 = vmatprep.subr.bf16.mxu1 %v4056_v1 }
 0x396   : > { %3798 = vmatpush3.bf16.msra.mxu1 %v2144_v56 }
 0x397   : > { %3799 = vmatprep.subr.bf16.mxu1 %v4056_v1 }
 0x39a   : > { %3800 = vmatpush3.bf16.msra.mxu1 %v2145_v57 }
 0x39b   : > { %3801 = vmatprep.subr.bf16.mxu1 %v4056_v1 }
 0x39e   : > { %3802 = vmatpush3.bf16.msra.mxu1 %v2146_v58  ;;  %v3260_v58 = vld [vmem:[%s5049_s11] ss:$0 sm:$0xff] }
 0x39f   : > { %3803 = vmatprep.subr.bf16.mxu1 %v4056_v1 }
 0x3a2   : > { %3804 = vmatpush3.bf16.msra.mxu1 %v2147_v2 }
 0x3a3   : > { %3805 = vmatprep.subr.bf16.mxu1 %v4056_v1 }
 0x3a6   : > { %3806 = vmatpush3.bf16.msra.mxu1 %v2148_v59  ;;  %v3261_v59 = vld [vmem:[%s5050_s12] ss:$0 sm:$0xff] }
 0x3a7   : > { %3807 = vmatprep.subr.bf16.mxu1 %v4056_v1 }
 0x3aa   : > { %3808 = vmatpush3.bf16.msra.mxu1 %v2149_v60 }
 0x3ab   : > { %3821 = vmatprep.subr.bf16.mxu1 %v4056_v1  ;;  %v2452_v25 = vpop.xlane.xlu0 %2451 }
 0x3ac   : > { %3936 = vrcp.f32 %v2452_v25 }
 0x3b6   : > { %v3937_v61 = vpop.eup %3936 }
 0x3b7   : > { %v2460_v62 = vmul.f32 %v3937_v61, %v4841_v28 }
 0x3b9   : > { %v2465_v63 = vpack.c.bf16 %v2460_v62, %v2460_v62  ;;  %v2643_v0 = vmul.f32 %v2460_v62, %v4853_v37 }
 0x3bb   : > { %3790 = vmatmul.mubr.bf16.vlgmr.msra.gmra.mrb[80].mxu0 %v2465_v63  ;;  %3252 = vst [vmem:[%s4856_s29 + $0x10] sm:$0xff] %v2643_v0  ;;  %v3922_v63 = vld [vmem:[%s5053_s15 + $0x10] sm:$0xff]   ;;  %v3923_v0 = vld [vmem:[%s5053_s15 + $0x18] sm:$0xff]  }
 0x3bc   : > { %3817 = vmatprep.mubr.msk.bf16.mxu0 %vm4057_vm0, %v4056_v1  ;;  %3814 = vmatpush3.bf16.msra.mxu0 %v3916_v24 }
 0x3bd   : > { %3815 = vmatprep.subr.bf16.mxu0 %v4056_v1 }
 0x3c0   : > { %3816 = vmatpush3.bf16.msra.mxu0 %v3917_v51 }
 0x3c1   : > { %3829 = vmatprep.subr.bf16.mxu0 %v4056_v1 }
 0x3c5   : > { %v2454_v3 = vpop.xlane.xlu1 %2453 }
 0x3c6   : > { %3938 = vrcp.f32 %v2454_v3  ;;  %v3262_v3 = vld [vmem:[%s5092_s18] ss:$0 sm:$0xff]  ;;  %s3961_s18 = sshll.u32 %s4061_s2, 4  ;;  %s3962_s18 = int_to_ptr.vmem [resolvable:$false] %s3961_s18 }
 0x3c7   : > { %p3964_p5 = scmp.lt.s32.totalorder %s4950_s27, %s3962_s18 }
 0x3d0   : > { %v3939_v4 = vpop.eup %3938 }
 0x3d1   : > { %v2462_v5 = vmul.f32 %v3939_v4, %v4844_v33 }
 0x3d3   : > { %v2466_v6 = vpack.c.bf16 %v2462_v5, %v2462_v5  ;;  %v2655_v8 = vmul.f32 %v2462_v5, %v4853_v37 }
 0x3d5   : > { %3810 = vmatmul.mubr.bf16.vlgmr.msra.gmra.mrb[88].mxu1 %v2466_v6  ;;  %3254 = vst [vmem:[%s4856_s29 + $0x18] sm:$0xff] %v2655_v8  ;;  %s3963_s29 = scalar_lea.vmem %s3962_s18, 1024 }
 0x3d6   : > { %3825 = vmatprep.mubr.msk.bf16.mxu1 %vm4057_vm0, %v4056_v1  ;;  %3822 = vmatpush3.bf16.msra.mxu1 %v3918_v49  ;;  %p3965_p6 = scmp.lt.s32.totalorder %s3963_s29, %s3957_s0 }
 0x3d7   : > { %3823 = vmatprep.subr.bf16.mxu1 %v4056_v1 }
 0x3d8   : > { %p3966_p7 = por %p3965_p6, %p3964_p5 }
 0x3da   : > { %3824 = vmatpush3.bf16.msra.mxu1 %v3919_v50  ;;  %p3967_p8 = pnand %p3966_p7, %p3960_p4 }
 0x446   : > { %v2501_v9 = vpop.f32.mrb[76].mxu0 }
 0x447   : > { %v2629_v10 = vpack.c.bf16 %v2501_v9, %v2501_v9  ;;  %v3751_v11 = vpop.f32.mrb[77].mxu0 }
 0x448   : > { %v2504_v12 = vpop.f32.mrb[78].mxu0 }
 0x449   : > { %2630 = vst.msk [vmem:[#allocation5] sm:$0xf] %vm742_vm2, %v2629_v10  ;;  %v3752_v13 = vpop.f32.mrb[79].mxu0 }
 0x460   : > { %v2541_v14 = vpop.f32.mrb[84].mxu1 }
 0x461   : > { %v3282_v15 = vpack.c.bf16 %v2541_v14, %v2541_v14  ;;  %v3771_v16 = vpop.f32.mrb[85].mxu1 }
 0x462   : > { %v2544_v17 = vpop.f32.mrb[86].mxu1 }
 0x463   : > { %2638 = vrot.lane.b32.xlu0 %v3282_v15, %s4058_s30  ;;  %v3772_v18 = vpop.f32.mrb[87].mxu1 }
 0x48e   : > { %v2581_v19 = vpop.f32.mrb[80].mxu0 }
 0x48f   : > { %v3283_v20 = vpack.c.bf16 %v2581_v19, %v2581_v19  ;;  %v3791_v21 = vpop.f32.mrb[81].mxu0 }
 0x490   : > { %v2584_v22 = vpop.f32.mrb[82].mxu0 }
 0x491   : > { %2650 = vrot.lane.b32.xlu1 %v3283_v20, %s4059_s22  ;;  %v3792_v23 = vpop.f32.mrb[83].mxu0 }
 0x4a8   : > { %v2621_v26 = vpop.f32.mrb[88].mxu1 }
 0x4a9   : > { %v3284_v27 = vpack.c.bf16 %v2621_v26, %v2621_v26  ;;  %v3811_v28 = vpop.f32.mrb[89].mxu1 }
 0x4aa   : > { %v2624_v30 = vpop.f32.mrb[90].mxu1 }
 0x4ab   : > { %v3812_v31 = vpop.f32.mrb[91].mxu1  ;;  %2662 = vrot.lane.b32.xlu1 %v3284_v27, %s4060_s25 }
 0x4d5   : > { %v2639_v32 = vpop.permute.xlu0 %2638 }
 0x4d6   : > { %2642 = vst.msk [vmem:[#allocation5] sm:$0xf] %vm2641_vm6, %v2639_v32 }
 0x503   : > { %v2651_v33 = vpop.permute.xlu1 %2650 }
 0x504   : > { %2654 = vst.msk [vmem:[#allocation5] sm:$0xf] %vm2653_vm7, %v2651_v33 }
 0x51d   : > { %v2663_v7 = vpop.permute.xlu1 %2662 }
 0x51e   : > { %2666 = vst.msk [vmem:[#allocation5] sm:$0xf] %vm2665_vm8, %v2663_v7 }
 0x525   : > { %v2667_v34 = vld [vmem:[#allocation5] sm:$0xf] }
 0x526   : > { %3818 = vmatmul.mubr.msk.bf16.vlgmr.msra.gmra.mrb[84].mxu0 %vm696_vm1, %v2667_v34 }
 0x527   : > { %3837 = vmatprep.mubr.msk.bf16.mxu0 %vm4057_vm0, %v4056_v1  ;;  %3830 = vmatpush3.bf16.msra.mxu0 %v3920_v29 }
 0x528   : > { %3831 = vmatprep.subr.bf16.mxu0 %v4056_v1 }
 0x52b   : > { %3832 = vmatpush3.bf16.msra.mxu0 %v3921_v52 }
 0x52c   : > { %3833 = vmatprep.subr.bf16.mxu0 %v4056_v1 }
 0x52f   : > { %3834 = vmatpush3.bf16.msra.mxu0 %v3922_v63 }
 0x530   : > { %3835 = vmatprep.subr.bf16.mxu0 %v4056_v1  ;;  %v3266_v1 = vld [vmem:[%s5054_s16] ss:$0 sm:$0xff] }
 0x533   : > { %3836 = vmatpush3.bf16.msra.mxu0 %v3923_v0 }
 0x5f9   : > { %v2728_v36 = vpop.f32.mrb[84].mxu0 }
 0x5fa   : > { %v2729_v38 = vadd.f32 %v3256_v35, %v2728_v36  ;;  %v3819_v39 = vpop.f32.mrb[85].mxu0 }
 0x5fb   : > { %v2731_v40 = vpop.f32.mrb[86].mxu0 }
 0x5fc   : > { %v3820_v41 = vpop.f32.mrb[87].mxu0  ;;  %v2734_v42 = vadd.f32 %v3944_v54, %v2729_v38 }
 0x5fe   : > { %v2737_v43 = vsel %vm696_vm1, %v2734_v42, 0.0 }
 0x5ff   : > { %2738 = vadd.xlane.f32.xlu1 %v2737_v43 }
 0x68c   : > { %v2739_v44 = vpop.xlane.xlu1 %2738 }
 0x68d   : > { %v2741_v45 = vmul.f32 0.03125, %v2739_v44 }
 0x68f   : > { %v2742_v46 = vsub.f32 %v2734_v42, %v2741_v45 }
 0x691   : > { %v2743_v47 = vmul.f32 %v2742_v46, %v2742_v46 }
 0x693   : > { %v2744_v48 = vsel %vm696_vm1, %v2743_v47, 0.0 }
 0x694   : > { %2745 = vadd.xlane.f32.xlu0 %v2744_v48 }
 0x721   : > { %v2746_v53 = vpop.xlane.xlu0 %2745 }
 0x722   : > { %v2747_v55 = vmul.f32 0.03125, %v2746_v53 }
 0x724   : > { %v2748_v56 = vadd.f32 1e-05, %v2747_v55 }
 0x726   : > { %3940 = vrsqrt.f32 %v2748_v56 }
 0x730   : > { %v3941_v57 = vpop.eup %3940 }
 0x731   : > { %v2750_v2 = vmul.f32 %v3941_v57, %v2742_v46 }
 0x733   : > { %v2757_v60 = vmul.f32 %v3260_v58, %v2750_v2 }
 0x735   : > { %v2764_v25 = vadd.f32 %v3261_v59, %v2757_v60 }
 0x737   : > { %v2765_v61 = vmul.f32 %v2764_v25, %v4853_v37 }
 0x739   : > { %v2766_v62 = vpack.c.bf16 %v2765_v61, %v2765_v61 }
 0x73b   : > { %3826 = vmatmul.mubr.msk.bf16.vlgmr.msra.gmra.mrb[92].mxu1 %vm696_vm1, %v2766_v62 }
 0x80e   : > { %v2827_v4 = vpop.f32.mrb[92].mxu1 }
 0x80f   : > { %v2828_v5 = vadd.f32 %v3262_v3, %v2827_v4  ;;  %v3827_v6 = vpop.f32.mrb[93].mxu1 }
 0x810   : > { %v2830_v8 = vpop.f32.mrb[94].mxu1 }
 0x811   : > { %v2833_v9 = vmax.f32 %v2828_v5, 0.0  ;;  %v3828_v10 = vpop.f32.mrb[95].mxu1 }
 0x813   : > { %v2834_v11 = vpack.c.bf16 %v2833_v9, %v2833_v9 }
 0x815   : > { %3838 = vmatmul.mubr.msk.bf16.vlgmr.msra.gmra.mrb[88].mxu0 %vm2874_vm9, %v2834_v11 }
 0x8e8   : > { %v2912_v12 = vpop.f32.mrb[88].mxu0 }
 0x8e9   : > { %v2913_v13 = vadd.f32 %v3266_v1, %v2912_v12  ;;  %v3839_v14 = vpop.f32.mrb[89].mxu0 }
 0x8ea   : > { %v2915_v15 = vpop.f32.mrb[90].mxu0 }
 0x8eb   : > { %v3840_v16 = vpop.f32.mrb[91].mxu0  ;;  %v2918_v17 = vadd.f32 %v2913_v13, %v2765_v61 }
 0x8ed   : > { %v2921_v18 = vsel %vm696_vm1, %v2918_v17, 0.0 }
 0x8ee   : > { %2922 = vadd.xlane.f32.xlu0 %v2921_v18 }
 0x97b   : > { %v2923_v19 = vpop.xlane.xlu0 %2922 }
 0x97c   : > { %v2924_v20 = vmul.f32 0.03125, %v2923_v19 }
 0x97e   : > { %v2925_v21 = vsub.f32 %v2918_v17, %v2924_v20 }
 0x980   : > { %v2926_v22 = vmul.f32 %v2925_v21, %v2925_v21 }
 0x982   : > { %v2927_v23 = vsel %vm696_vm1, %v2926_v22, 0.0 }
 0x983   : > { %2928 = vadd.xlane.f32.xlu0 %v2927_v23 }
 0x984   : > { %3970 = shalt.err (!%p3967_p8)
}
 0x985   : > { %s3971_s25 = scalar_lea.hbm %s4955_s23, 512  ;;  %s3975_s28 = scalar_lea.hbm %s5058_s20, 1024 }
 0x986   : > { %p3972_p9 = scmp.ne.s32.totalorder %s4955_s23, %s3971_s25  ;;  %p3976_p0 = scmp.lt.u32.totalorder %s4955_s23, %s5058_s20 }
 0x987   : > { %p3977_p1 = scmp.lt.u32.totalorder %s3975_s28, %s3971_s25  ;;  %p3979_p3 = scmp.lt.u32.totalorder %s3971_s25, %s4955_s23 }
 0x988   : > { %p3973_p12 = pnand %p3972_p9, %p4210_p10 }
 0x989   : > { %p3978_p2 = por %p3977_p1, %p3976_p0 }
 0x98a   : > { %p3974_p13 = pneg %p3973_p12 }
 0x98b   : > { %p3980_p4 = por %p3979_p3, %p3978_p2 }
 0x98d   : > { %p3981_p5 = pnand %p3980_p4, %p3974_p13 }
 0x98f   : > { %3984 = shalt.err (!%p3981_p5)
}
 0x990   : > { %s4062_s0 = smov 128   ;;  %s3092_s18 = sshll.u32 %s4849_s1, 3 }
 0x991   : > { %3842 = dma.vmem_to_hbm [thread:$0]  (%p4210_p10), %s4950_s27, 512, %s4955_s23, %s2956_s19, %s4062_s0, %s4062_s0, %s4058_s30  }
 0x992   : > { %s5093_s26 = sld [smem:[#allocation28_spill]]  ;;  %s5094_s22 = sld [smem:[#allocation29_spill]] }
 0x993   : > { %s3276_s2 = sshll.u32 %s4193_s14, 7  ;;  %s619_s30 = scalar_lea.vmem [#allocation8], %s3092_s18 }
 0x994   : > { %s2969_s27 = sshll.u32 %s619_s30, 4  ;;  %s5095_s0 = sld [smem:[#allocation30_spill]]  ;;  %s4996_s27 = int_to_ptr.vmem [resolvable:$true] %s2969_s27 }
 0x995   : > { %s2951_s29 = scalar_lea.sflag [#allocation9], %s4849_s1  ;;  %s3985_s25 = scalar_lea.vmem %s4996_s27, 128 }
 0x996   : > { %p3986_p6 = scmp.ne.s32.totalorder %s4996_s27, %s3985_s25  ;;  %s4063_s14 = smov [#allocation8]  }
 0x997   : > { %s3989_s18 = sshll.u32 %s4063_s14, 4  ;;  %s3990_s18 = int_to_ptr.vmem [resolvable:$false] %s3989_s18 }
 0x998   : > { %v3272_v28 = vld [vmem:[%s5093_s26] ss:$0 sm:$0xff]  ;;  %p3987_p7 = pnand %p3986_p6, %p4210_p10  ;;  %s3991_s26 = scalar_lea.vmem %s3990_s18, 256 }
 0x999   : > { %v3273_v31 = vld [vmem:[%s5094_s22] ss:$0 sm:$0xff]  ;;  %p3992_p9 = scmp.lt.s32.totalorder %s4996_s27, %s3990_s18  ;;  %p3993_p12 = scmp.lt.s32.totalorder %s3991_s26, %s3985_s25 }
 0x99a   : > { %s4994_s5 = scalar_lea.hbm %s5095_s0, %s3276_s2  ;;  %p3988_p8 = pneg %p3987_p7 }
 0x99b   : > { %p3994_p13 = por %p3993_p12, %p3992_p9 }
 0x99d   : > { %p3995_p0 = pnand %p3994_p13, %p3988_p8 }
 0xa10   : > { %v2929_v24 = vpop.xlane.xlu0 %2928 }
 0xa11   : > { %v2930_v51 = vmul.f32 0.03125, %v2929_v24 }
 0xa13   : > { %v2931_v26 = vadd.f32 1e-05, %v2930_v51 }
 0xa15   : > { %3942 = vrsqrt.f32 %v2931_v26 }
 0xa1f   : > { %v3943_v27 = vpop.eup %3942 }
 0xa20   : > { %v2933_v30 = vmul.f32 %v3943_v27, %v2925_v21 }
 0xa22   : > { %v2940_v32 = vmul.f32 %v3272_v28, %v2933_v30 }
 0xa24   : > { %v2947_v33 = vadd.f32 %v3273_v31, %v2940_v32 }
 0xa26   : > { %v2948_v7 = vmul.f32 %v2947_v33, %v4853_v37 }
 0xa28   : > { %2949 = vst.msk [vmem:[%s619_s30] sm:$0xff] %vm696_vm1, %v2948_v7 }
 0xa29   : > { %3998 = shalt.err (!%p3995_p0)
}
 0xa2a   : > { %s3999_s1 = scalar_lea.hbm %s4994_s5, 128  ;;  %s4003_s22 = scalar_lea.hbm %s5095_s0, 256 }
 0xa2b   : > { %p4000_p1 = scmp.ne.s32.totalorder %s4994_s5, %s3999_s1  ;;  %p4004_p4 = scmp.lt.u32.totalorder %s4994_s5, %s5095_s0 }
 0xa2c   : > { %p4005_p5 = scmp.lt.u32.totalorder %s4003_s22, %s3999_s1  ;;  %p4007_p7 = scmp.lt.u32.totalorder %s3999_s1, %s4994_s5 }
 0xa2d   : > { %p4001_p2 = pnand %p4000_p1, %p4210_p10 }
 0xa2e   : > { %p4006_p6 = por %p4005_p5, %p4004_p4 }
 0xa2f   : > { %p4002_p3 = pneg %p4001_p2 }
 0xa30   : > { %p4008_p8 = por %p4007_p7, %p4006_p6 }
 0xa32   : > { %p4009_p9 = pnand %p4008_p8, %p4002_p3 }
 0xa34   : > { %4012 = shalt.err (!%p4009_p9)
}
 0xa35   : > { %3841 = dma.vmem_to_hbm [thread:$0]  (%p4210_p10), %s4996_s27, 128, %s4994_s5, %s2951_s29  }
 0xa36 PF: > { %s5096_s23 = sld [smem:[#allocation17_spill]]  ;;  %s5097_s19 = sld [smem:[#allocation15_spill]] }
 0xa3c   : > { %p3852_p12 = scmp.ge.s32.totalorder %s5096_s23, 2  ;;  %s2997_s14 = sand.u32 1, %s5097_s19  }
 0xa3d   : > { %s2998_s18 = scalar_lea.sflag [#allocation9], %s2997_s14 }
 0xa3e   : > { %p3846_p13 = pnand %p3852_p12, %p4214_p11 }
 0xa40   : > { %4032 = dma.done.wait (!%p3846_p13), %s2998_s18, 128  }
 0xa41   : > { %4034 = vsyncadd (!%p3846_p13), %s2998_s18, 4294967168  ;;  %s3007_s26 = scalar_lea.sflag [#allocation11], %s2997_s14 }
 0xa42   : > { %4036 = dma.done.wait (!%p3846_p13), %s3007_s26, 512  }
 0xa43   : > { %4038 = vsyncadd (!%p3846_p13), %s3007_s26, 4294966784  ;;  %s5099_s27 = sld [smem:[#allocation18_spill]]  ;;  %s5100_s21 = sld [smem:[#allocation16_spill]] }
 0xa44   : > { %s5101_s26 = sld [smem:[#allocation19_spill]]  ;;  %s5102_s25 = smov %s4045_s3 }
 0xa49   : > { %p40_p10 = scmp.ge.s32.totalorder %s5099_s27, 4   ;;  %s5103_s3 = smov %s5100_s21 }
 0xa4b   :  { %42 = sbr.rel (!%p40_p10) target bundleno = 28 (0x1c), region = 177 }
 0xa52   :  { %3012 = vsyncpa [#allocation9], 1 }
 0xa53   :  { %3014 = vsyncpa [#allocation9 + $0x1], 1 }
 0xa54   :  { %3015 = vsyncpa [#allocation11], 1 }
 0xa55   :  { %3017 = vsyncpa [#allocation11 + $0x1], 1 }

</bundles_post_ra>
